<compile_context>
chip_gen: v7x
topology: tpu7x:2x2x1
jax: 0.10.0
libtpu: 0.0.40
codegen_flags: <defaults>
</compile_context>

<pallas_src>
import jax
import jax.numpy as jnp
from jax.experimental import pallas as pl
from jax.experimental.pallas import tpu as pltpu


def _round_up(v, m):
    return (v + m - 1) // m * m


def _rb_kernel(xpp_ref, w1_ref, w2_ref, o_ref):
    # xpp_ref : (1, H+4, Wd+2, Cp)  f32 input, spatial halo of 2 + channel pad to Cp
    # w1_ref  : (9*Cp, Cp)          bf16 conv01 weights, row index = (kh*3 + kw)*Cp + ci
    # w2_ref  : (9*Cp, Cp)          bf16 conv02 weights, same layout
    # o_ref   : (1, H, W, Cp)       f32 output
    H, W, Cp = o_ref.shape[1], o_ref.shape[2], o_ref.shape[3]
    Hd = H + 2                       # conv01 halo-domain height
    Wd = xpp_ref.shape[2] - 2        # conv01 halo-domain width (multiple of 8)

    xpp = xpp_ref[0]                 # (H+4, Wd+2, Cp) f32
    xpp_bf = xpp.astype(jnp.bfloat16)
    w1 = w1_ref[...]
    w2 = w2_ref[...]

    # ---- conv01 over the (Hd, Wd) halo domain: single MXU contraction of depth 9*Cp ----
    # column (kw) shifts: 3 sublane slices, lane-aligned concat (chunks are Cp=128-multiples)
    cols1 = jnp.concatenate([xpp_bf[:, dx:dx + Wd, :] for dx in range(3)], axis=-1)
    # row (kh) shifts: cheap outer-dim slices, lane-aligned concat
    p1 = jnp.concatenate([cols1[dy:dy + Hd] for dy in range(3)], axis=-1)   # (Hd, Wd, 9*Cp)
    a1 = jnp.dot(p1.reshape(Hd * Wd, 9 * Cp), w1,
                 preferred_element_type=jnp.float32).reshape(Hd, Wd, Cp)

    # ---- LeakyReLU(0.2) + zero the 1-pixel halo ring ----
    # The masked result is exactly the zero-padded activation conv02 (padding=1) expects,
    # so no scratch buffer, zero-fill, or misaligned store/reload is needed.
    rr = jax.lax.broadcasted_iota(jnp.int32, (Hd, Wd, Cp), 0)
    cc = jax.lax.broadcasted_iota(jnp.int32, (Hd, Wd, Cp), 1)
    interior = (rr >= 1) & (rr <= H) & (cc >= 1) & (cc <= W)
    a1 = jnp.where(interior, jnp.maximum(a1, 0.2 * a1), 0.0)
    a1_bf = a1.astype(jnp.bfloat16)

    # ---- conv02 over the true (H, W) domain: single MXU contraction ----
    cols2 = jnp.concatenate([a1_bf[:, dx:dx + W, :] for dx in range(3)], axis=-1)
    p2 = jnp.concatenate([cols2[dy:dy + H] for dy in range(3)], axis=-1)    # (H, W, 9*Cp)
    a2 = jnp.dot(p2.reshape(H * W, 9 * Cp), w2,
                 preferred_element_type=jnp.float32).reshape(H, W, Cp)

    # ---- residual add in f32 ----
    o_ref[0] = (a2 + xpp[2:H + 2, 2:W + 2, :]).astype(o_ref.dtype)


def _prep_weight(w_oihw, Cp):
    """PyTorch Conv2d (Cout, Cin, 3, 3) -> (9*Cp, Cp) bf16, row = (kh*3+kw)*Cp + ci."""
    c_out, c_in = w_oihw.shape[0], w_oihw.shape[1]
    w = jnp.transpose(w_oihw, (2, 3, 1, 0))                       # (kh, kw, Cin, Cout)
    w = jnp.pad(w, ((0, 0), (0, 0), (0, Cp - c_in), (0, Cp - c_out)))
    return w.reshape(9 * Cp, Cp).astype(jnp.bfloat16)


def rb_forward(x_nchw, w1_oihw, w2_oihw):
    """x_nchw: (N, C, H, W) f32.  w*_oihw: (C, C, 3, 3) PyTorch Conv2d layout."""
    N, C, H, W = x_nchw.shape
    Cp = _round_up(C, 128)           # lane-dense channel dim
    Wd = _round_up(W + 2, 8)         # conv01 halo-domain width, multiple of 8 for clean reshapes
    Hd = H + 2

    # interface glue (PyTorch NCHW in/out): one transpose + one combined pad
    # (2-row/col halo for the in-kernel taps + channel pad to Cp).
    x_nhwc = jnp.transpose(x_nchw, (0, 2, 3, 1))
    xpp = jnp.pad(x_nhwc, ((0, 0), (2, 2), (2, Wd - W), (0, Cp - C)))

    w1m = _prep_weight(w1_oihw, Cp)
    w2m = _prep_weight(w2_oihw, Cp)

    out = pl.pallas_call(
        _rb_kernel,
        out_shape=jax.ShapeDtypeStruct((N, H, W, Cp), x_nchw.dtype),
        grid_spec=pltpu.PrefetchScalarGridSpec(
            num_scalar_prefetch=0,
            grid=(N,),
            in_specs=[
                pl.BlockSpec((1, H + 4, Wd + 2, Cp), lambda b: (b, 0, 0, 0)),
                pl.BlockSpec((9 * Cp, Cp), lambda b: (0, 0)),
                pl.BlockSpec((9 * Cp, Cp), lambda b: (0, 0)),
            ],
            out_specs=pl.BlockSpec((1, H, W, Cp), lambda b: (b, 0, 0, 0)),
        ),
        compiler_params=pltpu.CompilerParams(
            dimension_semantics=("parallel",)),
    )(xpp, w1m, w2m)

    return jnp.transpose(out[..., :C], (0, 3, 1, 2))   # back to NCHW


def _reference(x_nchw, w1_oihw, w2_oihw):
    """Plain-JAX reference mirroring the kernel's MXU precision:
    bf16 conv operands, f32 accumulation, f32 LeakyReLU and residual."""
    dn = jax.lax.conv_dimension_numbers(x_nchw.shape, w1_oihw.shape,
                                        ("NCHW", "OIHW", "NCHW"))
    b1 = jax.lax.conv_general_dilated(
        x_nchw.astype(jnp.bfloat16), w1_oihw.astype(jnp.bfloat16), (1, 1), "SAME",
        dimension_numbers=dn, preferred_element_type=jnp.float32)
    b1 = jnp.maximum(b1, 0.2 * b1)
    b2 = jax.lax.conv_general_dilated(
        b1.astype(jnp.bfloat16), w2_oihw.astype(jnp.bfloat16), (1, 1), "SAME",
        dimension_numbers=dn, preferred_element_type=jnp.float32)
    return b2 + x_nchw


if __name__ == "__main__":
    key = jax.random.PRNGKey(0)
    kx, k1, k2 = jax.random.split(key, 3)

    N, C, H, W = 2, 4, 16, 16
    x = jax.random.normal(kx, (N, C, H, W), dtype=jnp.float32)
    # deterministic synthetic weights, PyTorch Conv2d layout (out, in, kh, kw)
    w1 = jax.random.normal(k1, (C, C, 3, 3), dtype=jnp.float32) * 0.1
    w2 = jax.random.normal(k2, (C, C, 3, 3), dtype=jnp.float32) * 0.1

    out = jax.block_until_ready(rb_forward(x, w1, w2))
    ref = jax.block_until_ready(_reference(x, w1, w2))

    assert out.shape == (N, C, H, W)
    assert jnp.allclose(out, ref, atol=1e-2, rtol=1e-2), "mismatch vs reference"

    print("KERNEL_OK")
</pallas_src>

<mosaic_0001>
module attributes {stable_mosaic.version = 11 : i64} {
  func.func @_rb_kernel(%arg0: i32, %arg1: memref<1x20x26x128xf32, #tpu.memory_space<vmem>>, %arg2: memref<1152x128xbf16, #tpu.memory_space<vmem>>, %arg3: memref<1152x128xbf16, #tpu.memory_space<vmem>>, %arg4: memref<1x16x16x128xf32, #tpu.memory_space<vmem>>) attributes {dimension_semantics = [#tpu.dimension_semantics<parallel>], iteration_bounds = array<i64: 2>, scalar_prefetch = 0 : i64, scratch_operands = 0 : i64, tpu.core_type = #tpu.core_type<tc>, window_params = [{transform_indices = @transform_0, window_bounds = array<i64: 1, 20, 26, 128>}, {pipeline_mode = #tpu.pipeline_mode<synchronous>, transform_indices = @transform_1, window_bounds = array<i64: 1152, 128>}, {pipeline_mode = #tpu.pipeline_mode<synchronous>, transform_indices = @transform_2, window_bounds = array<i64: 1152, 128>}, {transform_indices = @transform_3, window_bounds = array<i64: 1, 16, 16, 128>}]} {
    %c0 = arith.constant 0 : index
    %c0_0 = arith.constant 0 : index
    %c0_1 = arith.constant 0 : index
    %c0_2 = arith.constant 0 : index
    %0 = vector.load %arg1[%c0, %c0_0, %c0_1, %c0_2] : memref<1x20x26x128xf32, #tpu.memory_space<vmem>>, vector<1x20x26x128xf32>
    %1 = vector.shape_cast %0 : vector<1x20x26x128xf32> to vector<20x26x128xf32>
    %2 = arith.truncf %1 : vector<20x26x128xf32> to vector<20x26x128xbf16>
    %c0_3 = arith.constant 0 : index
    %c0_4 = arith.constant 0 : index
    %3 = vector.load %arg2[%c0_3, %c0_4] : memref<1152x128xbf16, #tpu.memory_space<vmem>>, vector<1152x128xbf16>
    %c0_5 = arith.constant 0 : index
    %c0_6 = arith.constant 0 : index
    %4 = vector.load %arg3[%c0_5, %c0_6] : memref<1152x128xbf16, #tpu.memory_space<vmem>>, vector<1152x128xbf16>
    %5 = vector.extract_strided_slice %2 {offsets = [0, 0, 0], sizes = [20, 24, 128], strides = [1, 1, 1]} : vector<20x26x128xbf16> to vector<20x24x128xbf16>
    %6 = vector.extract_strided_slice %2 {offsets = [0, 1, 0], sizes = [20, 24, 128], strides = [1, 1, 1]} : vector<20x26x128xbf16> to vector<20x24x128xbf16>
    %7 = vector.extract_strided_slice %2 {offsets = [0, 2, 0], sizes = [20, 24, 128], strides = [1, 1, 1]} : vector<20x26x128xbf16> to vector<20x24x128xbf16>
    %8 = tpu.concatenate %5, %6, %7 in 2 : vector<20x24x128xbf16>, vector<20x24x128xbf16>, vector<20x24x128xbf16> -> vector<20x24x384xbf16>
    %9 = vector.extract_strided_slice %8 {offsets = [0, 0, 0], sizes = [18, 24, 384], strides = [1, 1, 1]} : vector<20x24x384xbf16> to vector<18x24x384xbf16>
    %10 = vector.extract_strided_slice %8 {offsets = [1, 0, 0], sizes = [18, 24, 384], strides = [1, 1, 1]} : vector<20x24x384xbf16> to vector<18x24x384xbf16>
    %11 = vector.extract_strided_slice %8 {offsets = [2, 0, 0], sizes = [18, 24, 384], strides = [1, 1, 1]} : vector<20x24x384xbf16> to vector<18x24x384xbf16>
    %12 = tpu.concatenate %9, %10, %11 in 2 : vector<18x24x384xbf16>, vector<18x24x384xbf16>, vector<18x24x384xbf16> -> vector<18x24x1152xbf16>
    %13 = vector.shape_cast %12 : vector<18x24x1152xbf16> to vector<432x1152xbf16>
    %cst = arith.constant dense<0.000000e+00> : vector<432x128xf32>
    %14 = tpu.matmul %13, %3, %cst {dimension_numbers = #tpu.dot_dimension_numbers<[1], [0], [0], [1], [0, 0, 1, 1], [], []>} : vector<432x1152xbf16>, vector<1152x128xbf16>, vector<432x128xf32> -> vector<432x128xf32>
    %15 = vector.shape_cast %14 : vector<432x128xf32> to vector<18x24x128xf32>
    %16 = tpu.iota {dimensions = array<i32: 0>} : vector<18x24x128xi32>
    %17 = tpu.iota {dimensions = array<i32: 1>} : vector<18x24x128xi32>
    %c1_i32 = arith.constant 1 : i32
    %18 = vector.broadcast %c1_i32 : i32 to vector<18x24x128xi32>
    %19 = arith.cmpi sge, %16, %18 : vector<18x24x128xi32>
    %c16_i32 = arith.constant 16 : i32
    %20 = vector.broadcast %c16_i32 : i32 to vector<18x24x128xi32>
    %21 = arith.cmpi sle, %16, %20 : vector<18x24x128xi32>
    %22 = arith.andi %19, %21 : vector<18x24x128xi1>
    %c1_i32_7 = arith.constant 1 : i32
    %23 = vector.broadcast %c1_i32_7 : i32 to vector<18x24x128xi32>
    %24 = arith.cmpi sge, %17, %23 : vector<18x24x128xi32>
    %25 = arith.andi %22, %24 : vector<18x24x128xi1>
    %c16_i32_8 = arith.constant 16 : i32
    %26 = vector.broadcast %c16_i32_8 : i32 to vector<18x24x128xi32>
    %27 = arith.cmpi sle, %17, %26 : vector<18x24x128xi32>
    %28 = arith.andi %25, %27 : vector<18x24x128xi1>
    %cst_9 = arith.constant 2.000000e-01 : f32
    %29 = vector.broadcast %cst_9 : f32 to vector<18x24x128xf32>
    %30 = arith.mulf %29, %15 : vector<18x24x128xf32>
    %31 = arith.maximumf %15, %30 : vector<18x24x128xf32>
    %cst_10 = arith.constant 0.000000e+00 : f32
    %32 = vector.broadcast %cst_10 : f32 to vector<18x24x128xf32>
    %33 = arith.select %28, %31, %32 : vector<18x24x128xi1>, vector<18x24x128xf32>
    %34 = arith.truncf %33 : vector<18x24x128xf32> to vector<18x24x128xbf16>
    %35 = vector.extract_strided_slice %34 {offsets = [0, 0, 0], sizes = [18, 16, 128], strides = [1, 1, 1]} : vector<18x24x128xbf16> to vector<18x16x128xbf16>
    %36 = vector.extract_strided_slice %34 {offsets = [0, 1, 0], sizes = [18, 16, 128], strides = [1, 1, 1]} : vector<18x24x128xbf16> to vector<18x16x128xbf16>
    %37 = vector.extract_strided_slice %34 {offsets = [0, 2, 0], sizes = [18, 16, 128], strides = [1, 1, 1]} : vector<18x24x128xbf16> to vector<18x16x128xbf16>
    %38 = tpu.concatenate %35, %36, %37 in 2 : vector<18x16x128xbf16>, vector<18x16x128xbf16>, vector<18x16x128xbf16> -> vector<18x16x384xbf16>
    %39 = vector.extract_strided_slice %38 {offsets = [0, 0, 0], sizes = [16, 16, 384], strides = [1, 1, 1]} : vector<18x16x384xbf16> to vector<16x16x384xbf16>
    %40 = vector.extract_strided_slice %38 {offsets = [1, 0, 0], sizes = [16, 16, 384], strides = [1, 1, 1]} : vector<18x16x384xbf16> to vector<16x16x384xbf16>
    %41 = vector.extract_strided_slice %38 {offsets = [2, 0, 0], sizes = [16, 16, 384], strides = [1, 1, 1]} : vector<18x16x384xbf16> to vector<16x16x384xbf16>
    %42 = tpu.concatenate %39, %40, %41 in 2 : vector<16x16x384xbf16>, vector<16x16x384xbf16>, vector<16x16x384xbf16> -> vector<16x16x1152xbf16>
    %43 = vector.shape_cast %42 : vector<16x16x1152xbf16> to vector<256x1152xbf16>
    %cst_11 = arith.constant dense<0.000000e+00> : vector<256x128xf32>
    %44 = tpu.matmul %43, %4, %cst_11 {dimension_numbers = #tpu.dot_dimension_numbers<[1], [0], [0], [1], [0, 0, 1, 1], [], []>} : vector<256x1152xbf16>, vector<1152x128xbf16>, vector<256x128xf32> -> vector<256x128xf32>
    %45 = vector.shape_cast %44 : vector<256x128xf32> to vector<16x16x128xf32>
    %46 = vector.extract_strided_slice %1 {offsets = [2, 2, 0], sizes = [16, 16, 128], strides = [1, 1, 1]} : vector<20x26x128xf32> to vector<16x16x128xf32>
    %47 = arith.addf %45, %46 : vector<16x16x128xf32>
    %c0_12 = arith.constant 0 : index
    %c0_13 = arith.constant 0 : index
    %c0_14 = arith.constant 0 : index
    %c0_15 = arith.constant 0 : index
    %48 = vector.load %arg4[%c0_12, %c0_13, %c0_14, %c0_15] : memref<1x16x16x128xf32, #tpu.memory_space<vmem>>, vector<1x16x16x128xf32>
    %49 = vector.shape_cast %48 : vector<1x16x16x128xf32> to vector<16x16x128xf32>
    %50 = vector.shape_cast %47 : vector<16x16x128xf32> to vector<1x16x16x128xf32>
    tpu.vector_store %arg4[%c0_12, %c0_13, %c0_14, %c0_15], %50 {strides = array<i32>} : memref<1x16x16x128xf32, #tpu.memory_space<vmem>>, vector<1x16x16x128xf32>,
    return
  }
  func.func @transform_0(%arg0: i32) -> (i32, i32, i32, i32) {
    %c0_i32 = arith.constant 0 : i32
    %c0_i32_0 = arith.constant 0 : i32
    %c0_i32_1 = arith.constant 0 : i32
    %c0_i32_2 = arith.constant 0 : i32
    return %arg0, %c0_i32, %c0_i32_0, %c0_i32_1 : i32, i32, i32, i32
  }
  func.func @transform_1(%arg0: i32) -> (i32, i32) {
    %c0_i32 = arith.constant 0 : i32
    %c0_i32_0 = arith.constant 0 : i32
    %c0_i32_1 = arith.constant 0 : i32
    return %c0_i32, %c0_i32_0 : i32, i32
  }
  func.func @transform_2(%arg0: i32) -> (i32, i32) {
    %c0_i32 = arith.constant 0 : i32
    %c0_i32_0 = arith.constant 0 : i32
    %c0_i32_1 = arith.constant 0 : i32
    return %c0_i32, %c0_i32_0 : i32, i32
  }
  func.func @transform_3(%arg0: i32) -> (i32, i32, i32, i32) {
    %c0_i32 = arith.constant 0 : i32
    %c0_i32_0 = arith.constant 0 : i32
    %c0_i32_1 = arith.constant 0 : i32
    %c0_i32_2 = arith.constant 0 : i32
    return %arg0, %c0_i32, %c0_i32_0, %c0_i32_1 : i32, i32, i32, i32
  }
}

</mosaic_0001>

<bundles_post_ra>
// kernel: tpu_custom_call.1
= control target key start
LH: loop header
LB: loop body
LE: loop exit
PB: predicated region body
PF: predicated region fallthrough
CT: control target
= control target key end

     0   :  { %8 = vsyncpa [#allocation3], 0  ;;  %s9799_s0 = inlined_call_operand.vmem [shape: f32[2,20,26,128], index: 0, kind: input, shape index: {}]   ;;  %s9800_s1 = inlined_call_operand.vmem [shape: bf16[1152,128], index: 1, kind: input, shape index: {}]   ;;  %s9801_s2 = inlined_call_operand.vmem [shape: bf16[1152,128], index: 2, kind: input, shape index: {}]   ;;  %s9802_s3 = inlined_call_operand.hbm [shape: f32[2,16,16,128], index: 3, kind: output, shape index: {}]  }
   0x1   :  { %10 = vsyncpa [#allocation3 + $0x1], 0  ;;  %s7071_s12 = smov 0   ;;  %s7073_s13 = smov 0  }
   0x2   :  { %s7075_s14 = smov 0   ;;  %s7077_s15 = smov 0  }
   0x3 LB: > { %s7092_s16 = sadd.s32 4294967295, %s7041_s15   ;;  %s5279_s17 = sadd.s32 4294967294, %s7041_s15   ;;  %s7041_s15 = sphi %s7077_s15, %s10126_s15   ;;  %s7037_s14 = sphi %s7075_s14, %s10125_s14   ;;  %s7033_s13 = sphi %s7073_s13, %s10124_s13   ;;  %s7029_s12 = sphi %s7071_s12, %s10123_s12  }
   0x4   : > { %s7096_s18 = sadd.s32 1, %s7041_s15   ;;  %s91_s19 = sadd.s32 1, %s7037_s14 }
   0x5   : > { %s88_s20 = ssub.s32 %s7041_s15, %s7096_s18  ;;  %p101_p0 = scmp.ne.s32.totalorder %s7037_s14, %s7033_s13 }
   0x6   : > { %p89_p1 = scmp.eq.s32.totalorder %s88_s20, 0  ;;  %p102_p2 = scmp.eq.s32.totalorder %s7092_s16, 1 }
   0x7   : > { %p107_p3 = scmp.ne.s32.totalorder %s7033_s13, %s7029_s12  ;;  %p108_p4 = scmp.eq.s32.totalorder %s5279_s17, 1 }
   0x8   : > { %s7107_s21 = scalar_select %p89_p1, %s7037_s14, %s91_s19  }
   0x9   : > { %p7109_p5 = por %p102_p2, %p101_p0  ;;  %p7113_p6 = por %p108_p4, %p107_p3 }
   0xa   : > { %p5282_p7 = scmp.ge.s32.totalorder %s7041_s15, 1  ;;  %p140_p8 = scmp.lt.s32.totalorder %s7041_s15, 3 }
   0xc   : > { %p141_p9 = pnand %p5282_p7, %p140_p8 }
   0xe   : > { %144 = sbr.rel (%p141_p9) target bundleno = 1797 (0x705), region = 32 }
  0x15   : > { %v6755_v0 = vld [vmem:[%s9800_s1 + $0x80] sm:$0xff]   ;;  %v9803_v1 = vmov 0   ;;  %v6756_v2 = vld [vmem:[%s9800_s1 + $0x88] sm:$0xff]   ;;  %p164_p10 = scmp.lt.s32.totalorder %s7092_s16, 1  ;;  %v6757_v3 = vld [vmem:[%s9800_s1 + $0x90] sm:$0xff]   ;;  %vm919_vm0 = vcmask 1046528  }
  0x16   : > { %2183 = vmatprep.subr.bf16.mxu0 %v9803_v1  ;;  %1934 = vmatprep.subr.bf16.mxu1 %v9803_v1  ;;  %v6758_v4 = vld [vmem:[%s9800_s1 + $0x98] sm:$0xff]   ;;  %v6759_v5 = vld [vmem:[%s9800_s1 + $0xa0] sm:$0xff]   ;;  %v6760_v9 = vld [vmem:[%s9800_s1 + $0xa8] sm:$0xff]   ;;  %vm578_vm1 = vsmask.f32 7424  ;;  %vm7045_vm2 = vmmov 0  }
  0x17   : > { %2184 = vmatpush1.bf16.msra.mxu0 %v6755_v0  ;;  %s165_s30 = scalar_select %p164_p10, %s7092_s16, 1  ;;  %v6761_v10 = vld [vmem:[%s9800_s1 + $0xb0] sm:$0xff]   ;;  %v6762_v11 = vld [vmem:[%s9800_s1 + $0xb8] sm:$0xff]   ;;  %v6763_v12 = vld [vmem:[%s9800_s1 + $0xc0] sm:$0xff]   ;;  %vm7047_vm5 = vmmov 1   ;;  %vm5026_vm7 = vcmask 1045504  }
  0x18   : > { %2185 = vmatprep.subr.bf16.mxu0 %v9803_v1  ;;  %v6764_v13 = vld [vmem:[%s9800_s1 + $0xc8] sm:$0xff]   ;;  %v6765_v14 = vld [vmem:[%s9800_s1 + $0xd0] sm:$0xff]   ;;  %v6766_v15 = vld [vmem:[%s9800_s1 + $0xd8] sm:$0xff]   ;;  %s161_s25 = sand.u32 1, %s7033_s13  }
  0x19   : > { %s6708_s6 = smul.u32 640, %s165_s30  ;;  %v6767_v16 = vld [vmem:[%s9800_s1 + $0xe0] sm:$0xff]   ;;  %v6768_v17 = vld [vmem:[%s9800_s1 + $0xe8] sm:$0xff]   ;;  %v6769_v24 = vld [vmem:[%s9800_s1 + $0xf0] sm:$0xff]   ;;  %s5283_s26 = sshll.u32 %s161_s25, 8 }
  0x1a   : > { %v6770_v27 = vld [vmem:[%s9800_s1 + $0xf8] sm:$0xff]   ;;  %v6771_v35 = vld [vmem:[%s9800_s1 + $0x100] sm:$0xff]   ;;  %v6772_v42 = vld [vmem:[%s9800_s1 + $0x108] sm:$0xff]   ;;  %s9617_s27 = scalar_lea.vmem [#allocation2], %s5283_s26 }
  0x1b   : > { %2186 = vmatpush1.bf16.msra.mxu0 %v6756_v2  ;;  %s7145_s11 = scalar_lea.vmem %s9799_s0, %s6708_s6  ;;  %v6773_v46 = vld [vmem:[%s9800_s1 + $0x110] sm:$0xff]   ;;  %v6774_v53 = vld [vmem:[%s9800_s1 + $0x118] sm:$0xff]   ;;  %v6775_v56 = vld [vmem:[%s9800_s1 + $0x120] sm:$0xff]   ;;  %s5217_s28 = sshll.u32 %s9617_s27, 4  ;;  %s9751_s28 = int_to_ptr.vmem [resolvable:$true] %s5217_s28 }
  0x1c   : > { %2187 = vmatprep.subr.bf16.mxu0 %v9803_v1  ;;  %v174_v6 = vld [vmem:[%s7145_s11 + $0x20] sm:$0xff]  ;;  %v175_v7 = vld [vmem:[%s7145_s11 + $0x28] sm:$0xff]  ;;  %v172_v20 = vld [vmem:[%s7145_s11 + $0x10] sm:$0xff]  ;;  %s6979_s5 = scalar_lea.vmem %s9751_s28, 4096  ;;  %s7048_s6 = smov [#allocation2]  }
  0x1d   : > { %v7149_v8 = vpack.c.bf16 %v175_v7, %v174_v6  ;;  %v170_v18 = vld [vmem:[%s7145_s11] sm:$0xff]  ;;  %v171_v19 = vld [vmem:[%s7145_s11 + $0x8] sm:$0xff]  ;;  %v173_v21 = vld [vmem:[%s7145_s11 + $0x18] sm:$0x3]  ;;  %p6980_p11 = scmp.ne.s32.totalorder %s9751_s28, %s6979_s5  ;;  %s6983_s7 = sshll.u32 %s7048_s6, 4  ;;  %s6984_s7 = int_to_ptr.vmem [resolvable:$false] %s6983_s7 }
  0x1e   : > { %v176_v22 = vld [vmem:[%s7145_s11 + $0x30] sm:$0xff]  ;;  %v177_v23 = vld [vmem:[%s7145_s11 + $0x38] sm:$0x3]  ;;  %v7197_v25 = vpack.c.bf16 %v171_v19, %v170_v18  ;;  %v7199_v26 = vpack.c.bf16 %v173_v21, %v172_v20  ;;  %v178_v31 = vld [vmem:[%s7145_s11 + $0x40] sm:$0xff]  ;;  %s6985_s8 = scalar_lea.vmem %s6984_s7, 8192  ;;  %p6986_p0 = scmp.lt.s32.totalorder %s9751_s28, %s6984_s7 }
  0x1f   : > { %2188 = vmatpush1.bf16.msra.mxu0 %v6757_v3  ;;  %2215 = vmatprep.mubr.bf16.mxu0 %v7149_v8  ;;  %v7205_v28 = vpack.c.bf16 %v177_v23, %v176_v22  ;;  %v179_v32 = vld [vmem:[%s7145_s11 + $0x48] sm:$0xff]  ;;  %v180_v33 = vld [vmem:[%s7145_s11 + $0x50] sm:$0xff]  ;;  %v181_v34 = vld [vmem:[%s7145_s11 + $0x58] sm:$0x3]  ;;  %v923_v36 = vrot.slane %v7149_v8, 1  ;;  %v5630_v40 = vpack.c.bf16 %v178_v31, %v176_v22  ;;  %p6981_p12 = pnand %p6980_p11, %p7109_p5  ;;  %p6987_p1 = scmp.lt.s32.totalorder %s6985_s8, %s6979_s5 }
  0x20   : > { %2189 = vmatprep.subr.bf16.mxu0 %v9803_v1  ;;  %9921 = vst [vmem:[#allocation5_spill] sm:$0xff] %v7197_v25  ;;  %9922 = vst [vmem:[#allocation6_spill] sm:$0xff] %v7199_v26  ;;  %v920_v29 = vrot.slane %v7197_v25, 1  ;;  %v921_v30 = vrot.slane %v7199_v26, 1  ;;  %v7222_v39 = vpack.c.bf16 %v179_v32, %v178_v31  ;;  %v7224_v41 = vpack.c.bf16 %v181_v34, %v180_v33  ;;  %v182_v51 = vld [vmem:[%s7145_s11 + $0x60] sm:$0xff]  ;;  %v183_v52 = vld [vmem:[%s7145_s11 + $0x68] sm:$0xff] }
  0x21   : > { %9923 = vst [vmem:[#allocation7_spill] sm:$0xff] %v7205_v28  ;;  %v7219_v37 = vrot.slane %v7205_v28, 1  ;;  %v184_v54 = vld [vmem:[%s7145_s11 + $0x70] sm:$0xff]  ;;  %v185_v55 = vld [vmem:[%s7145_s11 + $0x78] sm:$0x3]  ;;  %v7255_v58 = vpack.c.bf16 %v183_v52, %v182_v51  ;;  %v186_v62 = vld [vmem:[%s7145_s11 + $0x80] sm:$0xff]  ;;  %p6982_p13 = pneg %p6981_p12  ;;  %p6988_p2 = por %p6987_p1, %p6986_p0 }
  0x22   : > { %v922_v38 = vsel %vm919_vm0, %v920_v29, %v921_v30  ;;  %v995_v44 = vunpack.c.h.b16 %v7222_v39  ;;  %v1004_v45 = vunpack.c.l.b16 %v7224_v41  ;;  %v7258_v59 = vpack.c.bf16 %v185_v55, %v184_v54  ;;  %v187_v63 = vld [vmem:[%s7145_s11 + $0x88] sm:$0xff]  ;;  %v188_v0 = vld [vmem:[%s7145_s11 + $0x90] sm:$0xff]  ;;  %v189_v3 = vld [vmem:[%s7145_s11 + $0x98] sm:$0x3] }
  0x23   : > { %2190 = vmatpush1.bf16.msra.mxu0 %v6758_v4  ;;  %v7232_v43 = vsel %vm919_vm0, %v923_v36, %v7219_v37  ;;  %v1003_v50 = vunpack.c.l.b16 %v7219_v37  ;;  %v926_v60 = vrot.slane %v7222_v39, 1  ;;  %v7262_v61 = vrot.slane %v7224_v41, 1  ;;  %v6776_v4 = vld [vmem:[%s9800_s1 + $0x128] sm:$0xff]   ;;  %v6777_v6 = vld [vmem:[%s9800_s1 + $0x130] sm:$0xff]   ;;  %v190_v21 = vld [vmem:[%s7145_s11 + $0xa0] sm:$0xff]  ;;  %p6989_p3 = pnand %p6988_p2, %p6982_p13 }
  0x24   : > { %2191 = vmatprep.subr.bf16.mxu0 %v9803_v1  ;;  %v5287_v47 = vcombine.low %v921_v30, %v7232_v43  ;;  %v1181_v48 = vpack.c.b16 %v1004_v45, %v995_v44  ;;  %v994_v49 = vunpack.c.h.b16 %v7232_v43  ;;  %v929_v2 = vrot.slane %v7255_v58, 1  ;;  %v191_v22 = vld [vmem:[%s7145_s11 + $0xa8] sm:$0xff]  ;;  %v6781_v29 = vld [vmem:[%s9800_s1 + $0x150] sm:$0xff]   ;;  %v6782_v44 = vld [vmem:[%s9800_s1 + $0x158] sm:$0xff]  }
  0x25   : > { %v7282_v7 = vsel %vm919_vm0, %v926_v60, %v7262_v61  ;;  %v6780_v23 = vld [vmem:[%s9800_s1 + $0x148] sm:$0xff]   ;;  %v7324_v31 = vpack.c.bf16 %v191_v22, %v190_v21  ;;  %v6785_v55 = vld [vmem:[%s9800_s1 + $0x170] sm:$0xff]  }
  0x26   : > { %v1180_v57 = vpack.c.b16 %v1003_v50, %v994_v49  ;;  %9924 = vst [vmem:[#allocation8_spill] sm:$0xff] %v7282_v7  ;;  %v195_v36 = vld [vmem:[%s7145_s11 + $0xc8] sm:$0xff] }
  0x27   : > { %2192 = vmatpush1.bf16.msra.mxu0 %v6759_v5  ;;  %v7275_v5 = vrot.slane %v7258_v59, 1 }
  0x28   : > { %2193 = vmatprep.subr.bf16.mxu0 %v9803_v1 }
  0x29   : > { %v1015_v20 = vunpack.c.l.b16 %v7275_v5 }
  0x2b   : > { %2194 = vmatpush1.bf16.msra.mxu0 %v6760_v9  ;;  %v7284_v9 = vpack.c.bf16 %v187_v63, %v186_v62  ;;  %v198_v63 = vld [vmem:[%s7145_s11 + $0xe0] sm:$0xff] }
  0x2c   : > { %2195 = vmatprep.subr.bf16.mxu0 %v9803_v1 }
  0x2d   : > { %v932_v33 = vrot.slane %v7284_v9, 1 }
  0x2f   : > { %2196 = vmatpush1.bf16.msra.mxu0 %v6761_v10  ;;  %v5632_v10 = vpack.c.bf16 %v186_v62, %v184_v54  ;;  %v6784_v54 = vld [vmem:[%s9800_s1 + $0x168] sm:$0xff]  }
  0x30   : > { %2197 = vmatprep.subr.bf16.mxu0 %v9803_v1 }
  0x33   : > { %2198 = vmatpush1.bf16.msra.mxu0 %v6762_v11  ;;  %v7286_v11 = vpack.c.bf16 %v189_v3, %v188_v0  ;;  %v199_v0 = vld [vmem:[%s7145_s11 + $0xe8] sm:$0xff]  ;;  %v6786_v3 = vld [vmem:[%s9800_s1 + $0x178] sm:$0xff]  }
  0x34   : > { %2199 = vmatprep.subr.bf16.mxu0 %v9803_v1 }
  0x35   : > { %v7332_v34 = vrot.slane %v7286_v11, 1 }
  0x37   : > { %2200 = vmatpush1.bf16.msra.mxu0 %v6763_v12  ;;  %v6778_v12 = vld [vmem:[%s9800_s1 + $0x138] sm:$0xff]  }
  0x38   : > { %2201 = vmatprep.subr.bf16.mxu0 %v9803_v1 }
  0x3b   : > { %2202 = vmatpush1.bf16.msra.mxu0 %v6764_v13  ;;  %v7295_v13 = vsel %vm919_vm0, %v929_v2, %v7275_v5  ;;  %v200_v2 = vld [vmem:[%s7145_s11 + $0xf0] sm:$0xff] }
  0x3c   : > { %2203 = vmatprep.subr.bf16.mxu0 %v9803_v1  ;;  %v1012_v19 = vunpack.c.h.b16 %v7295_v13 }
  0x3e   : > { %v7322_v30 = vpack.c.b16 %v1015_v20, %v1012_v19  ;;  %v204_v19 = vld [vmem:[%s7145_s11 + $0x110] sm:$0xff]  ;;  %v205_v20 = vld [vmem:[%s7145_s11 + $0x118] sm:$0x3] }
  0x3f   : > { %2204 = vmatpush1.bf16.msra.mxu0 %v6765_v14  ;;  %v1019_v14 = vunpack.c.h.b16 %v7284_v9 }
  0x40   : > { %2205 = vmatprep.subr.bf16.mxu0 %v9803_v1  ;;  %9926 = vst [vmem:[#allocation10_spill] sm:$0xff] %v7322_v30 }
  0x43   : > { %2206 = vmatpush1.bf16.msra.mxu0 %v6766_v15  ;;  %v1022_v15 = vunpack.c.l.b16 %v7286_v11 }
  0x44   : > { %2207 = vmatprep.subr.bf16.mxu0 %v9803_v1 }
  0x45   : > { %v1199_v18 = vpack.c.b16 %v1022_v15, %v1019_v14  ;;  %v7395_v14 = vpack.c.bf16 %v199_v0, %v198_v63  ;;  %v210_v0 = vld [vmem:[%s7145_s11 + $0x140] sm:$0xff] }
  0x47   : > { %2208 = vmatpush1.bf16.msra.mxu0 %v6767_v16  ;;  %v6779_v16 = vld [vmem:[%s9800_s1 + $0x140] sm:$0xff]   ;;  %v941_v21 = vrot.slane %v7395_v14, 1 }
  0x48   : > { %2209 = vmatprep.subr.bf16.mxu0 %v9803_v1 }
  0x4b   : > { %2210 = vmatpush1.bf16.msra.mxu0 %v6768_v17  ;;  %v7305_v17 = vcombine.low %v7262_v61, %v7295_v13 }
  0x4c   : > { %2211 = vmatprep.subr.bf16.mxu0 %v9803_v1 }
  0x4d   : > { %9925 = vst [vmem:[#allocation9_spill] sm:$0xff] %v7305_v17 }
  0x4f   : > { %2212 = vmatpush1.bf16.msra.mxu0 %v6769_v24  ;;  %v192_v24 = vld [vmem:[%s7145_s11 + $0xb0] sm:$0xff] }
  0x50   : > { %2213 = vmatprep.subr.bf16.mxu0 %v9803_v1 }
  0x53   : > { %2214 = vmatpush1.bf16.msra.mxu0 %v6770_v27  ;;  %v193_v27 = vld [vmem:[%s7145_s11 + $0xb8] sm:$0x3] }
  0x54   : > { %2432 = vmatprep.subr.bf16.mxu0 %v9803_v1  ;;  %v7327_v32 = vpack.c.bf16 %v193_v27, %v192_v24 }
  0x56   : > { %2216 = vmatmul.mubr.bf16.vlgmr.msra.gmra.mrb[0].mxu0 %v922_v38  ;;  %v196_v38 = vld [vmem:[%s7145_s11 + $0xd0] sm:$0xff]  ;;  %v7345_v45 = vrot.slane %v7327_v32, 1 }
  0x57   : > { %2433 = vmatpush1.bf16.msra.mxu0 %v6771_v35  ;;  %2223 = vmatprep.mubr.bf16.mxu0 %v5630_v40  ;;  %v194_v35 = vld [vmem:[%s7145_s11 + $0xc0] sm:$0xff]  ;;  %v935_v40 = vrot.slane %v7324_v31, 1 }
  0x58   : > { %2434 = vmatprep.subr.bf16.mxu0 %v9803_v1  ;;  %v5634_v49 = vpack.c.bf16 %v194_v35, %v192_v24  ;;  %v1033_v62 = vunpack.c.l.b16 %v7345_v45 }
  0x59   : > { %v7362_v51 = vsel %vm919_vm0, %v935_v40, %v7345_v45 }
  0x5a   : > { %v1030_v60 = vunpack.c.h.b16 %v7362_v51 }
  0x5b   : > { %2435 = vmatpush1.bf16.msra.mxu0 %v6772_v42  ;;  %v197_v42 = vld [vmem:[%s7145_s11 + $0xd8] sm:$0x3] }
  0x5c   : > { %2436 = vmatprep.subr.bf16.mxu0 %v9803_v1  ;;  %v7356_v50 = vpack.c.bf16 %v197_v42, %v196_v38 }
  0x5e   : > { %2224 = vmatmul.mubr.bf16.gmra.mrb[4].mxu0 %v5287_v47  ;;  %v7352_v47 = vsel %vm919_vm0, %v932_v33, %v7332_v34 }
  0x5f   : > { %2231 = vmatprep.mubr.bf16.mxu0 %v1181_v48  ;;  %2437 = vmatpush1.bf16.msra.mxu0 %v6773_v46  ;;  %v6783_v46 = vld [vmem:[%s9800_s1 + $0x160] sm:$0xff]   ;;  %9927 = vst [vmem:[#allocation11_spill] sm:$0xff] %v7352_v47  ;;  %v7354_v48 = vpack.c.bf16 %v195_v36, %v194_v35 }
  0x60   : > { %2438 = vmatprep.subr.bf16.mxu0 %v9803_v1 }
  0x61   : > { %v1037_v52 = vunpack.c.h.b16 %v7354_v48 }
  0x63   : > { %2439 = vmatpush1.bf16.msra.mxu0 %v6774_v53  ;;  %v1040_v53 = vunpack.c.l.b16 %v7356_v50 }
  0x64   : > { %2440 = vmatprep.subr.bf16.mxu0 %v9803_v1 }
  0x66   : > { %2232 = vmatmul.mubr.bf16.gmra.mrb[8].mxu0 %v1180_v57  ;;  %v1217_v57 = vpack.c.b16 %v1040_v53, %v1037_v52 }
  0x67   : > { %2239 = vmatprep.mubr.bf16.mxu0 %v7255_v58  ;;  %2441 = vmatpush1.bf16.msra.mxu0 %v6775_v56  ;;  %v7375_v56 = vcombine.low %v7332_v34, %v7362_v51 }
  0x68   : > { %2442 = vmatprep.subr.bf16.mxu0 %v9803_v1 }
  0x69   : > { %9928 = vst [vmem:[#allocation12_spill] sm:$0xff] %v7375_v56 }
  0x6b   : > { %2443 = vmatpush1.bf16.msra.mxu0 %v6776_v4  ;;  %v201_v4 = vld [vmem:[%s7145_s11 + $0xf8] sm:$0x3] }
  0x6c   : > { %2444 = vmatprep.subr.bf16.mxu0 %v9803_v1  ;;  %v7397_v15 = vpack.c.bf16 %v201_v4, %v200_v2 }
  0x6e   : > { %2240 = vmatmul.mubr.bf16.gmra.mrb[12].mxu0 %v7282_v7  ;;  %v7408_v22 = vrot.slane %v7397_v15, 1 }
  0x6f   : > { %2247 = vmatprep.mubr.bf16.mxu0 %v5632_v10  ;;  %2445 = vmatpush1.bf16.msra.mxu0 %v6777_v6  ;;  %v7389_v6 = vpack.c.b16 %v1033_v62, %v1030_v60  ;;  %v938_v10 = vrot.slane %v7354_v48, 1  ;;  %v211_v62 = vld [vmem:[%s7145_s11 + $0x148] sm:$0xff] }
  0x70   : > { %2446 = vmatprep.subr.bf16.mxu0 %v9803_v1  ;;  %v7421_v33 = vsel %vm919_vm0, %v941_v21, %v7408_v22 }
  0x71   : > { %9929 = vst [vmem:[#allocation13_spill] sm:$0xff] %v7389_v6  ;;  %v1048_v42 = vunpack.c.h.b16 %v7421_v33 }
  0x73   : > { %2447 = vmatpush1.bf16.msra.mxu0 %v6778_v12  ;;  %v7393_v12 = vrot.slane %v7356_v50, 1 }
  0x74   : > { %2448 = vmatprep.subr.bf16.mxu0 %v9803_v1 }
  0x75   : > { %v7427_v38 = vcombine.low %v7393_v12, %v7421_v33 }
  0x76   : > { %2248 = vmatmul.mubr.bf16.gmra.mrb[16].mxu0 %v7305_v17 }
  0x77   : > { %2255 = vmatprep.mubr.bf16.mxu0 %v1199_v18  ;;  %2449 = vmatpush1.bf16.msra.mxu0 %v6779_v16  ;;  %v202_v16 = vld [vmem:[%s7145_s11 + $0x100] sm:$0xff]  ;;  %v203_v18 = vld [vmem:[%s7145_s11 + $0x108] sm:$0xff]  ;;  %9931 = vst [vmem:[#allocation15_spill] sm:$0xff] %v7427_v38 }
  0x78   : > { %2450 = vmatprep.subr.bf16.mxu0 %v9803_v1  ;;  %v7414_v24 = vpack.c.bf16 %v203_v18, %v202_v16  ;;  %v5636_v27 = vpack.c.bf16 %v202_v16, %v200_v2  ;;  %v212_v2 = vld [vmem:[%s7145_s11 + $0x150] sm:$0xff] }
  0x7a   : > { %v1055_v35 = vunpack.c.h.b16 %v7414_v24 }
  0x7b   : > { %2451 = vmatpush1.bf16.msra.mxu0 %v6780_v23  ;;  %v7412_v23 = vsel %vm919_vm0, %v938_v10, %v7393_v12  ;;  %v7456_v10 = vpack.c.bf16 %v211_v62, %v210_v0  ;;  %v217_v62 = vld [vmem:[%s7145_s11 + $0x178] sm:$0x3] }
  0x7c   : > { %2452 = vmatprep.subr.bf16.mxu0 %v9803_v1  ;;  %9930 = vst [vmem:[#allocation14_spill] sm:$0xff] %v7412_v23 }
  0x7e   : > { %2256 = vmatmul.mubr.bf16.gmra.mrb[20].mxu0 %v7322_v30 }
  0x7f   : > { %2263 = vmatprep.mubr.bf16.mxu0 %v7324_v31  ;;  %2453 = vmatpush1.bf16.msra.mxu0 %v6781_v29  ;;  %v7416_v29 = vpack.c.bf16 %v205_v20, %v204_v19 }
  0x80   : > { %2454 = vmatprep.subr.bf16.mxu0 %v9803_v1 }
  0x81   : > { %v1058_v36 = vunpack.c.l.b16 %v7416_v29  ;;  %v7443_v60 = vrot.slane %v7416_v29, 1 }
  0x83   : > { %2455 = vmatpush1.bf16.msra.mxu0 %v6782_v44  ;;  %v1235_v40 = vpack.c.b16 %v1058_v36, %v1055_v35  ;;  %v1051_v44 = vunpack.c.l.b16 %v7408_v22 }
  0x84   : > { %2456 = vmatprep.subr.bf16.mxu0 %v9803_v1 }
  0x85   : > { %v7434_v52 = vpack.c.b16 %v1051_v44, %v1048_v42 }
  0x86   : > { %2264 = vmatmul.mubr.bf16.gmra.mrb[24].mxu0 %v7352_v47 }
  0x87   : > { %2271 = vmatprep.mubr.bf16.mxu0 %v5634_v49  ;;  %2457 = vmatpush1.bf16.msra.mxu0 %v6783_v46  ;;  %v206_v46 = vld [vmem:[%s7145_s11 + $0x120] sm:$0xff]  ;;  %v207_v49 = vld [vmem:[%s7145_s11 + $0x128] sm:$0xff]  ;;  %9932 = vst [vmem:[#allocation16_spill] sm:$0xff] %v7434_v52 }
  0x88   : > { %2458 = vmatprep.subr.bf16.mxu0 %v9803_v1  ;;  %v7436_v53 = vpack.c.bf16 %v207_v49, %v206_v46  ;;  %v214_v46 = vld [vmem:[%s7145_s11 + $0x160] sm:$0xff]  ;;  %v215_v49 = vld [vmem:[%s7145_s11 + $0x168] sm:$0xff] }
  0x8a   : > { %v947_v18 = vrot.slane %v7436_v53, 1 }
  0x8b   : > { %2459 = vmatpush1.bf16.msra.mxu0 %v6784_v54  ;;  %v208_v54 = vld [vmem:[%s7145_s11 + $0x130] sm:$0xff] }
  0x8c   : > { %2460 = vmatprep.subr.bf16.mxu0 %v9803_v1  ;;  %v5638_v16 = vpack.c.bf16 %v210_v0, %v208_v54  ;;  %v950_v0 = vrot.slane %v7456_v10, 1 }
  0x8e   : > { %2272 = vmatmul.mubr.bf16.gmra.mrb[28].mxu0 %v7375_v56  ;;  %v228_v56 = vld [vmem:[%s7145_s11 + $0x1d0] sm:$0xff] }
  0x8f   : > { %2279 = vmatprep.mubr.bf16.mxu0 %v1217_v57  ;;  %2461 = vmatpush1.bf16.msra.mxu0 %v6785_v55  ;;  %v209_v55 = vld [vmem:[%s7145_s11 + $0x138] sm:$0x3]  ;;  %v944_v57 = vrot.slane %v7414_v24, 1 }
  0x90   : > { %2462 = vmatprep.subr.bf16.mxu0 %v9803_v1  ;;  %v7447_v63 = vpack.c.bf16 %v209_v55, %v208_v54  ;;  %v7482_v55 = vpack.c.bf16 %v215_v49, %v214_v46 }
  0x91   : > { %v7454_v4 = vsel %vm919_vm0, %v944_v57, %v7443_v60  ;;  %v216_v57 = vld [vmem:[%s7145_s11 + $0x170] sm:$0xff] }
  0x92   : > { %9933 = vst [vmem:[#allocation17_spill] sm:$0xff] %v7454_v4  ;;  %v7460_v19 = vrot.slane %v7447_v63, 1  ;;  %v953_v46 = vrot.slane %v7482_v55, 1 }
  0x93   : > { %2463 = vmatpush1.bf16.msra.mxu0 %v6786_v3  ;;  %v213_v3 = vld [vmem:[%s7145_s11 + $0x158] sm:$0x3] }
  0x94   : > { %2681 = vmatprep.subr.bf16.mxu0 %v9803_v1  ;;  %v7462_v20 = vpack.c.bf16 %v213_v3, %v212_v2  ;;  %v7467_v21 = vsel %vm919_vm0, %v947_v18, %v7460_v19  ;;  %v1069_v44 = vunpack.c.l.b16 %v7460_v19  ;;  %v218_v3 = vld [vmem:[%s7145_s11 + $0x180] sm:$0xff]  ;;  %v219_v18 = vld [vmem:[%s7145_s11 + $0x188] sm:$0xff] }
  0x95   : > { %v7473_v36 = vcombine.low %v7443_v60, %v7467_v21  ;;  %v1066_v42 = vunpack.c.h.b16 %v7467_v21 }
  0x96   : > { %2280 = vmatmul.mubr.bf16.gmra.mrb[32].mxu0 %v7389_v6  ;;  %v1076_v35 = vunpack.c.l.b16 %v7462_v20  ;;  %v7489_v2 = vrot.slane %v7462_v20, 1 }
  0x97   : > { %2287 = vmatprep.mubr.bf16.mxu0 %v7395_v14  ;;  %9934 = vst [vmem:[#allocation18_spill] sm:$0xff] %v7473_v36  ;;  %v7480_v54 = vpack.c.b16 %v1069_v44, %v1066_v42  ;;  %v5640_v42 = vpack.c.bf16 %v218_v3, %v216_v57  ;;  %v7502_v44 = vpack.c.bf16 %v219_v18, %v218_v3 }
  0x99   : > { %9935 = vst [vmem:[#allocation19_spill] sm:$0xff] %v7480_v54 }
  0x9e   : > { %2288 = vmatmul.mubr.bf16.gmra.mrb[36].mxu0 %v7412_v23 }
  0x9f   : > { %2295 = vmatprep.mubr.bf16.mxu0 %v5636_v27  ;;  %v1073_v27 = vunpack.c.h.b16 %v7456_v10 }
  0xa6   : > { %2296 = vmatmul.mubr.bf16.gmra.mrb[40].mxu0 %v7427_v38  ;;  %v225_v38 = vld [vmem:[%s7145_s11 + $0x1b8] sm:$0x3] }
  0xa7   : > { %2303 = vmatprep.mubr.bf16.mxu0 %v1235_v40  ;;  %v1253_v40 = vpack.c.b16 %v1076_v35, %v1073_v27  ;;  %v220_v27 = vld [vmem:[%s7145_s11 + $0x190] sm:$0xff]  ;;  %v221_v35 = vld [vmem:[%s7145_s11 + $0x198] sm:$0x3] }
  0xa8   : > { %v7508_v1 = vpack.c.bf16 %v221_v35, %v220_v27 }
  0xae   : > { %2304 = vmatmul.mubr.bf16.gmra.mrb[44].mxu0 %v7434_v52  ;;  %v224_v52 = vld [vmem:[%s7145_s11 + $0x1b0] sm:$0xff] }
  0xaf   : > { %2311 = vmatprep.mubr.bf16.mxu0 %v7436_v53  ;;  %v7539_v6 = vpack.c.bf16 %v225_v38, %v224_v52 }
  0xb1   : > { %9940 = vst [vmem:[#allocation24_spill] sm:$0xff] %v7539_v6  ;;  %v7552_v30 = vrot.slane %v7539_v6, 1  ;;  %v232_v6 = vld [vmem:[%s7145_s11 + $0x1f0] sm:$0xff] }
  0xb3   : > { %9943 = vst [vmem:[#allocation27_spill] sm:$0xff] %v7552_v30 }
  0xb6   : > { %2312 = vmatmul.mubr.bf16.gmra.mrb[48].mxu0 %v7454_v4 }
  0xb7   : > { %2319 = vmatprep.mubr.bf16.mxu0 %v5638_v16  ;;  %v7493_v16 = vpack.c.bf16 %v217_v62, %v216_v57  ;;  %v1091_v57 = vunpack.c.h.b16 %v7502_v44 }
  0xb9   : > { %v7506_v49 = vrot.slane %v7493_v16, 1 }
  0xbb   : > { %v7513_v62 = vsel %vm919_vm0, %v953_v46, %v7506_v49  ;;  %v1087_v35 = vunpack.c.l.b16 %v7506_v49  ;;  %v223_v46 = vld [vmem:[%s7145_s11 + $0x1a8] sm:$0xff] }
  0xbc   : > { %v7519_v3 = vcombine.low %v7489_v2, %v7513_v62  ;;  %v1084_v27 = vunpack.c.h.b16 %v7513_v62 }
  0xbe   : > { %2320 = vmatmul.mubr.bf16.gmra.mrb[52].mxu0 %v7473_v36  ;;  %9937 = vst [vmem:[#allocation21_spill] sm:$0xff] %v7519_v3 }
  0xbf   : > { %2327 = vmatprep.mubr.bf16.mxu0 %v1253_v40  ;;  %v7500_v40 = vsel %vm919_vm0, %v950_v0, %v7489_v2  ;;  %v1094_v0 = vunpack.c.l.b16 %v7508_v1 }
  0xc0   : > { %9936 = vst [vmem:[#allocation20_spill] sm:$0xff] %v7500_v40 }
  0xc1   : > { %v1271_v18 = vpack.c.b16 %v1094_v0, %v1091_v57  ;;  %v956_v57 = vrot.slane %v7502_v44, 1  ;;  %v7535_v0 = vrot.slane %v7508_v1, 1 }
  0xc6   : > { %2328 = vmatmul.mubr.bf16.gmra.mrb[56].mxu0 %v7480_v54  ;;  %v7526_v54 = vpack.c.b16 %v1087_v35, %v1084_v27  ;;  %v229_v27 = vld [vmem:[%s7145_s11 + $0x1d8] sm:$0x3]  ;;  %v7546_v35 = vsel %vm919_vm0, %v956_v57, %v7535_v0 }
  0xc7   : > { %2335 = vmatprep.mubr.bf16.mxu0 %v7482_v55  ;;  %9941 = vst [vmem:[#allocation25_spill] sm:$0xff] %v7546_v35  ;;  %v7554_v17 = vpack.c.bf16 %v229_v27, %v228_v56  ;;  %v1105_v27 = vunpack.c.l.b16 %v7552_v30 }
  0xc8   : > { %9938 = vst [vmem:[#allocation22_spill] sm:$0xff] %v7526_v54 }
  0xce   : > { %2336 = vmatmul.mubr.bf16.gmra.mrb[60].mxu0 %v7500_v40 }
  0xcf   : > { %2343 = vmatprep.mubr.bf16.mxu0 %v5640_v42  ;;  %v222_v42 = vld [vmem:[%s7145_s11 + $0x1a0] sm:$0xff] }
  0xd0   : > { %v7528_v36 = vpack.c.bf16 %v223_v46, %v222_v42 }
  0xd2   : > { %9939 = vst [vmem:[#allocation23_spill] sm:$0xff] %v7528_v36 }
  0xd6   : > { %2344 = vmatmul.mubr.bf16.gmra.mrb[64].mxu0 %v7519_v3  ;;  %v226_v3 = vld [vmem:[%s7145_s11 + $0x1c0] sm:$0xff] }
  0xd7   : > { %2351 = vmatprep.mubr.bf16.mxu0 %v1271_v18  ;;  %v227_v18 = vld [vmem:[%s7145_s11 + $0x1c8] sm:$0xff]  ;;  %v5642_v42 = vpack.c.bf16 %v226_v3, %v224_v52 }
  0xd8   : > { %v7548_v46 = vpack.c.bf16 %v227_v18, %v226_v3  ;;  %v1112_v3 = vunpack.c.l.b16 %v7554_v17 }
  0xda   : > { %9942 = vst [vmem:[#allocation26_spill] sm:$0xff] %v7548_v46  ;;  %v1109_v52 = vunpack.c.h.b16 %v7548_v46 }
  0xdc   : > { %v1289_v18 = vpack.c.b16 %v1112_v3, %v1109_v52  ;;  %v962_v52 = vrot.slane %v7548_v46, 1  ;;  %v7582_v3 = vrot.slane %v7554_v17, 1 }
  0xde   : > { %2352 = vmatmul.mubr.bf16.gmra.mrb[68].mxu0 %v7526_v54  ;;  %v959_v54 = vrot.slane %v7528_v36, 1  ;;  %9947 = vst [vmem:[#allocation31_spill] sm:$0xff] %v7582_v3 }
  0xdf   : > { %2359 = vmatprep.mubr.bf16.mxu0 %v7528_v36  ;;  %v233_v36 = vld [vmem:[%s7145_s11 + $0x1f8] sm:$0x3] }
  0xe0   : > { %v7559_v38 = vsel %vm919_vm0, %v959_v54, %v7552_v30  ;;  %v231_v54 = vld [vmem:[%s7145_s11 + $0x1e8] sm:$0xff] }
  0xe1   : > { %v7565_v57 = vcombine.low %v7535_v0, %v7559_v38  ;;  %v1102_v56 = vunpack.c.h.b16 %v7559_v38 }
  0xe3   : > { %9944 = vst [vmem:[#allocation28_spill] sm:$0xff] %v7565_v57  ;;  %v7572_v26 = vpack.c.b16 %v1105_v27, %v1102_v56  ;;  %v7591_v56 = vsel %vm919_vm0, %v962_v52, %v7582_v3 }
  0xe4   : > { %9950 = vst [vmem:[#allocation34_spill] sm:$0xff] %v7591_v56 }
  0xe5   : > { %9945 = vst [vmem:[#allocation29_spill] sm:$0xff] %v7572_v26 }
  0xe6   : > { %2360 = vmatmul.mubr.bf16.gmra.mrb[72].mxu0 %v7546_v35 }
  0xe7   : > { %2367 = vmatprep.mubr.bf16.mxu0 %v5642_v42  ;;  %v230_v42 = vld [vmem:[%s7145_s11 + $0x1e0] sm:$0xff] }
  0xe8   : > { %v7574_v25 = vpack.c.bf16 %v231_v54, %v230_v42 }
  0xea   : > { %9946 = vst [vmem:[#allocation30_spill] sm:$0xff] %v7574_v25  ;;  %v965_v42 = vrot.slane %v7574_v25, 1 }
  0xee   : > { %2368 = vmatmul.mubr.bf16.gmra.mrb[76].mxu0 %v7565_v57  ;;  %v7584_v57 = vpack.c.bf16 %v233_v36, %v232_v6 }
  0xef   : > { %2375 = vmatprep.mubr.bf16.mxu0 %v1289_v18  ;;  %v7587_v18 = vld [vmem:[%s7145_s11 + $0x200] sm:$0xff] }
  0xf0   : > { %9948 = vst [vmem:[#allocation32_spill] sm:$0xff] %v7584_v57  ;;  %9949 = vst [vmem:[#allocation33_spill] sm:$0xff] %v7587_v18  ;;  %v5644_v27 = vpack.c.bf16 %v7587_v18, %v232_v6  ;;  %v7596_v54 = vrot.slane %v7584_v57, 1  ;;  %v602_v6 = vshll.u32 %v7205_v28, 16  ;;  %v612_v57 = vshll.u32 %v7222_v39, 16 }
  0xf2   : > { %9951 = vst [vmem:[#allocation35_spill] sm:$0xff] %v7596_v54  ;;  %v7601_v36 = vsel %vm919_vm0, %v965_v42, %v7596_v54  ;;  %v610_v54 = vshrl.u32 %v7222_v39, 16  ;;  %v614_v30 = vrot.slane %v612_v57, 1 }
  0xf3   : > { %9952 = vst [vmem:[#allocation36_spill] sm:$0xff] %v7601_v36  ;;  %v7606_v52 = vcombine.low %v7582_v3, %v7601_v36  ;;  %v606_v36 = vshrl.u32 %v7205_v28, 16  ;;  %v1006_v28 = vunpack.c.l.b16 %v7262_v61 }
  0xf5   : > { %9953 = vst [vmem:[#allocation37_spill] sm:$0xff] %v7606_v52 }
  0xf6   : > { %2376 = vmatmul.mubr.bf16.gmra.mrb[80].mxu0 %v7572_v26  ;;  %v597_v26 = vshll.u32 %v7149_v8, 16 }
  0xf7   : > { %2383 = vmatprep.mubr.bf16.mxu0 %v7574_v25  ;;  %v595_v25 = vshrl.u32 %v7149_v8, 16 }
  0xf8   : > { %v599_v18 = vrot.slane %v597_v26, 1  ;;  %v6787_v26 = vld [vmem:[%s9800_s1 + $0x180] sm:$0xff]  }
  0xfa   : > { %v600_v42 = vor.u32 %v599_v18, %v595_v25  ;;  %v621_v18 = vshrl.u32 %v7224_v41, 16 }
  0xfe   : > { %2384 = vmatmul.mubr.bf16.gmra.mrb[84].mxu0 %v7591_v56  ;;  %v617_v56 = vshll.u32 %v7224_v41, 16 }
  0xff   : > { %2391 = vmatprep.mubr.bf16.mxu0 %v5644_v27  ;;  %v604_v27 = vrot.slane %v602_v6, 1  ;;  %v5290_v6 = vcombine.low %v7219_v37, %v7282_v7  ;;  %v6788_v37 = vld [vmem:[%s9800_s1 + $0x188] sm:$0xff]  }
 0x100   : > { %v619_v25 = vrot.slane %v617_v56, 1 }
 0x101   : > { %v7617_v3 = vsel %vm578_vm1, %v600_v42, %v604_v27  ;;  %v7625_v57 = vor.u32 %v606_v36, %v604_v27  ;;  %v6789_v36 = vld [vmem:[%s9800_s1 + $0x190] sm:$0xff]  }
 0x106   : > { %2392 = vmatmul.mubr.bf16.gmra.mrb[88].mxu0 %v7606_v52  ;;  %v997_v52 = vunpack.c.h.b16 %v7282_v7 }
 0x107   : > { %2464 = vmatprep.mubr.bf16.mxu0 %v7232_v43  ;;  %v615_v43 = vor.u32 %v614_v30, %v610_v54  ;;  %v9954_v30 = vmov 0   ;;  %v7639_v54 = vor.u32 %v621_v18, %v619_v25  ;;  %v642_v18 = vshll.u32 %v7284_v9, 16 }
 0x108   : > { %v1183_v41 = vpack.c.b16 %v1006_v28, %v997_v52  ;;  %v6790_v28 = vld [vmem:[%s9800_s1 + $0x198] sm:$0xff]  }
 0x109   : > { %v7629_v42 = vsel %vm578_vm1, %v615_v43, %v619_v25  ;;  %v1005_v27 = vunpack.c.l.b16 %v7639_v54  ;;  %v625_v43 = vshrl.u32 %v7255_v58, 16 }
 0x10a   : > { %v5289_v56 = vcombine.low %v7625_v57, %v7629_v42  ;;  %v996_v61 = vunpack.c.h.b16 %v7629_v42 }
 0x10c   : > { %v1182_v52 = vpack.c.b16 %v1005_v27, %v996_v61  ;;  %v644_v61 = vrot.slane %v642_v18, 1  ;;  %v647_v27 = vshll.u32 %v7286_v11, 16 }
 0x10e   : > { %2465 = vmatmul.mubr.bf16.vlgmr.msra.gmra.mrb[92].mxu0 %v7617_v3 }
 0x10f   : > { %2682 = vmatpush1.bf16.msra.mxu0 %v6787_v26  ;;  %2472 = vmatprep.mubr.bf16.mxu0 %v5290_v6  ;;  %v627_v26 = vshll.u32 %v7255_v58, 16  ;;  %v632_v6 = vshll.u32 %v7258_v59, 16 }
 0x110   : > { %2683 = vmatprep.subr.bf16.mxu0 %v9954_v30 }
 0x111   : > { %v629_v25 = vrot.slane %v627_v26, 1  ;;  %v6792_v26 = vld [vmem:[%s9800_s1 + $0x1a8] sm:$0xff]  }
 0x113   : > { %2684 = vmatpush1.bf16.msra.mxu0 %v6788_v37  ;;  %v6791_v37 = vld [vmem:[%s9800_s1 + $0x1a0] sm:$0xff]  }
 0x114   : > { %2685 = vmatprep.subr.bf16.mxu0 %v9954_v30 }
 0x116   : > { %2473 = vmatmul.mubr.bf16.gmra.mrb[4].mxu0 %v5289_v56  ;;  %v634_v56 = vrot.slane %v632_v6, 1 }
 0x117   : > { %2480 = vmatprep.mubr.bf16.mxu0 %v1183_v41  ;;  %2686 = vmatpush1.bf16.msra.mxu0 %v6789_v36  ;;  %v630_v41 = vor.u32 %v629_v25, %v625_v43  ;;  %v640_v36 = vshrl.u32 %v7284_v9, 16  ;;  %v649_v43 = vrot.slane %v647_v27, 1  ;;  %v6793_v25 = vld [vmem:[%s9800_s1 + $0x1b0] sm:$0xff]  }
 0x118   : > { %2687 = vmatprep.subr.bf16.mxu0 %v9954_v30 }
 0x119   : > { %v645_v6 = vor.u32 %v644_v61, %v640_v36  ;;  %v1024_v36 = vunpack.c.l.b16 %v7332_v34  ;;  %v6794_v61 = vld [vmem:[%s9800_s1 + $0x1b8] sm:$0xff]   ;;  %v6795_v34 = vld [vmem:[%s9800_s1 + $0x1c0] sm:$0xff]  }
 0x11b   : > { %2688 = vmatpush1.bf16.msra.mxu0 %v6790_v28  ;;  %v636_v28 = vshrl.u32 %v7258_v59, 16 }
 0x11c   : > { %2689 = vmatprep.subr.bf16.mxu0 %v9954_v30 }
 0x11d   : > { %v7677_v18 = vor.u32 %v636_v28, %v634_v56 }
 0x11e   : > { %2481 = vmatmul.mubr.bf16.gmra.mrb[8].mxu0 %v1182_v52  ;;  %v7668_v52 = vsel %vm578_vm1, %v630_v41, %v634_v56  ;;  %v7681_v41 = vsel %vm578_vm1, %v645_v6, %v649_v43 }
 0x11f   : > { %2488 = vmatprep.mubr.bf16.mxu0 %v7295_v13  ;;  %2690 = vmatpush1.bf16.msra.mxu0 %v6791_v37  ;;  %v5296_v13 = vcombine.low %v7275_v5, %v7352_v47  ;;  %v651_v37 = vshrl.u32 %v7286_v11, 16  ;;  %v1021_v5 = vunpack.c.h.b16 %v7352_v47  ;;  %v5295_v11 = vcombine.low %v7677_v18, %v7681_v41 }
 0x120   : > { %2691 = vmatprep.subr.bf16.mxu0 %v9954_v30 }
 0x123   : > { %2692 = vmatpush1.bf16.msra.mxu0 %v6792_v26  ;;  %v7691_v26 = vor.u32 %v651_v37, %v649_v43  ;;  %v6796_v43 = vld [vmem:[%s9800_s1 + $0x1c8] sm:$0xff]  }
 0x124   : > { %2693 = vmatprep.subr.bf16.mxu0 %v9954_v30 }
 0x126   : > { %2489 = vmatmul.mubr.bf16.gmra.mrb[12].mxu0 %v7668_v52 }
 0x127   : > { %2496 = vmatprep.mubr.bf16.mxu0 %v5296_v13  ;;  %2694 = vmatpush1.bf16.msra.mxu0 %v6793_v25  ;;  %v1201_v13 = vpack.c.b16 %v1024_v36, %v1021_v5  ;;  %v1020_v25 = vunpack.c.h.b16 %v7681_v41  ;;  %v662_v5 = vshll.u32 %v7327_v32, 16  ;;  %v655_v36 = vshrl.u32 %v7324_v31, 16 }
 0x128   : > { %2695 = vmatprep.subr.bf16.mxu0 %v9954_v30 }
 0x129   : > { %v2217_v27 = vpop.f32.mrb[0].mxu0 }
 0x12a   : > { %v2219_v56 = vpop.f32.mrb[1].mxu0  ;;  %v1023_v27 = vunpack.c.l.b16 %v7691_v26 }
 0x12b   : > { %v2220_v28 = vpop.f32.mrb[2].mxu0  ;;  %2696 = vmatpush1.bf16.msra.mxu0 %v6794_v61  ;;  %v657_v56 = vshll.u32 %v7324_v31, 16 }
 0x12c   : > { %v2222_v6 = vpop.f32.mrb[3].mxu0  ;;  %2697 = vmatprep.subr.bf16.mxu0 %v9954_v30  ;;  %v1200_v37 = vpack.c.b16 %v1023_v27, %v1020_v25  ;;  %v6797_v28 = vld [vmem:[%s9800_s1 + $0x1d0] sm:$0xff]   ;;  %v677_v27 = vshll.u32 %v7356_v50, 16 }
 0x12d   : > { %v659_v61 = vrot.slane %v657_v56, 1  ;;  %v670_v6 = vshrl.u32 %v7354_v48, 16  ;;  %v6798_v56 = vld [vmem:[%s9800_s1 + $0x1d8] sm:$0xff]  }
 0x12e   : > { %2497 = vmatmul.mubr.bf16.gmra.mrb[16].mxu0 %v5295_v11  ;;  %v672_v11 = vshll.u32 %v7354_v48, 16 }
 0x12f   : > { %2504 = vmatprep.mubr.bf16.mxu0 %v1201_v13  ;;  %2698 = vmatpush1.bf16.msra.mxu0 %v6795_v34  ;;  %v664_v13 = vrot.slane %v662_v5, 1  ;;  %v660_v34 = vor.u32 %v659_v61, %v655_v36  ;;  %v679_v36 = vrot.slane %v677_v27, 1  ;;  %v6799_v61 = vld [vmem:[%s9800_s1 + $0x1e0] sm:$0xff]  }
 0x130   : > { %2699 = vmatprep.subr.bf16.mxu0 %v9954_v30  ;;  %v674_v25 = vrot.slane %v672_v11, 1 }
 0x132   : > { %v675_v5 = vor.u32 %v674_v25, %v670_v6  ;;  %v1042_v6 = vunpack.c.l.b16 %v7393_v12  ;;  %v6800_v25 = vld [vmem:[%s9800_s1 + $0x1e8] sm:$0xff]  }
 0x133   : > { %2700 = vmatpush1.bf16.msra.mxu0 %v6796_v43  ;;  %v666_v43 = vshrl.u32 %v7327_v32, 16 }
 0x134   : > { %2701 = vmatprep.subr.bf16.mxu0 %v9954_v30 }
 0x135   : > { %v7729_v11 = vor.u32 %v666_v43, %v664_v13  ;;  %v6801_v43 = vld [vmem:[%s9800_s1 + $0x1f0] sm:$0xff]  }
 0x136   : > { %2505 = vmatmul.mubr.bf16.gmra.mrb[20].mxu0 %v1200_v37  ;;  %v7720_v37 = vsel %vm578_vm1, %v660_v34, %v664_v13  ;;  %v7733_v34 = vsel %vm578_vm1, %v675_v5, %v679_v36 }
 0x137   : > { %2512 = vmatprep.mubr.bf16.mxu0 %v7362_v51  ;;  %2702 = vmatpush1.bf16.msra.mxu0 %v6797_v28  ;;  %v5302_v51 = vcombine.low %v7345_v45, %v7412_v23  ;;  %v681_v28 = vshrl.u32 %v7356_v50, 16  ;;  %v1039_v45 = vunpack.c.h.b16 %v7412_v23  ;;  %v5301_v13 = vcombine.low %v7729_v11, %v7733_v34 }
 0x138   : > { %2703 = vmatprep.subr.bf16.mxu0 %v9954_v30  ;;  %v696_v23 = vshrl.u32 %v7397_v15, 16 }
 0x139   : > { %v7743_v27 = vor.u32 %v681_v28, %v679_v36  ;;  %v1219_v50 = vpack.c.b16 %v1042_v6, %v1039_v45  ;;  %v692_v36 = vshll.u32 %v7397_v15, 16  ;;  %v702_v45 = vshll.u32 %v7414_v24, 16 }
 0x13b   : > { %2704 = vmatpush1.bf16.msra.mxu0 %v6798_v56  ;;  %v1038_v56 = vunpack.c.h.b16 %v7733_v34  ;;  %v1041_v12 = vunpack.c.l.b16 %v7743_v27  ;;  %v694_v6 = vrot.slane %v692_v36, 1  ;;  %v6802_v36 = vld [vmem:[%s9800_s1 + $0x1f8] sm:$0xff]  }
 0x13c   : > { %2705 = vmatprep.subr.bf16.mxu0 %v9954_v30 }
 0x13d   : > { %v1218_v5 = vpack.c.b16 %v1041_v12, %v1038_v56  ;;  %v5308_v12 = vcombine.low %v7408_v22, %v7454_v4  ;;  %v1060_v22 = vunpack.c.l.b16 %v7443_v60  ;;  %v715_v60 = vshrl.u32 %v7436_v53, 16 }
 0x13e   : > { %2513 = vmatmul.mubr.bf16.gmra.mrb[24].mxu0 %v7720_v37 }
 0x13f   : > { %2520 = vmatprep.mubr.bf16.mxu0 %v5302_v51  ;;  %2706 = vmatpush1.bf16.msra.mxu0 %v6799_v61  ;;  %v687_v51 = vshll.u32 %v7395_v14, 16  ;;  %v685_v61 = vshrl.u32 %v7395_v14, 16 }
 0x140   : > { %2707 = vmatprep.subr.bf16.mxu0 %v9954_v30 }
 0x141   : > { %v689_v28 = vrot.slane %v687_v51, 1 }
 0x143   : > { %2708 = vmatpush1.bf16.msra.mxu0 %v6800_v25  ;;  %v690_v25 = vor.u32 %v689_v28, %v685_v61  ;;  %v1057_v28 = vunpack.c.h.b16 %v7454_v4 }
 0x144   : > { %2709 = vmatprep.subr.bf16.mxu0 %v9954_v30 }
 0x145   : > { %v7761_v56 = vsel %vm578_vm1, %v690_v25, %v694_v6 }
 0x146   : > { %2521 = vmatmul.mubr.bf16.gmra.mrb[28].mxu0 %v5301_v13  ;;  %v700_v13 = vshrl.u32 %v7414_v24, 16 }
 0x147   : > { %2528 = vmatprep.mubr.bf16.mxu0 %v1219_v50  ;;  %2710 = vmatpush1.bf16.msra.mxu0 %v6801_v43  ;;  %v704_v50 = vrot.slane %v702_v45, 1  ;;  %v707_v43 = vshll.u32 %v7416_v29, 16 }
 0x148   : > { %2711 = vmatprep.subr.bf16.mxu0 %v9954_v30 }
 0x149   : > { %v705_v51 = vor.u32 %v704_v50, %v700_v13  ;;  %v709_v47 = vrot.slane %v707_v43, 1  ;;  %v717_v13 = vshll.u32 %v7436_v53, 16  ;;  %v722_v43 = vshll.u32 %v7447_v63, 16 }
 0x14b   : > { %v7773_v61 = vsel %vm578_vm1, %v705_v51, %v709_v47  ;;  %2712 = vmatpush1.bf16.msra.mxu0 %v6802_v36  ;;  %v732_v51 = vshll.u32 %v7456_v10, 16  ;;  %v730_v36 = vshrl.u32 %v7456_v10, 16 }
 0x14e   : > { %2529 = vmatmul.mubr.bf16.gmra.mrb[32].mxu0 %v1218_v5  ;;  %v7766_v5 = vor.u32 %v696_v23, %v694_v6  ;;  %v1237_v6 = vpack.c.b16 %v1060_v22, %v1057_v28  ;;  %v734_v28 = vrot.slane %v732_v51, 1  ;;  %v737_v22 = vshll.u32 %v7462_v20, 16 }
 0x14f   : > { %2536 = vmatprep.mubr.bf16.mxu0 %v7421_v33  ;;  %v711_v33 = vshrl.u32 %v7416_v29, 16  ;;  %v1056_v29 = vunpack.c.h.b16 %v7773_v61  ;;  %v1078_v51 = vunpack.c.l.b16 %v7489_v2 }
 0x150   : > { %v5307_v45 = vcombine.low %v7766_v5, %v7773_v61 }
 0x151   : > { %v7779_v23 = vor.u32 %v711_v33, %v709_v47  ;;  %v724_v47 = vrot.slane %v722_v43, 1  ;;  %v741_v43 = vshrl.u32 %v7462_v20, 16  ;;  %v747_v20 = vshll.u32 %v7482_v55, 16 }
 0x153   : > { %v1059_v25 = vunpack.c.l.b16 %v7779_v23  ;;  %v749_v2 = vrot.slane %v747_v20, 1 }
 0x155   : > { %v1236_v50 = vpack.c.b16 %v1059_v25, %v1056_v29  ;;  %v5314_v25 = vcombine.low %v7460_v19, %v7500_v40 }
 0x156   : > { %2537 = vmatmul.mubr.bf16.gmra.mrb[36].mxu0 %v7761_v56 }
 0x157   : > { %2544 = vmatprep.mubr.bf16.mxu0 %v5308_v12  ;;  %v719_v12 = vrot.slane %v717_v13, 1  ;;  %v735_v13 = vor.u32 %v734_v28, %v730_v36 }
 0x159   : > { %v720_v33 = vor.u32 %v719_v12, %v715_v60  ;;  %v1075_v12 = vunpack.c.h.b16 %v7500_v40 }
 0x15b   : > { %v7793_v29 = vsel %vm578_vm1, %v720_v33, %v724_v47  ;;  %v1255_v36 = vpack.c.b16 %v1078_v51, %v1075_v12  ;;  %v760_v12 = vshrl.u32 %v7502_v44, 16 }
 0x15e   : > { %2545 = vmatmul.mubr.bf16.gmra.mrb[40].mxu0 %v5307_v45  ;;  %v9842_v45 = vmov 0.0  }
 0x15f   : > { %2552 = vmatprep.mubr.bf16.mxu0 %v1237_v6  ;;  %6156 = vmatprep.subr.bf16.mxu0 %v9842_v45  ;;  %v726_v6 = vshrl.u32 %v7447_v63, 16 }
 0x166   : > { %2553 = vmatmul.mubr.bf16.gmra.mrb[44].mxu0 %v1236_v50  ;;  %v739_v50 = vrot.slane %v737_v22, 1 }
 0x167   : > { %2560 = vmatprep.mubr.bf16.mxu0 %v7467_v21  ;;  %v7798_v21 = vor.u32 %v726_v6, %v724_v47  ;;  %v752_v6 = vshll.u32 %v7493_v16, 16 }
 0x168   : > { %v7802_v60 = vsel %vm578_vm1, %v735_v13, %v739_v50  ;;  %v7808_v19 = vor.u32 %v741_v43, %v739_v50  ;;  %v762_v13 = vshll.u32 %v7502_v44, 16 }
 0x169   : > { %v5313_v33 = vcombine.low %v7798_v21, %v7802_v60  ;;  %v1074_v47 = vunpack.c.h.b16 %v7802_v60  ;;  %v754_v50 = vrot.slane %v752_v6, 1 }
 0x16a   : > { %v1077_v28 = vunpack.c.l.b16 %v7808_v19  ;;  %v764_v51 = vrot.slane %v762_v13, 1 }
 0x16c   : > { %v1254_v22 = vpack.c.b16 %v1077_v28, %v1074_v47  ;;  %v5320_v28 = vcombine.low %v7506_v49, %v7546_v35  ;;  %v765_v20 = vor.u32 %v764_v51, %v760_v12 }
 0x16e   : > { %2561 = vmatmul.mubr.bf16.gmra.mrb[48].mxu0 %v7793_v29 }
 0x16f   : > { %2568 = vmatprep.mubr.bf16.mxu0 %v5314_v25  ;;  %v745_v25 = vshrl.u32 %v7482_v55, 16 }
 0x171   : > { %v750_v43 = vor.u32 %v749_v2, %v745_v25  ;;  %v1093_v25 = vunpack.c.h.b16 %v7546_v35  ;;  %v1096_v2 = vunpack.c.l.b16 %v7535_v0  ;;  %v792_v35 = vshll.u32 %v7548_v46, 16 }
 0x173   : > { %v7821_v47 = vsel %vm578_vm1, %v750_v43, %v754_v50  ;;  %v1273_v43 = vpack.c.b16 %v1096_v2, %v1093_v25  ;;  %v790_v25 = vshrl.u32 %v7548_v46, 16  ;;  %v794_v2 = vrot.slane %v792_v35, 1 }
 0x174   : > { %v801_v35 = vshrl.u32 %v7554_v17, 16 }
 0x176   : > { %2569 = vmatmul.mubr.bf16.gmra.mrb[52].mxu0 %v5313_v33  ;;  %v767_v33 = vshll.u32 %v7508_v1, 16 }
 0x177   : > { %2576 = vmatprep.mubr.bf16.mxu0 %v1255_v36  ;;  %v756_v36 = vshrl.u32 %v7493_v16, 16 }
 0x178   : > { %v769_v45 = vrot.slane %v767_v33, 1 }
 0x17a   : > { %v7830_v6 = vsel %vm578_vm1, %v765_v20, %v769_v45 }
 0x17e   : > { %2577 = vmatmul.mubr.bf16.gmra.mrb[56].mxu0 %v1254_v22  ;;  %v7826_v22 = vor.u32 %v756_v36, %v754_v50  ;;  %v1092_v50 = vunpack.c.h.b16 %v7830_v6  ;;  %v9956_v36 = vld [vmem:[#allocation24_spill] sm:$0xff] }
 0x17f   : > { %2584 = vmatprep.mubr.bf16.mxu0 %v7513_v62  ;;  %v771_v62 = vshrl.u32 %v7508_v1, 16  ;;  %v9955_v1 = vld [vmem:[#allocation23_spill] sm:$0xff] }
 0x180   : > { %v5319_v13 = vcombine.low %v7826_v22, %v7830_v6  ;;  %v777_v51 = vshll.u32 %v9955_v1, 16  ;;  %v775_v20 = vshrl.u32 %v9955_v1, 16 }
 0x181   : > { %v7836_v49 = vor.u32 %v771_v62, %v769_v45 }
 0x182   : > { %v779_v0 = vrot.slane %v777_v51, 1  ;;  %v9958_v51 = vld [vmem:[#allocation27_spill] sm:$0xff] }
 0x183   : > { %v1095_v12 = vunpack.c.l.b16 %v7836_v49 }
 0x184   : > { %v780_v62 = vor.u32 %v779_v0, %v775_v20 }
 0x185   : > { %v1272_v33 = vpack.c.b16 %v1095_v12, %v1092_v50  ;;  %v9957_v12 = vld [vmem:[#allocation34_spill] sm:$0xff] }
 0x186   : > { %2585 = vmatmul.mubr.bf16.gmra.mrb[60].mxu0 %v7821_v47  ;;  %v1111_v0 = vunpack.c.h.b16 %v9957_v12 }
 0x187   : > { %2592 = vmatprep.mubr.bf16.mxu0 %v5320_v28  ;;  %v782_v28 = vshll.u32 %v9956_v36, 16 }
 0x189   : > { %v784_v45 = vrot.slane %v782_v28, 1  ;;  %v795_v28 = vor.u32 %v794_v2, %v790_v25  ;;  %v235_v2 = vld [vmem:[%s7145_s11 + $0x208] sm:$0xff] }
 0x18b   : > { %v7849_v50 = vsel %vm578_vm1, %v780_v62, %v784_v45  ;;  %v9960_v62 = vld [vmem:[#allocation31_spill] sm:$0xff] }
 0x18c   : > { %v1114_v4 = vunpack.c.l.b16 %v9960_v62  ;;  %v9965_v62 = vld [vmem:[#allocation30_spill] sm:$0xff] }
 0x18e   : > { %2593 = vmatmul.mubr.bf16.gmra.mrb[64].mxu0 %v5319_v13  ;;  %v797_v13 = vshll.u32 %v7554_v17, 16  ;;  %v1291_v25 = vpack.c.b16 %v1114_v4, %v1111_v0  ;;  %v9967_v4 = vld [vmem:[#allocation32_spill] sm:$0xff]  ;;  %v805_v0 = vshrl.u32 %v9965_v62, 16 }
 0x18f   : > { %2600 = vmatprep.mubr.bf16.mxu0 %v1273_v43  ;;  %v786_v43 = vshrl.u32 %v9956_v36, 16 }
 0x190   : > { %v799_v40 = vrot.slane %v797_v13, 1  ;;  %v7868_v13 = vld [vmem:[%s7145_s11 + $0x210] sm:$0xff] }
 0x191   : > { %9962 = vst [vmem:[#allocation38_spill] sm:$0xff] %v7868_v13 }
 0x192   : > { %v7858_v20 = vsel %vm578_vm1, %v795_v28, %v799_v40 }
 0x193   : > { %9959 = vst [vmem:[#allocation27_spill] sm:$0xff] %v7858_v20  ;;  %v1110_v17 = vunpack.c.h.b16 %v7858_v20 }
 0x196   : > { %2601 = vmatmul.mubr.bf16.gmra.mrb[68].mxu0 %v1272_v33  ;;  %v5326_v33 = vcombine.low %v9958_v51, %v9957_v12  ;;  %v7864_v51 = vor.u32 %v801_v35, %v799_v40  ;;  %v807_v12 = vshll.u32 %v9965_v62, 16  ;;  %v812_v35 = vshll.u32 %v9967_v4, 16  ;;  %v7936_v62 = vld [vmem:[%s7145_s11 + $0x250] sm:$0xff] }
 0x197   : > { %2608 = vmatprep.mubr.bf16.mxu0 %v7559_v38  ;;  %v7854_v38 = vor.u32 %v786_v43, %v784_v45  ;;  %v237_v45 = vld [vmem:[%s7145_s11 + $0x218] sm:$0x3]  ;;  %9980 = vst [vmem:[#allocation50_spill] sm:$0xff] %v7936_v62 }
 0x198   : > { %9961 = vst [vmem:[#allocation31_spill] sm:$0xff] %v7864_v51  ;;  %v1113_v43 = vunpack.c.l.b16 %v7864_v51  ;;  %v7878_v46 = vpack.c.bf16 %v237_v45, %v7868_v13  ;;  %v809_v36 = vrot.slane %v807_v12, 1  ;;  %v816_v13 = vshrl.u32 %v9967_v4, 16  ;;  %v7932_v4 = vld [vmem:[%s7145_s11 + $0x240] sm:$0xff] }
 0x199   : > { %v5325_v7 = vcombine.low %v7854_v38, %v7858_v20  ;;  %9979 = vst [vmem:[#allocation49_spill] sm:$0xff] %v7932_v4 }
 0x19a   : > { %9966 = vst [vmem:[#allocation39_spill] sm:$0xff] %v7878_v46  ;;  %v1290_v40 = vpack.c.b16 %v1113_v43, %v1110_v17  ;;  %v7885_v51 = vrot.slane %v7878_v46, 1  ;;  %v827_v43 = vshll.u32 %v7878_v46, 16 }
 0x19c   : > { %9968 = vst [vmem:[#allocation40_spill] sm:$0xff] %v7885_v51 }
 0x19e   : > { %2609 = vmatmul.mubr.bf16.gmra.mrb[72].mxu0 %v7849_v50 }
 0x19f   : > { %2616 = vmatprep.mubr.bf16.mxu0 %v5326_v33  ;;  %v9963_v33 = vld [vmem:[#allocation33_spill] sm:$0xff] }
 0x1a0   : > { %v7874_v28 = vpack.c.bf16 %v235_v2, %v9963_v33  ;;  %v9969_v2 = vld [vmem:[#allocation36_spill] sm:$0xff]  ;;  %v810_v33 = vor.u32 %v809_v36, %v805_v0 }
 0x1a2   : > { %9964 = vst [vmem:[#allocation33_spill] sm:$0xff] %v7874_v28  ;;  %v968_v20 = vrot.slane %v7874_v28, 1  ;;  %v820_v45 = vshrl.u32 %v7874_v28, 16 }
 0x1a4   : > { %v7892_v12 = vsel %vm919_vm0, %v968_v20, %v7885_v51  ;;  %v6807_v20 = vld [vmem:[%s9800_s1] sm:$0xff]  }
 0x1a5   : > { %9970 = vst [vmem:[#allocation41_spill] sm:$0xff] %v7892_v12  ;;  %1935 = vmatpush1.bf16.msra.mxu1 %v6807_v20  ;;  %v243_v20 = vld [vmem:[%s7145_s11 + $0x248] sm:$0xff] }
 0x1a6   : > { %2617 = vmatmul.mubr.bf16.gmra.mrb[76].mxu0 %v5325_v7  ;;  %v822_v7 = vshll.u32 %v7874_v28, 16  ;;  %v831_v28 = vshrl.u32 %v7878_v46, 16  ;;  %v241_v46 = vld [vmem:[%s7145_s11 + $0x238] sm:$0x3]  ;;  %1936 = vmatprep.subr.bf16.mxu1 %v9954_v30 }
 0x1a7   : > { %2624 = vmatprep.mubr.bf16.mxu0 %v1291_v25  ;;  %v814_v25 = vrot.slane %v812_v35, 1  ;;  %v9972_v35 = vld [vmem:[#allocation35_spill] sm:$0xff] }
 0x1a8   : > { %v824_v17 = vrot.slane %v822_v7, 1  ;;  %v5332_v36 = vcombine.low %v9972_v35, %v7892_v12  ;;  %v829_v7 = vrot.slane %v827_v43, 1  ;;  %v7917_v43 = vld [vmem:[%s7145_s11 + $0x230] sm:$0xff] }
 0x1a9   : > { %9976 = vst [vmem:[#allocation46_spill] sm:$0xff] %v7917_v43 }
 0x1aa   : > { %v825_v0 = vor.u32 %v824_v17, %v820_v45  ;;  %v1129_v45 = vunpack.c.h.b16 %v7892_v12  ;;  %v1132_v17 = vunpack.c.l.b16 %v7885_v51  ;;  %v7929_v51 = vpack.c.bf16 %v241_v46, %v7917_v43 }
 0x1ab   : > { %v7946_v46 = vpack.c.bf16 %v243_v20, %v7932_v4 }
 0x1ac   : > { %v1309_v12 = vpack.c.b16 %v1132_v17, %v1129_v45  ;;  %v7950_v17 = vrot.slane %v7929_v51, 1  ;;  %v842_v4 = vshll.u32 %v7929_v51, 16 }
 0x1ae   : > { %2625 = vmatmul.mubr.bf16.gmra.mrb[80].mxu0 %v1290_v40  ;;  %v7896_v40 = vsel %vm578_vm1, %v810_v33, %v814_v25  ;;  %v7908_v33 = vsel %vm578_vm1, %v825_v0, %v829_v7  ;;  %v7923_v0 = vor.u32 %v831_v28, %v829_v7  ;;  %v6808_v7 = vld [vmem:[%s9800_s1 + $0x8] sm:$0xff]  }
 0x1af   : > { %2632 = vmatprep.mubr.bf16.mxu0 %v9969_v2  ;;  %9971 = vst [vmem:[#allocation42_spill] sm:$0xff] %v7896_v40  ;;  %v7901_v2 = vor.u32 %v816_v13, %v814_v25  ;;  %9974 = vst [vmem:[#allocation44_spill] sm:$0xff] %v7908_v33  ;;  %v7913_v13 = vld [vmem:[%s7145_s11 + $0x220] sm:$0xff]  ;;  %v239_v25 = vld [vmem:[%s7145_s11 + $0x228] sm:$0xff]  ;;  %v1128_v1 = vunpack.c.h.b16 %v7908_v33  ;;  %1937 = vmatpush1.bf16.msra.mxu1 %v6808_v7 }
 0x1b0   : > { %9975 = vst [vmem:[#allocation45_spill] sm:$0xff] %v7913_v13  ;;  %9977 = vst [vmem:[#allocation47_spill] sm:$0xff] %v7923_v0  ;;  %v7926_v35 = vpack.c.bf16 %v239_v25, %v7913_v13  ;;  %1938 = vmatprep.subr.bf16.mxu1 %v9954_v30  ;;  %v852_v13 = vshll.u32 %v7946_v46, 16 }
 0x1b1   : > { %9973 = vst [vmem:[#allocation43_spill] sm:$0xff] %v7901_v2 }
 0x1b2   : > { %9978 = vst [vmem:[#allocation48_spill] sm:$0xff] %v7926_v35  ;;  %v837_v28 = vshll.u32 %v7926_v35, 16  ;;  %v971_v45 = vrot.slane %v7926_v35, 1 }
 0x1b4   : > { %v839_v20 = vrot.slane %v837_v28, 1  ;;  %v844_v28 = vrot.slane %v842_v4, 1 }
 0x1b6   : > { %2633 = vmatmul.mubr.bf16.gmra.mrb[84].mxu0 %v7896_v40  ;;  %v245_v40 = vld [vmem:[%s7145_s11 + $0x258] sm:$0x3] }
 0x1b7   : > { %2640 = vmatprep.mubr.bf16.mxu0 %v5332_v36  ;;  %v5331_v36 = vcombine.low %v7901_v2, %v7908_v33  ;;  %v1131_v2 = vunpack.c.l.b16 %v7923_v0  ;;  %v7953_v25 = vpack.c.bf16 %v245_v40, %v7936_v62  ;;  %v7964_v0 = vsel %vm919_vm0, %v971_v45, %v7950_v17 }
 0x1b8   : > { %9981 = vst [vmem:[#allocation51_spill] sm:$0xff] %v7964_v0  ;;  %v974_v40 = vrot.slane %v7946_v46, 1  ;;  %v850_v45 = vshrl.u32 %v7946_v46, 16  ;;  %v854_v62 = vrot.slane %v852_v13, 1 }
 0x1b9   : > { %v1308_v43 = vpack.c.b16 %v1131_v2, %v1128_v1  ;;  %v7968_v7 = vrot.slane %v7953_v25, 1  ;;  %v6810_v2 = vld [vmem:[%s9800_s1 + $0x18] sm:$0xff]  }
 0x1bb   : > { %9982 = vst [vmem:[#allocation52_spill] sm:$0xff] %v7968_v7  ;;  %v7979_v33 = vsel %vm919_vm0, %v974_v40, %v7968_v7 }
 0x1bc   : > { %9983 = vst [vmem:[#allocation53_spill] sm:$0xff] %v7979_v33  ;;  %v5338_v13 = vcombine.low %v7950_v17, %v7979_v33 }
 0x1be   : > { %2641 = vmatmul.mubr.bf16.gmra.mrb[88].mxu0 %v5331_v36  ;;  %v6809_v36 = vld [vmem:[%s9800_s1 + $0x10] sm:$0xff]  }
 0x1bf   : > { %2648 = vmatprep.mubr.bf16.mxu0 %v1309_v12  ;;  %v835_v12 = vshrl.u32 %v7926_v35, 16  ;;  %1939 = vmatpush1.bf16.msra.mxu1 %v6809_v36  ;;  %v857_v35 = vshll.u32 %v7953_v25, 16  ;;  %v846_v36 = vshrl.u32 %v7929_v51, 16 }
 0x1c0   : > { %1940 = vmatprep.subr.bf16.mxu1 %v9954_v30 }
 0x1c1   : > { %v840_v1 = vor.u32 %v839_v20, %v835_v12  ;;  %v855_v12 = vor.u32 %v854_v62, %v850_v45  ;;  %v859_v20 = vrot.slane %v857_v35, 1  ;;  %v7993_v40 = vor.u32 %v846_v36, %v844_v28 }
 0x1c2   : > { %v1147_v62 = vunpack.c.h.b16 %v7979_v33  ;;  %v1150_v35 = vunpack.c.l.b16 %v7968_v7  ;;  %v8103_v33 = vcombine.low %v7691_v26, %v7720_v37 }
 0x1c3   : > { %1941 = vmatpush1.bf16.msra.mxu1 %v6810_v2  ;;  %v7987_v4 = vsel %vm578_vm1, %v840_v1, %v844_v28  ;;  %v861_v2 = vshrl.u32 %v7953_v25, 16  ;;  %v8000_v1 = vsel %vm578_vm1, %v855_v12, %v859_v20  ;;  %v6814_v28 = vld [vmem:[%s9800_s1 + $0x30] sm:$0xff]   ;;  %v6815_v12 = vld [vmem:[%s9800_s1 + $0x38] sm:$0xff]  }
 0x1c4   : > { %1942 = vmatprep.subr.bf16.mxu1 %v9954_v30  ;;  %v5337_v45 = vcombine.low %v7993_v40, %v8000_v1  ;;  %v1327_v36 = vpack.c.b16 %v1150_v35, %v1147_v62  ;;  %v6817_v62 = vld [vmem:[%s9800_s1 + $0x48] sm:$0xff]   ;;  %v6818_v35 = vld [vmem:[%s9800_s1 + $0x50] sm:$0xff]  }
 0x1c6   : > { %2649 = vmatmul.mubr.bf16.gmra.mrb[96].mxu0 %v1308_v43  ;;  %v6811_v43 = vld [vmem:[%s9800_s1 + $0x20] sm:$0xff]  }
 0x1c7   : > { %2656 = vmatprep.mubr.bf16.mxu0 %v7964_v0  ;;  %1943 = vmatpush1.bf16.msra.mxu1 %v6811_v43  ;;  %v6812_v0 = vld [vmem:[%s9800_s1 + $0x28] sm:$0xff]   ;;  %v8010_v43 = vor.u32 %v861_v2, %v859_v20  ;;  %v6816_v20 = vld [vmem:[%s9800_s1 + $0x40] sm:$0xff]  }
 0x1c8   : > { %1944 = vmatprep.subr.bf16.mxu1 %v9954_v30 }
 0x1cb   : > { %1945 = vmatpush1.bf16.msra.mxu1 %v6812_v0  ;;  %v1149_v0 = vunpack.c.l.b16 %v8010_v43 }
 0x1cc   : > { %1946 = vmatprep.subr.bf16.mxu1 %v9954_v30 }
 0x1ce   : > { %2657 = vmatmul.mubr.bf16.gmra.mrb[100].mxu0 %v7987_v4 }
 0x1cf   : > { %2664 = vmatprep.mubr.bf16.mxu0 %v5338_v13  ;;  %1947 = vmatpush1.bf16.msra.mxu1 %v6814_v28  ;;  %v1146_v13 = vunpack.c.h.b16 %v8000_v1 }
 0x1d0   : > { %1948 = vmatprep.subr.bf16.mxu1 %v9954_v30 }
 0x1d1   : > { %v1326_v2 = vpack.c.b16 %v1149_v0, %v1146_v13  ;;  %v6803_v13 = vld [vmem:[%s9800_s1 + $0x200] sm:$0xff]   ;;  %v8036_v0 = vcombine.low %v7639_v54, %v7668_v52  ;;  %v6804_v54 = vld [vmem:[%s9800_s1 + $0x208] sm:$0xff]  }
 0x1d3   : > { %1949 = vmatpush1.bf16.msra.mxu1 %v6815_v12 }
 0x1d4   : > { %1950 = vmatprep.subr.bf16.mxu1 %v9954_v30 }
 0x1d6   : > { %2665 = vmatmul.mubr.bf16.gmra.mrb[104].mxu0 %v5337_v45 }
 0x1d7   : > { %2672 = vmatprep.mubr.bf16.mxu0 %v1327_v36  ;;  %1951 = vmatpush1.bf16.msra.mxu1 %v6816_v20  ;;  %v6819_v20 = vld [vmem:[%s9800_s1 + $0x58] sm:$0xff]  }
 0x1d8   : > { %1952 = vmatprep.subr.bf16.mxu1 %v9954_v30 }
 0x1db   : > { %1953 = vmatpush1.bf16.msra.mxu1 %v6817_v62  ;;  %v1014_v62 = vunpack.c.l.b16 %v7677_v18  ;;  %v6805_v18 = vld [vmem:[%s9800_s1 + $0x210] sm:$0xff]  }
 0x1dc   : > { %1954 = vmatprep.subr.bf16.mxu1 %v9954_v30 }
 0x1de   : > { %2673 = vmatmul.mubr.bf16.gmra.mrb[108].mxu0 %v1326_v2  ;;  %v1011_v2 = vunpack.c.h.b16 %v7668_v52  ;;  %v6900_v52 = vld [vmem:[%s7145_s11 + $0x60] sm:$0xff] }
 0x1df   : > { %2713 = vmatprep.mubr.bf16.mxu0 %v7629_v42  ;;  %1955 = vmatpush1.bf16.msra.mxu1 %v6818_v35  ;;  %v9984_v35 = vmov 0.0  }
 0x1e0   : > { %1956 = vmatprep.subr.bf16.mxu1 %v9954_v30 }
 0x1e1   : > { %v2466_v28 = vpop.f32.mrb[92].mxu0 }
 0x1e2   : > { %v2468_v45 = vpop.f32.mrb[93].mxu0  ;;  %v6820_v28 = vld [vmem:[%s9800_s1 + $0x60] sm:$0xff]  }
 0x1e3   : > { %v2469_v36 = vpop.f32.mrb[94].mxu0  ;;  %1957 = vmatpush1.bf16.msra.mxu1 %v6819_v20  ;;  %v6899_v45 = vld [vmem:[%s7145_s11 + $0x50] sm:$0xff]  ;;  %v1013_v20 = vunpack.c.l.b16 %v7258_v59 }
 0x1e4   : > { %v2471_v12 = vpop.f32.mrb[95].mxu0  ;;  %1958 = vmatprep.subr.bf16.mxu1 %v9954_v30  ;;  %v8056_v36 = vpack.c.bf16 %v6900_v52, %v6899_v45 }
 0x1e5   : > { %v1010_v12 = vunpack.c.h.b16 %v7255_v58  ;;  %v6823_v58 = vld [vmem:[%s9800_s1 + $0x70] sm:$0xff]  }
 0x1e6   : > { %2714 = vmatmul.mubr.bf16.vlgmr.msra.gmra.mrb[112].mxu0 %v7222_v39 }
 0x1e7   : > { %6157 = vmatpush3.bf16.msra.mxu0 %v6803_v13  ;;  %2721 = vmatprep.mubr.bf16.mxu0 %v8036_v0  ;;  %v8058_v13 = vpack.c.b16 %v1014_v62, %v1011_v2  ;;  %v6822_v2 = vld [vmem:[%s9800_s1 + $0x68] sm:$0xff]   ;;  %v6806_v62 = vld [vmem:[%s9800_s1 + $0x218] sm:$0xff]   ;;  %v8080_v59 = vpack.c.b16 %v1013_v20, %v1010_v12 }
 0x1e8   : > { %6158 = vmatprep.subr.bf16.mxu0 %v9984_v35  ;;  %1959 = vmatpush1.bf16.msra.mxu1 %v6820_v28  ;;  %v9985_v28 = vld [vmem:[#allocation5_spill] sm:$0xff]  ;;  %v6824_v12 = vld [vmem:[%s9800_s1 + $0x78] sm:$0xff]   ;;  %v6821_v20 = vld [vmem:[%s9800_s1 + $0x228] sm:$0xff]  }
 0x1e9   : > { %1960 = vmatprep.subr.bf16.mxu1 %v9954_v30  ;;  %v582_v45 = vshll.u32 %v9985_v28, 16  ;;  %v580_v52 = vshrl.u32 %v9985_v28, 16 }
 0x1eb   : > { %6159 = vmatpush3.bf16.msra.mxu0 %v6804_v54  ;;  %v6813_v54 = vld [vmem:[%s9800_s1 + $0x220] sm:$0xff]  }
 0x1ec   : > { %6160 = vmatprep.subr.bf16.mxu0 %v9984_v35  ;;  %1961 = vmatpush1.bf16.msra.mxu1 %v6822_v2  ;;  %v9986_v2 = vld [vmem:[#allocation6_spill] sm:$0xff] }
 0x1ed   : > { %1962 = vmatprep.subr.bf16.mxu1 %v9954_v30  ;;  %v587_v7 = vshll.u32 %v9986_v2, 16 }
 0x1ee   : > { %2722 = vmatmul.mubr.bf16.gmra.mrb[4].mxu0 %v8056_v36 }
 0x1ef   : > { %2729 = vmatprep.mubr.bf16.mxu0 %v8058_v13  ;;  %6161 = vmatpush3.bf16.msra.mxu0 %v6805_v18  ;;  %v584_v18 = vrot.slane %v582_v45, 1 }
 0x1f0   : > { %6162 = vmatprep.subr.bf16.mxu0 %v9984_v35  ;;  %1963 = vmatpush1.bf16.msra.mxu1 %v6823_v58  ;;  %v589_v58 = vrot.slane %v587_v7, 1  ;;  %v6901_v7 = vld [vmem:[%s9800_s1 + $0x80] sm:$0xff]  }
 0x1f1   : > { %1964 = vmatprep.subr.bf16.mxu1 %v9954_v30 }
 0x1f3   : > { %6163 = vmatpush3.bf16.msra.mxu0 %v6806_v62  ;;  %v585_v62 = vor.u32 %v584_v18, %v580_v52  ;;  %v1029_v52 = vunpack.c.h.b16 %v7720_v37  ;;  %v6902_v18 = vld [vmem:[%s7145_s11 + $0x20] sm:$0xff] }
 0x1f4   : > { %6164 = vmatprep.subr.bf16.mxu0 %v9984_v35  ;;  %1965 = vmatpush1.bf16.msra.mxu1 %v6824_v12 }
 0x1f5   : > { %v590_v45 = vsel %vm578_vm1, %v585_v62, %v589_v58  ;;  %6328 = vmatprep.subr.bf16.mxu1 %v9954_v30  ;;  %v6904_v62 = vld [vmem:[%s9800_s1 + $0x88] sm:$0xff]  }
 0x1f6   : > { %2730 = vmatmul.mubr.bf16.gmra.mrb[8].mxu0 %v8080_v59  ;;  %1966 = vmatprep.mubr.bf16.mxu1 %v590_v45  ;;  %v6905_v45 = vld [vmem:[%s7145_s11 + $0x90] sm:$0xff] }
 0x1f7   : > { %2737 = vmatprep.mubr.bf16.mxu0 %v7681_v41  ;;  %6165 = vmatpush3.bf16.msra.mxu0 %v6813_v54  ;;  %v591_v54 = vshrl.u32 %v9986_v2, 16  ;;  %v6903_v2 = vld [vmem:[%s7145_s11 + $0x10] sm:$0xff] }
 0x1f8   : > { %6166 = vmatprep.subr.bf16.mxu0 %v9984_v35  ;;  %1967 = vmatmul.mubr.bf16.vlgmr.msra.gmra.mrb[0].mxu1 %v9985_v28  ;;  %v1032_v28 = vunpack.c.l.b16 %v7729_v11  ;;  %v5629_v12 = vpack.c.bf16 %v6902_v18, %v6903_v2  ;;  %v6907_v11 = vld [vmem:[%s9800_s1 + $0x90] sm:$0xff]   ;;  %v992_v2 = vunpack.c.h.b16 %v7149_v8  ;;  %v6909_v8 = vld [vmem:[%s9800_s1 + $0xa0] sm:$0xff]  }
 0x1f9   : > { %6344 = vmatpush1.bf16.msra.mxu1 %v6901_v7  ;;  %v593_v26 = vor.u32 %v591_v54, %v589_v58  ;;  %v6906_v58 = vld [vmem:[%s7145_s11 + $0xa0] sm:$0xff]  ;;  %v1028_v7 = vunpack.c.h.b16 %v7324_v31  ;;  %v6825_v18 = vld [vmem:[%s9800_s1 + $0x230] sm:$0xff]  }
 0x1fa   : > { %6329 = vmatprep.subr.bf16.mxu1 %v9954_v30  ;;  %v8125_v54 = vpack.c.bf16 %v6906_v58, %v6905_v45  ;;  %v8127_v37 = vpack.c.b16 %v1032_v28, %v1029_v52  ;;  %v993_v52 = vunpack.c.h.b16 %v7617_v3  ;;  %v1002_v28 = vunpack.c.l.b16 %v7625_v57  ;;  %v6910_v57 = vld [vmem:[%s9800_s1 + $0xa8] sm:$0xff]   ;;  %v6911_v45 = vld [vmem:[%s9800_s1 + $0xb0] sm:$0xff]  }
 0x1fb   : > { %6167 = vmatpush3.bf16.msra.mxu0 %v6821_v20  ;;  %v5286_v20 = vcombine.low %v593_v26, %v7617_v3  ;;  %v1031_v26 = vunpack.c.l.b16 %v7327_v32  ;;  %v1047_v58 = vunpack.c.h.b16 %v7761_v56 }
 0x1fc   : > { %6168 = vmatprep.subr.bf16.mxu0 %v9984_v35  ;;  %v1179_v31 = vpack.c.b16 %v1002_v28, %v993_v52  ;;  %v6826_v52 = vld [vmem:[%s9800_s1 + $0x238] sm:$0xff]   ;;  %v1065_v28 = vunpack.c.h.b16 %v7793_v29 }
 0x1fd   : > { %6345 = vmatpush1.bf16.msra.mxu1 %v6904_v62  ;;  %1974 = vmatprep.mubr.bf16.mxu1 %v5286_v20  ;;  %v6908_v62 = vld [vmem:[%s9800_s1 + $0x98] sm:$0xff]   ;;  %v8149_v3 = vpack.c.b16 %v1031_v26, %v1028_v7 }
 0x1fe   : > { %2738 = vmatmul.mubr.bf16.gmra.mrb[12].mxu0 %v7284_v9  ;;  %6330 = vmatprep.subr.bf16.mxu1 %v9954_v30 }
 0x1ff   : > { %2745 = vmatprep.mubr.bf16.mxu0 %v8103_v33  ;;  %6169 = vmatpush3.bf16.msra.mxu0 %v6825_v18  ;;  %v1049_v18 = vunpack.c.l.b16 %v7397_v15  ;;  %v6918_v15 = vld [vmem:[%s9800_s1 + $0xd8] sm:$0xff]  }
 0x200   : > { %1975 = vmatmul.mubr.bf16.gmra.mrb[4].mxu1 %v5629_v12  ;;  %v9987_v12 = vld [vmem:[#allocation7_spill] sm:$0xff]  ;;  %6170 = vmatprep.subr.bf16.mxu0 %v9984_v35 }
 0x201   : > { %6346 = vmatpush1.bf16.msra.mxu1 %v6907_v11  ;;  %v1001_v20 = vunpack.c.l.b16 %v9987_v12  ;;  %1982 = vmatprep.mubr.bf16.mxu1 %v1179_v31  ;;  %v6914_v11 = vld [vmem:[%s7145_s11 + $0xe0] sm:$0xff]  ;;  %v1067_v31 = vunpack.c.l.b16 %v7447_v63  ;;  %v1083_v63 = vunpack.c.h.b16 %v7821_v47 }
 0x202   : > { %6331 = vmatprep.subr.bf16.mxu1 %v9954_v30 }
 0x203   : > { %v1178_v32 = vpack.c.b16 %v1001_v20, %v992_v2  ;;  %6171 = vmatpush3.bf16.msra.mxu0 %v6826_v52  ;;  %v1068_v2 = vunpack.c.l.b16 %v7798_v21  ;;  %v1064_v21 = vunpack.c.h.b16 %v7436_v53  ;;  %v5316_v53 = vcombine.low %v7808_v19, %v7821_v47  ;;  %v6930_v52 = vld [vmem:[%s7145_s11 + $0x1e0] sm:$0xff] }
 0x204   : > { %v1085_v19 = vunpack.c.l.b16 %v7493_v16  ;;  %v1104_v16 = vunpack.c.l.b16 %v7854_v38  ;;  %v9991_v38 = vld [vmem:[#allocation42_spill] sm:$0xff] }
 0x205   : > { %6347 = vmatpush1.bf16.msra.mxu1 %v6908_v62  ;;  %v1239_v20 = vpack.c.b16 %v1068_v2, %v1065_v28  ;;  %v6925_v62 = vld [vmem:[%s7145_s11 + $0x150] sm:$0xff] }
 0x206   : > { %2746 = vmatmul.mubr.bf16.gmra.mrb[16].mxu0 %v8125_v54  ;;  %6332 = vmatprep.subr.bf16.mxu1 %v9954_v30  ;;  %v9998_v28 = vld [vmem:[#allocation47_spill] sm:$0xff] }
 0x207   : > { %2753 = vmatprep.mubr.bf16.mxu0 %v8127_v37  ;;  %v8286_v2 = vcombine.low %v9998_v28, %v7987_v4 }
 0x208   : > { %1983 = vmatmul.mubr.bf16.gmra.mrb[8].mxu1 %v1178_v32  ;;  %v1086_v32 = vunpack.c.l.b16 %v7826_v22  ;;  %v5322_v22 = vcombine.low %v7836_v49, %v7849_v50 }
 0x209   : > { %1990 = vmatprep.mubr.bf16.mxu1 %v7629_v42  ;;  %6348 = vmatpush1.bf16.msra.mxu1 %v6909_v8  ;;  %v8164_v42 = vcombine.low %v7743_v27, %v7761_v56  ;;  %v1050_v27 = vunpack.c.l.b16 %v7766_v5  ;;  %v6915_v56 = vld [vmem:[%s9800_s1 + $0xc0] sm:$0xff]   ;;  %v1046_v5 = vunpack.c.h.b16 %v7395_v14  ;;  %v6917_v14 = vld [vmem:[%s9800_s1 + $0xd0] sm:$0xff]  }
 0x20a   : > { %6333 = vmatprep.subr.bf16.mxu1 %v9954_v30  ;;  %v1257_v8 = vpack.c.b16 %v1086_v32, %v1083_v63 }
 0x20b   : > { %v8184_v26 = vpack.c.b16 %v1050_v27, %v1047_v58  ;;  %v9988_v58 = vld [vmem:[#allocation23_spill] sm:$0xff]  ;;  %v9989_v27 = vld [vmem:[#allocation24_spill] sm:$0xff] }
 0x20c   : > { %v1100_v49 = vunpack.c.h.b16 %v9988_v58 }
 0x20d   : > { %6349 = vmatpush1.bf16.msra.mxu1 %v6910_v57  ;;  %v6927_v57 = vld [vmem:[%s7145_s11 + $0x190] sm:$0xff] }
 0x20e   : > { %2754 = vmatmul.mubr.bf16.gmra.mrb[20].mxu0 %v8149_v3  ;;  %6334 = vmatprep.subr.bf16.mxu1 %v9954_v30 }
 0x20f   : > { %2761 = vmatprep.mubr.bf16.mxu0 %v7733_v34 }
 0x210   : > { %1991 = vmatmul.mubr.bf16.gmra.mrb[12].mxu1 %v7222_v39  ;;  %v6912_v39 = vld [vmem:[%s9800_s1 + $0xb8] sm:$0xff]  }
 0x211   : > { %1998 = vmatprep.mubr.bf16.mxu1 %v8036_v0  ;;  %6350 = vmatpush1.bf16.msra.mxu1 %v6911_v45  ;;  %v6913_v0 = vld [vmem:[%s7145_s11 + $0xd0] sm:$0xff] }
 0x212   : > { %6335 = vmatprep.subr.bf16.mxu1 %v9954_v30  ;;  %v8182_v7 = vpack.c.bf16 %v6914_v11, %v6913_v0  ;;  %v9992_v0 = vld [vmem:[#allocation31_spill] sm:$0xff] }
 0x213   : > { %v5328_v11 = vcombine.low %v9992_v0, %v9991_v38 }
 0x215   : > { %6351 = vmatpush1.bf16.msra.mxu1 %v6912_v39 }
 0x216   : > { %2762 = vmatmul.mubr.bf16.gmra.mrb[24].mxu0 %v7354_v48  ;;  %6336 = vmatprep.subr.bf16.mxu1 %v9954_v30 }
 0x217   : > { %2769 = vmatprep.mubr.bf16.mxu0 %v8164_v42 }
 0x218   : > { %1999 = vmatmul.mubr.bf16.gmra.mrb[16].mxu1 %v8056_v36  ;;  %v6916_v36 = vld [vmem:[%s9800_s1 + $0xc8] sm:$0xff]  }
 0x219   : > { %2006 = vmatprep.mubr.bf16.mxu1 %v8058_v13  ;;  %6352 = vmatpush1.bf16.msra.mxu1 %v6915_v56  ;;  %v1220_v13 = vpack.c.b16 %v1049_v18, %v1046_v5  ;;  %v9994_v56 = vld [vmem:[#allocation43_spill] sm:$0xff] }
 0x21a   : > { %6337 = vmatprep.subr.bf16.mxu1 %v9954_v30  ;;  %v1122_v5 = vunpack.c.l.b16 %v9994_v56  ;;  %v6929_v18 = vld [vmem:[%s7145_s11 + $0x1d0] sm:$0xff]  ;;  %v10007_v56 = vld [vmem:[#allocation36_spill] sm:$0xff] }
 0x21d   : > { %6353 = vmatpush1.bf16.msra.mxu1 %v6916_v36  ;;  %v5643_v36 = vpack.c.bf16 %v6930_v52, %v6929_v18  ;;  %v10008_v18 = vld [vmem:[#allocation35_spill] sm:$0xff] }
 0x21e   : > { %2770 = vmatmul.mubr.bf16.gmra.mrb[28].mxu0 %v8182_v7  ;;  %6338 = vmatprep.subr.bf16.mxu1 %v9954_v30  ;;  %v1123_v52 = vunpack.c.l.b16 %v10008_v18  ;;  %v6836_v18 = vld [vmem:[%s9801_s2 + $0x20] sm:$0xff]  }
 0x21f   : > { %2777 = vmatprep.mubr.bf16.mxu0 %v8184_v26 }
 0x220   : > { %2007 = vmatmul.mubr.bf16.gmra.mrb[20].mxu1 %v8080_v59  ;;  %v6919_v59 = vld [vmem:[%s9800_s1 + $0xe0] sm:$0xff]  }
 0x221   : > { %2014 = vmatprep.mubr.bf16.mxu1 %v7681_v41  ;;  %6354 = vmatpush1.bf16.msra.mxu1 %v6917_v14  ;;  %v5310_v41 = vcombine.low %v7779_v23, %v7793_v29  ;;  %v6921_v23 = vld [vmem:[%s7145_s11 + $0x110] sm:$0xff] }
 0x222   : > { %6339 = vmatprep.subr.bf16.mxu1 %v9954_v30  ;;  %v6923_v29 = vld [vmem:[%s9800_s1 + $0xf0] sm:$0xff]  }
 0x225   : > { %6355 = vmatpush1.bf16.msra.mxu1 %v6918_v15 }
 0x226   : > { %2778 = vmatmul.mubr.bf16.gmra.mrb[32].mxu0 %v1220_v13  ;;  %6340 = vmatprep.subr.bf16.mxu1 %v9954_v30 }
 0x227   : > { %2785 = vmatprep.mubr.bf16.mxu0 %v7773_v61 }
 0x228   : > { %2015 = vmatmul.mubr.bf16.gmra.mrb[24].mxu1 %v7284_v9  ;;  %v6920_v9 = vld [vmem:[%s9800_s1 + $0xe8] sm:$0xff]  }
 0x229   : > { %2022 = vmatprep.mubr.bf16.mxu1 %v8103_v33  ;;  %6356 = vmatpush1.bf16.msra.mxu1 %v6919_v59  ;;  %v6922_v33 = vld [vmem:[%s7145_s11 + $0x120] sm:$0xff]  ;;  %v9997_v59 = vld [vmem:[#allocation44_spill] sm:$0xff] }
 0x22a   : > { %6341 = vmatprep.subr.bf16.mxu1 %v9954_v30  ;;  %v5637_v12 = vpack.c.bf16 %v6922_v33, %v6921_v23  ;;  %v247_v23 = vld [vmem:[%s7145_s11 + $0x268] sm:$0xff]  ;;  %v9999_v33 = vld [vmem:[#allocation33_spill] sm:$0xff] }
 0x22d   : > { %6357 = vmatpush1.bf16.msra.mxu1 %v6920_v9  ;;  %v246_v9 = vld [vmem:[%s7145_s11 + $0x260] sm:$0xff] }
 0x22e   : > { %2786 = vmatmul.mubr.bf16.gmra.mrb[36].mxu0 %v7414_v24  ;;  %6342 = vmatprep.subr.bf16.mxu1 %v9954_v30 }
 0x22f   : > { %2793 = vmatprep.mubr.bf16.mxu0 %v5310_v41 }
 0x230   : > { %2023 = vmatmul.mubr.bf16.gmra.mrb[28].mxu1 %v8125_v54  ;;  %v6924_v54 = vld [vmem:[%s9800_s1 + $0xf8] sm:$0xff]  }
 0x231   : > { %2030 = vmatprep.mubr.bf16.mxu1 %v8127_v37  ;;  %6358 = vmatpush1.bf16.msra.mxu1 %v6923_v29  ;;  %v1238_v37 = vpack.c.b16 %v1067_v31, %v1064_v21  ;;  %v248_v29 = vld [vmem:[%s7145_s11 + $0x270] sm:$0xff]  ;;  %v249_v21 = vld [vmem:[%s7145_s11 + $0x278] sm:$0x3]  ;;  %v10000_v31 = vld [vmem:[#allocation38_spill] sm:$0xff] }
 0x232   : > { %6343 = vmatprep.subr.bf16.mxu1 %v9954_v30 }
 0x235   : > { %6359 = vmatpush1.bf16.msra.mxu1 %v6924_v54  ;;  %v10001_v54 = vld [vmem:[#allocation45_spill] sm:$0xff] }
 0x236   : > { %2794 = vmatmul.mubr.bf16.gmra.mrb[40].mxu0 %v5637_v12 }
 0x237   : > { %2801 = vmatprep.mubr.bf16.mxu0 %v1239_v20 }
 0x238   : > { %2031 = vmatmul.mubr.bf16.gmra.mrb[32].mxu1 %v8149_v3  ;;  %v6926_v3 = vld [vmem:[%s7145_s11 + $0x160] sm:$0xff] }
 0x239   : > { %2038 = vmatprep.mubr.bf16.mxu1 %v7733_v34  ;;  %v5639_v34 = vpack.c.bf16 %v6926_v3, %v6925_v62  ;;  %v1139_v62 = vunpack.c.l.b16 %v7929_v51 }
 0x23e   : > { %2802 = vmatmul.mubr.bf16.gmra.mrb[44].mxu0 %v1238_v37 }
 0x23f   : > { %2809 = vmatprep.mubr.bf16.mxu0 %v7802_v60 }
 0x240   : > { %2039 = vmatmul.mubr.bf16.gmra.mrb[36].mxu1 %v7354_v48  ;;  %v1082_v48 = vunpack.c.h.b16 %v7482_v55  ;;  %v1101_v55 = vunpack.c.h.b16 %v7849_v50  ;;  %v9990_v50 = vld [vmem:[#allocation27_spill] sm:$0xff] }
 0x241   : > { %2046 = vmatprep.mubr.bf16.mxu1 %v8164_v42  ;;  %v6928_v42 = vld [vmem:[%s7145_s11 + $0x1a0] sm:$0xff] }
 0x242   : > { %v1256_v47 = vpack.c.b16 %v1085_v19, %v1082_v48  ;;  %v5641_v45 = vpack.c.bf16 %v6928_v42, %v6927_v57  ;;  %v10004_v42 = vld [vmem:[#allocation50_spill] sm:$0xff] }
 0x246   : > { %2810 = vmatmul.mubr.bf16.gmra.mrb[48].mxu0 %v7456_v10 }
 0x247   : > { %2817 = vmatprep.mubr.bf16.mxu0 %v5316_v53 }
 0x248   : > { %2047 = vmatmul.mubr.bf16.gmra.mrb[40].mxu1 %v8182_v7  ;;  %v9993_v7 = vld [vmem:[#allocation26_spill] sm:$0xff] }
 0x249   : > { %2054 = vmatprep.mubr.bf16.mxu1 %v8184_v26  ;;  %v1119_v26 = vunpack.c.h.b16 %v9991_v38 }
 0x24e   : > { %2818 = vmatmul.mubr.bf16.gmra.mrb[52].mxu0 %v5639_v34 }
 0x24f   : > { %2825 = vmatprep.mubr.bf16.mxu0 %v1257_v8 }
 0x250   : > { %2055 = vmatmul.mubr.bf16.gmra.mrb[44].mxu1 %v1220_v13  ;;  %v9995_v13 = vld [vmem:[#allocation30_spill] sm:$0xff] }
 0x251   : > { %2062 = vmatprep.mubr.bf16.mxu1 %v7773_v61  ;;  %v1275_v61 = vpack.c.b16 %v1104_v16, %v1101_v55  ;;  %v1118_v14 = vunpack.c.h.b16 %v9995_v13  ;;  %v10010_v13 = vld [vmem:[#allocation39_spill] sm:$0xff] }
 0x256   : > { %2826 = vmatmul.mubr.bf16.gmra.mrb[56].mxu0 %v1256_v47 }
 0x257   : > { %2833 = vmatprep.mubr.bf16.mxu0 %v7830_v6 }
 0x258   : > { %2063 = vmatmul.mubr.bf16.gmra.mrb[48].mxu1 %v7414_v24  ;;  %v1103_v24 = vunpack.c.l.b16 %v9989_v27 }
 0x259   : > { %2070 = vmatprep.mubr.bf16.mxu1 %v5310_v41 }
 0x25a   : > { %v1274_v39 = vpack.c.b16 %v1103_v24, %v1100_v49 }
 0x25e   : > { %2834 = vmatmul.mubr.bf16.gmra.mrb[60].mxu0 %v7502_v44 }
 0x25f   : > { %2841 = vmatprep.mubr.bf16.mxu0 %v5322_v22 }
 0x260   : > { %2071 = vmatmul.mubr.bf16.gmra.mrb[52].mxu1 %v5637_v12  ;;  %v1137_v12 = vunpack.c.h.b16 %v7987_v4  ;;  %v10003_v4 = vld [vmem:[#allocation48_spill] sm:$0xff] }
 0x261   : > { %2078 = vmatprep.mubr.bf16.mxu1 %v1239_v20  ;;  %v8295_v20 = vpack.c.bf16 %v247_v23, %v246_v9  ;;  %v1136_v32 = vunpack.c.h.b16 %v10003_v4 }
 0x263   : > { %v867_v63 = vshll.u32 %v8295_v20, 16 }
 0x265   : > { %v869_v3 = vrot.slane %v867_v63, 1  ;;  %v10018_v63 = vld [vmem:[#allocation13_spill] sm:$0xff] }
 0x266   : > { %2842 = vmatmul.mubr.bf16.gmra.mrb[64].mxu0 %v5641_v45 }
 0x267   : > { %2849 = vmatprep.mubr.bf16.mxu0 %v1275_v61 }
 0x268   : > { %2079 = vmatmul.mubr.bf16.gmra.mrb[56].mxu1 %v1238_v37  ;;  %v5645_v37 = vpack.c.bf16 %v10001_v54, %v10000_v31  ;;  %v10016_v54 = vld [vmem:[#allocation51_spill] sm:$0xff] }
 0x269   : > { %2086 = vmatprep.mubr.bf16.mxu1 %v7802_v60  ;;  %v1293_v60 = vpack.c.b16 %v1122_v5, %v1119_v26  ;;  %v10006_v26 = vld [vmem:[#allocation9_spill] sm:$0xff]  ;;  %v1120_v5 = vunpack.c.h.b16 %v10007_v56 }
 0x26e   : > { %2850 = vmatmul.mubr.bf16.gmra.mrb[68].mxu0 %v1274_v39 }
 0x26f   : > { %2857 = vmatprep.mubr.bf16.mxu0 %v9990_v50 }
 0x270   : > { %2087 = vmatmul.mubr.bf16.gmra.mrb[60].mxu1 %v7456_v10  ;;  %v9996_v10 = vld [vmem:[#allocation32_spill] sm:$0xff] }
 0x271   : > { %2094 = vmatprep.mubr.bf16.mxu1 %v5316_v53  ;;  %v1121_v15 = vunpack.c.l.b16 %v9996_v10 }
 0x273   : > { %v1292_v41 = vpack.c.b16 %v1121_v15, %v1118_v14  ;;  %v1130_v14 = vunpack.c.l.b16 %v10010_v13  ;;  %v8334_v15 = vpack.c.b16 %v1123_v52, %v1120_v5  ;;  %v6835_v5 = vld [vmem:[%s9801_s2 + $0x60] sm:$0xff]   ;;  %v1138_v52 = vunpack.c.h.b16 %v10016_v54  ;;  %v10025_v13 = vld [vmem:[#allocation20_spill] sm:$0xff] }
 0x276   : > { %2858 = vmatmul.mubr.bf16.gmra.mrb[72].mxu0 %v9993_v7 }
 0x277   : > { %2865 = vmatprep.mubr.bf16.mxu0 %v5328_v11 }
 0x278   : > { %2095 = vmatmul.mubr.bf16.gmra.mrb[64].mxu1 %v5639_v34 }
 0x279   : > { %2102 = vmatprep.mubr.bf16.mxu1 %v1257_v8  ;;  %v1310_v8 = vpack.c.b16 %v1139_v62, %v1136_v32  ;;  %v10020_v32 = vld [vmem:[#allocation15_spill] sm:$0xff] }
 0x27e   : > { %2866 = vmatmul.mubr.bf16.gmra.mrb[76].mxu0 %v5643_v36 }
 0x27f   : > { %2873 = vmatprep.mubr.bf16.mxu0 %v1293_v60 }
 0x280   : > { %2103 = vmatmul.mubr.bf16.gmra.mrb[68].mxu1 %v1256_v47 }
 0x281   : > { %2110 = vmatprep.mubr.bf16.mxu1 %v7830_v6  ;;  %v1140_v6 = vunpack.c.l.b16 %v7993_v40  ;;  %v865_v40 = vshrl.u32 %v8295_v20, 16 }
 0x283   : > { %v1311_v53 = vpack.c.b16 %v1140_v6, %v1137_v12  ;;  %v870_v48 = vor.u32 %v869_v3, %v865_v40  ;;  %v10012_v12 = vld [vmem:[#allocation41_spill] sm:$0xff]  ;;  %v10013_v6 = vld [vmem:[#allocation12_spill] sm:$0xff] }
 0x284   : > { %v10021_v3 = vld [vmem:[#allocation16_spill] sm:$0xff] }
 0x286   : > { %2874 = vmatmul.mubr.bf16.gmra.mrb[80].mxu0 %v1292_v41 }
 0x287   : > { %2881 = vmatprep.mubr.bf16.mxu0 %v9997_v59 }
 0x288   : > { %2111 = vmatmul.mubr.bf16.gmra.mrb[72].mxu1 %v7502_v44  ;;  %v8301_v44 = vpack.c.bf16 %v249_v21, %v248_v29  ;;  %v10014_v29 = vld [vmem:[#allocation46_spill] sm:$0xff]  ;;  %v10015_v21 = vld [vmem:[#allocation49_spill] sm:$0xff] }
 0x289   : > { %2118 = vmatprep.mubr.bf16.mxu1 %v5322_v22  ;;  %v5646_v31 = vpack.c.bf16 %v10015_v21, %v10014_v29  ;;  %v6842_v21 = vld [vmem:[%s9801_s2 + $0x38] sm:$0xff]  }
 0x28a   : > { %10002 = vst [vmem:[#allocation5_spill] sm:$0xff] %v8301_v44  ;;  %v872_v34 = vshll.u32 %v8301_v44, 16  ;;  %v876_v47 = vshrl.u32 %v8301_v44, 16  ;;  %v1157_v58 = vunpack.c.l.b16 %v8301_v44 }
 0x28c   : > { %v874_v19 = vrot.slane %v872_v34, 1 }
 0x28e   : > { %2882 = vmatmul.mubr.bf16.gmra.mrb[84].mxu0 %v9999_v33  ;;  %v875_v22 = vsel %vm578_vm1, %v870_v48, %v874_v19  ;;  %v878_v55 = vor.u32 %v876_v47, %v874_v19  ;;  %v10022_v47 = vld [vmem:[#allocation17_spill] sm:$0xff] }
 0x28f   : > { %2889 = vmatprep.mubr.bf16.mxu0 %v8286_v2  ;;  %v5340_v51 = vcombine.low %v8010_v43, %v875_v22  ;;  %v1155_v16 = vunpack.c.h.b16 %v875_v22 }
 0x290   : > { %2119 = vmatmul.mubr.bf16.gmra.mrb[76].mxu1 %v5641_v45  ;;  %v1158_v57 = vunpack.c.l.b16 %v878_v55  ;;  %v5647_v45 = vpack.c.bf16 %v246_v9, %v10004_v42  ;;  %v10011_v9 = vld [vmem:[#allocation11_spill] sm:$0xff]  ;;  %v6828_v42 = vld [vmem:[%s9801_s2] sm:$0xff]  }
 0x291   : > { %2126 = vmatprep.mubr.bf16.mxu1 %v1275_v61 }
 0x292   : > { %v1329_v61 = vpack.c.b16 %v1158_v57, %v1155_v16  ;;  %v6827_v57 = vld [vmem:[%s9801_s2 + $0x40] sm:$0xff]  }
 0x293   : > { %5684 = vmatprep.subr.bf16.mxu1 %v6827_v57 }
 0x296   : > { %2890 = vmatmul.mubr.bf16.gmra.mrb[88].mxu0 %v5645_v37 }
 0x297   : > { %2897 = vmatprep.mubr.bf16.mxu0 %v1311_v53 }
 0x298   : > { %2127 = vmatmul.mubr.bf16.gmra.mrb[80].mxu1 %v1274_v39 }
 0x299   : > { %2134 = vmatprep.mubr.bf16.mxu1 %v9990_v50 }
 0x29e   : > { %2898 = vmatmul.mubr.bf16.gmra.mrb[96].mxu0 %v1310_v8 }
 0x29f   : > { %2905 = vmatprep.mubr.bf16.mxu0 %v8000_v1  ;;  %v1154_v1 = vunpack.c.h.b16 %v8295_v20 }
 0x2a0   : > { %2135 = vmatmul.mubr.bf16.gmra.mrb[84].mxu1 %v9993_v7  ;;  %v10005_v7 = vld [vmem:[#allocation8_spill] sm:$0xff] }
 0x2a1   : > { %2142 = vmatprep.mubr.bf16.mxu1 %v5328_v11  ;;  %v1328_v27 = vpack.c.b16 %v1157_v58, %v1154_v1  ;;  %v6830_v1 = vld [vmem:[%s9801_s2 + $0x8] sm:$0xff]  }
 0x2a6   : > { %2906 = vmatmul.mubr.bf16.gmra.mrb[100].mxu0 %v7946_v46 }
 0x2a7   : > { %2913 = vmatprep.mubr.bf16.mxu0 %v5340_v51 }
 0x2a8   : > { %2143 = vmatmul.mubr.bf16.gmra.mrb[88].mxu1 %v5643_v36  ;;  %v10009_v36 = vld [vmem:[#allocation10_spill] sm:$0xff] }
 0x2a9   : > { %2150 = vmatprep.mubr.bf16.mxu1 %v1293_v60  ;;  %v1127_v60 = vunpack.c.h.b16 %v9999_v33 }
 0x2ae   : > { %2914 = vmatmul.mubr.bf16.gmra.mrb[104].mxu0 %v5647_v45 }
 0x2af   : > { %2921 = vmatprep.mubr.bf16.mxu0 %v1329_v61  ;;  %v6829_v61 = vld [vmem:[%s9801_s2 + $0x48] sm:$0xff]  }
 0x2b0   : > { %2151 = vmatmul.mubr.bf16.gmra.mrb[92].mxu1 %v1292_v41 }
 0x2b1   : > { %v2674_v43 = vpop.f32.mrb[108].mxu0  ;;  %2158 = vmatprep.mubr.bf16.mxu1 %v9997_v59  ;;  %v1307_v59 = vpack.c.b16 %v1130_v14, %v1127_v60  ;;  %v6837_v60 = vld [vmem:[%s9801_s2 + $0x68] sm:$0xff]  }
 0x2b2   : > { %v2676_v49 = vpop.f32.mrb[109].mxu0  ;;  %v10023_v43 = vld [vmem:[#allocation18_spill] sm:$0xff] }
 0x2b3   : > { %v2677_v24 = vpop.f32.mrb[110].mxu0 }
 0x2b4   : > { %v2679_v39 = vpop.f32.mrb[111].mxu0  ;;  %v6831_v24 = vld [vmem:[%s9801_s2 + $0x50] sm:$0xff]  }
 0x2b5   : > { %v6832_v39 = vld [vmem:[%s9801_s2 + $0x10] sm:$0xff]  }
 0x2b6   : > { %2922 = vmatmul.mubr.bf16.gmra.mrb[116].mxu0 %v1328_v27 }
 0x2b7   : > { %6172 = vmatprep.mubr.msk.bf16.mxu0 %vm7045_vm2, %v9984_v35 }
 0x2b8   : > { %2159 = vmatmul.mubr.bf16.gmra.mrb[96].mxu1 %v9999_v33 }
 0x2b9   : > { %v2715_v50 = vpop.f32.mrb[112].mxu0  ;;  %2166 = vmatprep.mubr.bf16.mxu1 %v8286_v2 }
 0x2ba   : > { %v2717_v38 = vpop.f32.mrb[113].mxu0 }
 0x2bb   : > { %v2718_v0 = vpop.f32.mrb[114].mxu0  ;;  %v6833_v38 = vld [vmem:[%s9801_s2 + $0x58] sm:$0xff]  }
 0x2bc   : > { %v2720_v11 = vpop.f32.mrb[115].mxu0  ;;  %v6834_v0 = vld [vmem:[%s9801_s2 + $0x18] sm:$0xff]  }
 0x2be   : > { %6173 = vmatmul.mubr.bf16.vlgmr.msra.gmra.mrb[120].mxu0 %v10005_v7  ;;  %v10024_v7 = vld [vmem:[#allocation19_spill] sm:$0xff] }
 0x2bf   : > { %6176 = vmatprep.mubr.msk.bf16.mxu0 %vm7045_vm2, %v9984_v35 }
 0x2c0   : > { %2167 = vmatmul.mubr.bf16.gmra.mrb[100].mxu1 %v5645_v37  ;;  %v10017_v37 = vld [vmem:[#allocation40_spill] sm:$0xff] }
 0x2c1   : > { %2174 = vmatprep.mubr.bf16.mxu1 %v1311_v53  ;;  %v8351_v53 = vcombine.low %v10017_v37, %v10016_v54  ;;  %v8463_v37 = vrot.slane %v9954_v30, 1 }
 0x2c3   : > { %10027 = vst [vmem:[#allocation6_spill] sm:$0xff] %v8463_v37 }
 0x2c6   : > { %6177 = vmatmul.mubr.bf16.gmra.mrb[4].mxu0 %v10006_v26 }
 0x2c7   : > { %6180 = vmatprep.mubr.msk.bf16.mxu0 %vm7045_vm2, %v9984_v35 }
 0x2c8   : > { %2175 = vmatmul.mubr.bf16.gmra.mrb[104].mxu1 %v1310_v8 }
 0x2c9   : > { %2399 = vmatprep.mubr.bf16.mxu1 %v1307_v59  ;;  %v1148_v59 = vunpack.c.l.b16 %v7953_v25  ;;  %v6841_v25 = vld [vmem:[%s9801_s2 + $0x78] sm:$0xff]  }
 0x2cb   : > { %v1968_v10 = vpop.f32.mrb[0].mxu1 }
 0x2cc   : > { %v1970_v41 = vpop.f32.mrb[1].mxu1  ;;  %v6838_v10 = vld [vmem:[%s9801_s2 + $0x28] sm:$0xff]  }
 0x2cd   : > { %v1971_v28 = vpop.f32.mrb[2].mxu1  ;;  %v1145_v41 = vunpack.c.h.b16 %v7946_v46  ;;  %v6840_v46 = vld [vmem:[%s9801_s2 + $0x30] sm:$0xff]  }
 0x2ce   : > { %6181 = vmatmul.mubr.bf16.gmra.mrb[8].mxu0 %v10009_v36  ;;  %v1973_v2 = vpop.f32.mrb[3].mxu1  ;;  %v1141_v36 = vunpack.c.l.b16 %v7950_v17 }
 0x2cf   : > { %6184 = vmatprep.mubr.msk.bf16.mxu0 %vm7045_vm2, %v9984_v35  ;;  %v1325_v2 = vpack.c.b16 %v1148_v59, %v1145_v41 }
 0x2d0   : > { %2400 = vmatmul.mubr.bf16.vlgmr.msra.gmra.mrb[92].mxu1 %v8334_v15 }
 0x2d1   : > { %2407 = vmatprep.mubr.bf16.mxu1 %v10003_v4  ;;  %v10019_v4 = vld [vmem:[#allocation14_spill] sm:$0xff]  ;;  %5685 = vmatpush3.bf16.msra.mxu1 %v6828_v42  ;;  %v10030_v42 = vld [vmem:[#allocation28_spill] sm:$0xff] }
 0x2d2   : > { %5686 = vmatprep.subr.bf16.mxu1 %v6829_v61 }
 0x2d3   : > { %v1976_v23 = vpop.f32.mrb[4].mxu1 }
 0x2d4   : > { %v1978_v33 = vpop.f32.mrb[5].mxu1 }
 0x2d5   : > { %v8361_v62 = vpop.f32.mrb[6].mxu1  ;;  %5687 = vmatpush3.bf16.msra.mxu1 %v6830_v1  ;;  %v6839_v33 = vld [vmem:[%s9801_s2 + $0x70] sm:$0xff]  }
 0x2d6   : > { %6185 = vmatmul.mubr.bf16.gmra.mrb[12].mxu0 %v10011_v9  ;;  %v1981_v40 = vpop.f32.mrb[7].mxu1  ;;  %5688 = vmatprep.subr.bf16.mxu1 %v6831_v24  ;;  %v8440_v9 = vpack.c.b16 %v1141_v36, %v1138_v52  ;;  %v10033_v52 = vld [vmem:[#allocation37_spill] sm:$0xff] }
 0x2d7   : > { %6188 = vmatprep.mubr.msk.bf16.mxu0 %vm7045_vm2, %v9984_v35 }
 0x2d8   : > { %2408 = vmatmul.mubr.bf16.gmra.mrb[96].mxu1 %v10012_v12 }
 0x2d9   : > { %2415 = vmatprep.mubr.bf16.mxu1 %v5646_v31  ;;  %5689 = vmatpush3.bf16.msra.mxu1 %v6832_v39 }
 0x2da   : > { %5690 = vmatprep.subr.bf16.mxu1 %v6833_v38 }
 0x2db   : > { %v8366_v34 = vpop.f32.mrb[8].mxu1 }
 0x2dc   : > { %v1986_v8 = vpop.f32.mrb[9].mxu1 }
 0x2dd   : > { %v8370_v48 = vpop.f32.mrb[10].mxu1  ;;  %5691 = vmatpush3.bf16.msra.mxu1 %v6834_v0 }
 0x2de   : > { %6189 = vmatmul.mubr.bf16.gmra.mrb[16].mxu0 %v10013_v6  ;;  %v1989_v19 = vpop.f32.mrb[11].mxu1  ;;  %5692 = vmatprep.subr.bf16.mxu1 %v6835_v5  ;;  %v10026_v6 = vld [vmem:[#allocation21_spill] sm:$0xff] }
 0x2df   : > { %6192 = vmatprep.mubr.msk.bf16.mxu0 %vm7045_vm2, %v9984_v35 }
 0x2e0   : > { %2416 = vmatmul.mubr.bf16.gmra.mrb[100].mxu1 %v8351_v53 }
 0x2e1   : > { %5693 = vmatpush3.bf16.msra.mxu1 %v6836_v18  ;;  %2423 = vmatprep.mubr.bf16.mxu1 %v1325_v2 }
 0x2e2   : > { %5694 = vmatprep.subr.bf16.mxu1 %v6837_v60 }
 0x2e3   : > { %v8373_v22 = vpop.f32.mrb[12].mxu1 }
 0x2e4   : > { %v1994_v51 = vpop.f32.mrb[13].mxu1 }
 0x2e5   : > { %v8377_v55 = vpop.f32.mrb[14].mxu1  ;;  %5695 = vmatpush3.bf16.msra.mxu1 %v6838_v10 }
 0x2e6   : > { %6193 = vmatmul.mubr.bf16.gmra.mrb[20].mxu0 %v10018_v63  ;;  %v1997_v16 = vpop.f32.mrb[15].mxu1  ;;  %5696 = vmatprep.subr.bf16.mxu1 %v6839_v33 }
 0x2e7   : > { %6196 = vmatprep.mubr.msk.bf16.mxu0 %vm7045_vm2, %v9984_v35 }
 0x2e8   : > { %2424 = vmatmul.mubr.bf16.gmra.mrb[108].mxu1 %v8440_v9 }
 0x2e9   : > { %5697 = vmatpush3.bf16.msra.mxu1 %v6840_v46  ;;  %4205 = vmatprep.mubr.bf16.mxu1 %v8463_v37 }
 0x2ea   : > { %5698 = vmatprep.subr.bf16.mxu1 %v6841_v25  ;;  %v6843_v25 = vld [vmem:[%s9801_s2 + $0xc0] sm:$0xff]  }
 0x2eb   : > { %v8385_v45 = vpop.f32.mrb[16].mxu1 }
 0x2ec   : > { %v2002_v58 = vpop.f32.mrb[17].mxu1 }
 0x2ed   : > { %v8394_v49 = vpop.f32.mrb[18].mxu1  ;;  %5699 = vmatpush3.bf16.msra.mxu1 %v6842_v21 }
 0x2ee   : > { %6197 = vmatmul.mubr.bf16.gmra.mrb[24].mxu0 %v10019_v4  ;;  %v2005_v27 = vpop.f32.mrb[19].mxu1  ;;  %v9882_v4 = vmov 0.0|0.0   ;;  %5796 = vmatprep.subr.bf16.mxu1 %v6843_v25 }
 0x2ef   : > { %6200 = vmatprep.mubr.msk.bf16.mxu0 %vm7045_vm2, %v9984_v35  ;;  %v10031_v27 = vld [vmem:[#allocation29_spill] sm:$0xff] }
 0x2f0   : > { %4206 = vmatmul.mubr.bf16.vlgmr.msra.gmra.mrb[112].mxu1 %v9882_v4 }
 0x2f3   : > { %v8404_v50 = vpop.f32.mrb[20].mxu1 }
 0x2f4   : > { %v2010_v11 = vpop.f32.mrb[21].mxu1 }
 0x2f5   : > { %v8413_v26 = vpop.f32.mrb[22].mxu1  ;;  %v10032_v11 = vld [vmem:[#allocation34_spill] sm:$0xff] }
 0x2f6   : > { %6201 = vmatmul.mubr.bf16.gmra.mrb[28].mxu0 %v10020_v32  ;;  %v2013_v56 = vpop.f32.mrb[23].mxu1  ;;  %v10028_v32 = vld [vmem:[#allocation22_spill] sm:$0xff] }
 0x2f7   : > { %6204 = vmatprep.mubr.msk.bf16.mxu0 %vm7045_vm2, %v9984_v35 }
 0x2fb   : > { %v8429_v14 = vpop.f32.mrb[24].mxu1 }
 0x2fc   : > { %v2018_v17 = vpop.f32.mrb[25].mxu1 }
 0x2fd   : > { %v8438_v28 = vpop.f32.mrb[26].mxu1 }
 0x2fe   : > { %6205 = vmatmul.mubr.bf16.gmra.mrb[32].mxu0 %v10021_v3  ;;  %v2021_v23 = vpop.f32.mrb[27].mxu1 }
 0x2ff   : > { %6208 = vmatprep.mubr.msk.bf16.mxu0 %vm7045_vm2, %v9984_v35 }
 0x303   : > { %v8453_v29 = vpop.f32.mrb[28].mxu1 }
 0x304   : > { %v2026_v31 = vpop.f32.mrb[29].mxu1 }
 0x305   : > { %v8460_v54 = vpop.f32.mrb[30].mxu1 }
 0x306   : > { %6209 = vmatmul.mubr.bf16.gmra.mrb[36].mxu0 %v10022_v47  ;;  %v2029_v63 = vpop.f32.mrb[31].mxu1  ;;  %v10029_v47 = vld [vmem:[#allocation25_spill] sm:$0xff] }
 0x307   : > { %6212 = vmatprep.mubr.msk.bf16.mxu0 %vm7045_vm2, %v9984_v35 }
 0x30b   : > { %v8468_v40 = vpop.f32.mrb[32].mxu1 }
 0x30c   : > { %v2034_v3 = vpop.f32.mrb[33].mxu1 }
 0x30d   : > { %v8472_v8 = vpop.f32.mrb[34].mxu1 }
 0x30e   : > { %6213 = vmatmul.mubr.bf16.gmra.mrb[40].mxu0 %v10023_v43  ;;  %v2037_v19 = vpop.f32.mrb[35].mxu1 }
 0x30f   : > { %6216 = vmatprep.mubr.msk.bf16.mxu0 %vm7045_vm2, %v9984_v35 }
 0x313   : > { %v8475_v30 = vpop.f32.mrb[36].mxu1 }
 0x314   : > { %v2042_v51 = vpop.f32.mrb[37].mxu1 }
 0x315   : > { %v8479_v16 = vpop.f32.mrb[38].mxu1  ;;  %v6846_v51 = vld [vmem:[%s9801_s2 + $0x88] sm:$0xff]  }
 0x316   : > { %6217 = vmatmul.mubr.bf16.gmra.mrb[44].mxu0 %v10024_v7  ;;  %v2045_v57 = vpop.f32.mrb[39].mxu1 }
 0x317   : > { %6220 = vmatprep.mubr.msk.bf16.mxu0 %vm7045_vm2, %v9984_v35  ;;  %v977_v57 = vrot.slane %v8295_v20, 1 }
 0x31b   : > { %v8482_v61 = vpop.f32.mrb[40].mxu1 }
 0x31c   : > { %v2050_v1 = vpop.f32.mrb[41].mxu1 }
 0x31d   : > { %v8486_v58 = vpop.f32.mrb[42].mxu1 }
 0x31e   : > { %6221 = vmatmul.mubr.bf16.gmra.mrb[48].mxu0 %v10025_v13  ;;  %v2053_v43 = vpop.f32.mrb[43].mxu1 }
 0x31f   : > { %6224 = vmatprep.mubr.msk.bf16.mxu0 %vm7045_vm2, %v9984_v35 }
 0x323   : > { %v8489_v24 = vpop.f32.mrb[44].mxu1 }
 0x324   : > { %v2058_v39 = vpop.f32.mrb[45].mxu1 }
 0x325   : > { %v8493_v38 = vpop.f32.mrb[46].mxu1 }
 0x326   : > { %6225 = vmatmul.mubr.bf16.gmra.mrb[52].mxu0 %v10026_v6  ;;  %v2061_v0 = vpop.f32.mrb[47].mxu1  ;;  %v6844_v6 = vld [vmem:[%s9801_s2 + $0x80] sm:$0xff]  }
 0x327   : > { %6228 = vmatprep.mubr.msk.bf16.mxu0 %vm7045_vm2, %v9984_v35  ;;  %5797 = vmatpush3.bf16.msra.mxu1 %v6844_v6  ;;  %v10036_v0 = vld [vmem:[#allocation52_spill] sm:$0xff] }
 0x32b   : > { %v8496_v7 = vpop.f32.mrb[48].mxu1 }
 0x32c   : > { %v2066_v56 = vpop.f32.mrb[49].mxu1 }
 0x32d   : > { %v8500_v5 = vpop.f32.mrb[50].mxu1 }
 0x32e   : > { %6229 = vmatmul.mubr.bf16.gmra.mrb[56].mxu0 %v10028_v32  ;;  %v2069_v18 = vpop.f32.mrb[51].mxu1 }
 0x32f   : > { %6232 = vmatprep.mubr.msk.bf16.mxu0 %vm7045_vm2, %v9984_v35 }
 0x333   : > { %v8503_v36 = vpop.f32.mrb[52].mxu1 }
 0x334   : > { %v2074_v60 = vpop.f32.mrb[53].mxu1 }
 0x335   : > { %v8507_v13 = vpop.f32.mrb[54].mxu1 }
 0x336   : > { %6233 = vmatmul.mubr.bf16.gmra.mrb[60].mxu0 %v10029_v47  ;;  %v2077_v10 = vpop.f32.mrb[55].mxu1  ;;  %v6845_v47 = vld [vmem:[%s9801_s2 + $0xc8] sm:$0xff]  }
 0x337   : > { %6236 = vmatprep.mubr.msk.bf16.mxu0 %vm7045_vm2, %v9984_v35  ;;  %5798 = vmatprep.subr.bf16.mxu1 %v6845_v47 }
 0x338   : > { %5799 = vmatpush3.bf16.msra.mxu1 %v6846_v51 }
 0x33b   : > { %v8510_v41 = vpop.f32.mrb[56].mxu1 }
 0x33c   : > { %v2082_v59 = vpop.f32.mrb[57].mxu1 }
 0x33d   : > { %v8514_v17 = vpop.f32.mrb[58].mxu1 }
 0x33e   : > { %6237 = vmatmul.mubr.bf16.gmra.mrb[64].mxu0 %v10030_v42  ;;  %v2085_v2 = vpop.f32.mrb[59].mxu1  ;;  %v10034_v42 = vld [vmem:[#allocation53_spill] sm:$0xff] }
 0x33f   : > { %6240 = vmatprep.mubr.msk.bf16.mxu0 %vm7045_vm2, %v9984_v35 }
 0x343   : > { %v8517_v23 = vpop.f32.mrb[60].mxu1 }
 0x344   : > { %v2090_v33 = vpop.f32.mrb[61].mxu1 }
 0x345   : > { %v8521_v46 = vpop.f32.mrb[62].mxu1  ;;  %v6847_v33 = vld [vmem:[%s9801_s2 + $0xd0] sm:$0xff]  }
 0x346   : > { %6241 = vmatmul.mubr.bf16.gmra.mrb[68].mxu0 %v10031_v27  ;;  %5800 = vmatprep.subr.bf16.mxu1 %v6847_v33 }
 0x347   : > { %6244 = vmatprep.mubr.msk.bf16.mxu0 %vm7045_vm2, %v9984_v35 }
 0x34e   : > { %6245 = vmatmul.mubr.bf16.gmra.mrb[72].mxu0 %v10032_v11 }
 0x34f   : > { %6248 = vmatprep.mubr.msk.bf16.mxu0 %vm7045_vm2, %v9984_v35 }
 0x356   : > { %6249 = vmatmul.mubr.bf16.gmra.mrb[76].mxu0 %v10033_v52 }
 0x357   : > { %6252 = vmatprep.mubr.msk.bf16.mxu0 %vm7045_vm2, %v9984_v35 }
 0x35e   : > { %6253 = vmatmul.mubr.bf16.gmra.mrb[80].mxu0 %v8334_v15  ;;  %v2093_v15 = vpop.f32.mrb[63].mxu1 }
 0x35f   : > { %6256 = vmatprep.mubr.msk.bf16.mxu0 %vm7045_vm2, %v9984_v35  ;;  %v6848_v15 = vld [vmem:[%s9801_s2 + $0x90] sm:$0xff]  }
 0x360   : > { %5801 = vmatpush3.bf16.msra.mxu1 %v6848_v15 }
 0x366   : > { %6257 = vmatmul.mubr.bf16.gmra.mrb[84].mxu0 %v10012_v12  ;;  %v8530_v12 = vpop.f32.mrb[64].mxu1 }
 0x367   : > { %6260 = vmatprep.mubr.msk.bf16.mxu0 %vm7045_vm2, %v9984_v35  ;;  %v2098_v21 = vpop.f32.mrb[65].mxu1 }
 0x368   : > { %v8534_v31 = vpop.f32.mrb[66].mxu1 }
 0x369   : > { %v2101_v63 = vpop.f32.mrb[67].mxu1 }
 0x36a   : > { %v8537_v32 = vpop.f32.mrb[68].mxu1 }
 0x36b   : > { %v2106_v3 = vpop.f32.mrb[69].mxu1 }
 0x36c   : > { %v8541_v19 = vpop.f32.mrb[70].mxu1 }
 0x36e   : > { %6261 = vmatmul.mubr.bf16.gmra.mrb[88].mxu0 %v8351_v53  ;;  %v2109_v53 = vpop.f32.mrb[71].mxu1 }
 0x36f   : > { %6264 = vmatprep.mubr.msk.bf16.mxu0 %vm7045_vm2, %v9984_v35  ;;  %v8552_v1 = vpop.f32.mrb[72].mxu1 }
 0x370   : > { %v2114_v27 = vpop.f32.mrb[73].mxu1 }
 0x371   : > { %v8561_v39 = vpop.f32.mrb[74].mxu1 }
 0x372   : > { %v2117_v20 = vpop.f32.mrb[75].mxu1 }
 0x373   : > { %v8565_v56 = vpop.f32.mrb[76].mxu1 }
 0x374   : > { %v2122_v18 = vpop.f32.mrb[77].mxu1 }
 0x375   : > { %v8569_v52 = vpop.f32.mrb[78].mxu1  ;;  %v6849_v18 = vld [vmem:[%s9801_s2 + $0xd8] sm:$0xff]  }
 0x376   : > { %6265 = vmatmul.mubr.bf16.gmra.mrb[96].mxu0 %v8440_v9  ;;  %v9881_v9 = vrot.slane %v8301_v44, 1  ;;  %v2125_v10 = vpop.f32.mrb[79].mxu1  ;;  %5802 = vmatprep.subr.bf16.mxu1 %v6849_v18 }
 0x377   : > { %6268 = vmatprep.mubr.msk.bf16.mxu0 %vm7045_vm2, %v9984_v35  ;;  %v8577_v6 = vpop.f32.mrb[80].mxu1 }
 0x378   : > { %v8559_v43 = vsel %vm919_vm0, %v977_v57, %v9881_v9 }
 0x379   : > { %10035 = vst [vmem:[#allocation7_spill] sm:$0xff] %v8559_v43  ;;  %v5341_v11 = vcombine.low %v10036_v0, %v8559_v43 }
 0x37e   : > { %6269 = vmatmul.mubr.bf16.gmra.mrb[100].mxu0 %v10034_v42 }
 0x37f   : > { %6272 = vmatprep.mubr.msk.bf16.mxu0 %vm7045_vm2, %v9984_v35 }
 0x386   : > { %6273 = vmatmul.mubr.bf16.gmra.mrb[104].mxu0 %v5341_v11 }
 0x387   : > { %6276 = vmatprep.mubr.msk.bf16.mxu0 %vm7045_vm2, %v9984_v35  ;;  %v2130_v35 = vpop.f32.mrb[81].mxu1 }
 0x388   : > { %v8579_v21 = vpop.f32.mrb[82].mxu1 }
 0x389   : > { %v2923_v60 = vpop.f32.mrb[116].mxu0  ;;  %v2133_v3 = vpop.f32.mrb[83].mxu1 }
 0x38a   : > { %v2925_v59 = vpop.f32.mrb[117].mxu0  ;;  %v8581_v57 = vpop.f32.mrb[84].mxu1  ;;  %v6850_v60 = vld [vmem:[%s9801_s2 + $0x98] sm:$0xff]  }
 0x38b   : > { %v2926_v2 = vpop.f32.mrb[118].mxu0  ;;  %v2138_v42 = vpop.f32.mrb[85].mxu1  ;;  %5803 = vmatpush3.bf16.msra.mxu1 %v6850_v60 }
 0x38c   : > { %v2928_v25 = vpop.f32.mrb[119].mxu0  ;;  %v8583_v27 = vpop.f32.mrb[86].mxu1  ;;  %v3179_v2 = vlaneseq }
 0x38d   : > { %v2141_v0 = vpop.f32.mrb[87].mxu1 }
 0x38e   : > { %v8592_v15 = vpop.f32.mrb[88].mxu1 }
 0x38f   : > { %v2146_v35 = vpop.f32.mrb[89].mxu1 }
 0x390   : > { %v8596_v3 = vpop.f32.mrb[90].mxu1 }
 0x391   : > { %v2964_v63 = vpop.f32.mrb[120].mxu0 }
 0x392   : > { %v6174_v53 = vpop.f32.mrb[121].mxu0  ;;  %v8594_v63 = vshrl.u32 %v3179_v2, 7 }
 0x393   : > { %v2967_v47 = vpop.f32.mrb[122].mxu0 }
 0x394   : > { %v6175_v51 = vpop.f32.mrb[123].mxu0  ;;  %v2149_v47 = vpop.f32.mrb[91].mxu1  ;;  %vm3183_vm3 = vcmp.ge.s32.totalorder %v8594_v63, 1 }
 0x395   : > { %vm8632_vm6 = vmpackc.low %vm7047_vm5, %vm3183_vm3 }
 0x399   : > { %v2972_v20 = vpop.f32.mrb[4].mxu0 }
 0x39a   : > { %v6178_v11 = vpop.f32.mrb[5].mxu0 }
 0x39b   : > { %v2975_v10 = vpop.f32.mrb[6].mxu0  ;;  %v2176_v20 = vpop.f32.mrb[104].mxu1  ;;  %v8600_v11 = vadd.s32 16, %v8594_v63 }
 0x39c   : > { %v6360_v59 = vadd.f32 %v2975_v10, %v8361_v62  ;;  %v6179_v33 = vpop.f32.mrb[7].mxu0  ;;  %v2178_v18 = vpop.f32.mrb[105].mxu1 }
 0x39d   : > { %v2179_v33 = vpop.f32.mrb[106].mxu1  ;;  %vm3194_vm4 = vcmp.le.s32.totalorder %v8600_v11, 16  ;;  %v6862_v11 = vld [vmem:[%s9801_s2 + $0x108] sm:$0xff]  }
 0x39e   : > { %v3204_v25 = vmul.f32 0.2, %v6360_v59  ;;  %v2181_v35 = vpop.f32.mrb[107].mxu1  ;;  %v6851_v33 = vld [vmem:[%s9801_s2 + $0xe0] sm:$0xff]  }
 0x39f   : > { %5804 = vmatprep.subr.bf16.mxu1 %v6851_v33 }
 0x3a0   : > { %v3258_v0 = vmax.f32 %v6360_v59, %v3204_v25 }
 0x3a1   : > { %v2980_v53 = vpop.f32.mrb[8].mxu0 }
 0x3a2   : > { %v6361_v51 = vadd.f32 %v2980_v53, %v8366_v34  ;;  %v6182_v42 = vpop.f32.mrb[9].mxu0  ;;  %v3312_v34 = vsel %vm3183_vm3, %v3258_v0, 0.0 }
 0x3a3   : > { %v2983_v62 = vpop.f32.mrb[10].mxu0  ;;  %v8604_v4 = vpop.f32.mrb[92].mxu1 }
 0x3a4   : > { %v3205_v60 = vmul.f32 0.2, %v6361_v51  ;;  %v6362_v10 = vadd.f32 %v2983_v62, %v8370_v48  ;;  %v6183_v2 = vpop.f32.mrb[11].mxu0  ;;  %10037 = vst [vmem:[#allocation23_spill] sm:$0xff] %v8604_v4  ;;  %v2403_v59 = vpop.f32.mrb[93].mxu1 }
 0x3a5   : > { %v8611_v20 = vpop.f32.mrb[94].mxu1 }
 0x3a6   : > { %v3259_v9 = vmax.f32 %v6361_v51, %v3205_v60  ;;  %v3206_v47 = vmul.f32 0.2, %v6362_v10  ;;  %10039 = vst [vmem:[#allocation27_spill] sm:$0xff] %v8611_v20  ;;  %v2406_v62 = vpop.f32.mrb[95].mxu1 }
 0x3a8   : > { %v3365_v25 = vpack.c.bf16 %v3259_v9, %v3312_v34  ;;  %v8609_v53 = vpack.c.bf16 %v3259_v9, %v3258_v0  ;;  %v3260_v42 = vmax.f32 %v6362_v10, %v3206_v47  ;;  %v6852_v9 = vld [vmem:[%s9801_s2 + $0xa0] sm:$0xff]  }
 0x3a9   : > { %v2988_v48 = vpop.f32.mrb[12].mxu0  ;;  %5805 = vmatpush3.bf16.msra.mxu1 %v6852_v9 }
 0x3aa   : > { %10038 = vst [vmem:[#allocation24_spill] sm:$0xff] %v8609_v53  ;;  %v3314_v51 = vsel %vm3194_vm4, %v3260_v42, 0.0  ;;  %v6363_v18 = vadd.f32 %v2988_v48, %v8373_v22  ;;  %v6186_v60 = vpop.f32.mrb[13].mxu0  ;;  %v3414_v2 = vshll.u32 %v3365_v25, 16  ;;  %v3412_v59 = vshrl.u32 %v3365_v25, 16 }
 0x3ab   : > { %v3366_v0 = vpack.c.bf16 %v3314_v51, %v3314_v51  ;;  %v2991_v10 = vpop.f32.mrb[14].mxu0  ;;  %v3672_v48 = vrot.slane %v3365_v25, 1  ;;  %v8623_v43 = vpop.f32.mrb[96].mxu1 }
 0x3ac   : > { %v3207_v35 = vmul.f32 0.2, %v6363_v18  ;;  %v6364_v47 = vadd.f32 %v2991_v10, %v8377_v55  ;;  %v6187_v34 = vpop.f32.mrb[15].mxu0  ;;  %v3416_v42 = vrot.slane %v3414_v2, 1  ;;  %v2411_v4 = vpop.f32.mrb[97].mxu1 }
 0x3ad   : > { %v3419_v22 = vshll.u32 %v3366_v0, 16  ;;  %v3673_v62 = vrot.slane %v3366_v0, 1 }
 0x3ae   : > { %v3261_v60 = vmax.f32 %v6363_v18, %v3207_v35  ;;  %v3208_v37 = vmul.f32 0.2, %v6364_v47  ;;  %v3417_v44 = vor.u32 %v3416_v42, %v3412_v59  ;;  %v8636_v18 = vpop.f32.mrb[98].mxu1 }
 0x3af   : > { %v3421_v20 = vrot.slane %v3419_v22, 1  ;;  %v8626_v51 = vsel %vm919_vm0, %v3672_v48, %v3673_v62  ;;  %v2414_v4 = vpop.f32.mrb[99].mxu1 }
 0x3b0   : > { %10040 = vst [vmem:[#allocation42_spill] sm:$0xff] %v8626_v51  ;;  %v3315_v55 = vsel %vm3183_vm3, %v3261_v60, 0.0  ;;  %v3262_v10 = vmax.f32 %v6364_v47, %v3208_v37 }
 0x3b1   : > { %v2996_v2 = vpop.f32.mrb[16].mxu0  ;;  %v8639_v33 = vsel %vm578_vm1, %v3417_v44, %v3421_v20 }
 0x3b2   : > { %10043 = vst [vmem:[#allocation31_spill] sm:$0xff] %v8639_v33  ;;  %v3367_v9 = vpack.c.bf16 %v3262_v10, %v3315_v55  ;;  %v8641_v0 = vpack.c.bf16 %v3262_v10, %v3261_v60  ;;  %v6365_v35 = vadd.f32 %v2996_v2, %v8385_v45  ;;  %v6190_v37 = vpop.f32.mrb[17].mxu0  ;;  %4213 = vmatprep.mubr.bf16.mxu1 %v8639_v33 }
 0x3b3   : > { %v2999_v47 = vpop.f32.mrb[18].mxu0  ;;  %5488 = vmatmul.mubr.msk.bf16.gmra.mrb[116].mxu1 %vm8632_vm6, %v8609_v53  ;;  %v8649_v22 = vpop.f32.mrb[100].mxu1 }
 0x3b4   : > { %v3209_v34 = vmul.f32 0.2, %v6365_v35  ;;  %v6366_v59 = vadd.f32 %v2999_v47, %v8394_v49  ;;  %v6191_v42 = vpop.f32.mrb[19].mxu0  ;;  %v3426_v44 = vshll.u32 %v3367_v9, 16  ;;  %v2419_v62 = vpop.f32.mrb[101].mxu1  ;;  %v3424_v51 = vshrl.u32 %v3367_v9, 16 }
 0x3b5   : > { %v2420_v60 = vpop.f32.mrb[102].mxu1 }
 0x3b6   : > { %v3263_v20 = vmax.f32 %v6365_v35, %v3209_v34  ;;  %v3210_v48 = vmul.f32 0.2, %v6366_v59  ;;  %v3428_v2 = vrot.slane %v3426_v44, 1  ;;  %v2422_v4 = vpop.f32.mrb[103].mxu1  ;;  %v6853_v35 = vld [vmem:[%s9801_s2 + $0xe8] sm:$0xff]  }
 0x3b7   : > { %v6854_v34 = vld [vmem:[%s9801_s2 + $0xa8] sm:$0xff]   ;;  %5806 = vmatprep.subr.bf16.mxu1 %v6853_v35 }
 0x3b8   : > { %v3317_v45 = vsel %vm3194_vm4, %v3263_v20, 0.0  ;;  %v3264_v49 = vmax.f32 %v6366_v59, %v3210_v48  ;;  %v3675_v20 = vrot.slane %v3367_v9, 1  ;;  %5807 = vmatpush3.bf16.msra.mxu1 %v6854_v34 }
 0x3b9   : > { %v3368_v55 = vpack.c.bf16 %v3317_v45, %v3317_v45  ;;  %v3004_v10 = vpop.f32.mrb[20].mxu0 }
 0x3ba   : > { %v6367_v37 = vadd.f32 %v3004_v10, %v8404_v50  ;;  %v6194_v33 = vpop.f32.mrb[21].mxu0  ;;  %v3429_v50 = vor.u32 %v3428_v2, %v3424_v51  ;;  %v3318_v4 = vsel %vm3183_vm3, %v3264_v49, 0.0 }
 0x3bb   : > { %v3007_v47 = vpop.f32.mrb[22].mxu0  ;;  %v3431_v42 = vshll.u32 %v3368_v55, 16  ;;  %v3676_v62 = vrot.slane %v3368_v55, 1 }
 0x3bc   : > { %v3211_v45 = vmul.f32 0.2, %v6367_v37  ;;  %v6368_v44 = vadd.f32 %v3007_v47, %v8413_v26  ;;  %v6195_v60 = vpop.f32.mrb[23].mxu0 }
 0x3bd   : > { %v3433_v33 = vrot.slane %v3431_v42, 1  ;;  %v8662_v59 = vsel %vm919_vm0, %v3675_v20, %v3676_v62 }
 0x3be   : > { %10044 = vst [vmem:[#allocation26_spill] sm:$0xff] %v8662_v59  ;;  %v3265_v48 = vmax.f32 %v6367_v37, %v3211_v45  ;;  %v3212_v10 = vmul.f32 0.2, %v6368_v44 }
 0x3bf   : > { %v8667_v53 = vsel %vm578_vm1, %v3429_v50, %v3433_v33 }
 0x3c0   : > { %10045 = vst [vmem:[#allocation43_spill] sm:$0xff] %v8667_v53  ;;  %v3369_v9 = vpack.c.bf16 %v3265_v48, %v3318_v4  ;;  %v8669_v55 = vpack.c.bf16 %v3265_v48, %v3264_v49  ;;  %v3266_v26 = vmax.f32 %v6368_v44, %v3212_v10  ;;  %4221 = vmatprep.mubr.bf16.mxu1 %v8667_v53 }
 0x3c1   : > { %v3012_v51 = vpop.f32.mrb[24].mxu0  ;;  %5491 = vmatmul.mubr.msk.bf16.gmra.mrb[120].mxu1 %vm8632_vm6, %v8641_v0 }
 0x3c2   : > { %v3320_v2 = vsel %vm3194_vm4, %v3266_v26, 0.0  ;;  %v6369_v37 = vadd.f32 %v3012_v51, %v8429_v14  ;;  %v6198_v47 = vpop.f32.mrb[25].mxu0  ;;  %v3438_v42 = vshll.u32 %v3369_v9, 16  ;;  %v3436_v45 = vshrl.u32 %v3369_v9, 16 }
 0x3c3   : > { %v3370_v35 = vpack.c.bf16 %v3320_v2, %v3320_v2  ;;  %v3015_v34 = vpop.f32.mrb[26].mxu0  ;;  %v3678_v50 = vrot.slane %v3369_v9, 1 }
 0x3c4   : > { %v3213_v20 = vmul.f32 0.2, %v6369_v37  ;;  %v6370_v49 = vadd.f32 %v3015_v34, %v8438_v28  ;;  %v6199_v62 = vpop.f32.mrb[27].mxu0  ;;  %v3440_v44 = vrot.slane %v3438_v42, 1  ;;  %v6856_v34 = vld [vmem:[%s9801_s2 + $0xb0] sm:$0xff]  }
 0x3c5   : > { %v3443_v60 = vshll.u32 %v3370_v35, 16  ;;  %v3679_v33 = vrot.slane %v3370_v35, 1  ;;  %v6855_v35 = vld [vmem:[%s9801_s2 + $0xf0] sm:$0xff]   ;;  %v10111_v25 = vld [vmem:[#allocation26_spill] sm:$0xff] }
 0x3c6   : > { %v3267_v48 = vmax.f32 %v6369_v37, %v3213_v20  ;;  %v3214_v10 = vmul.f32 0.2, %v6370_v49  ;;  %v3441_v4 = vor.u32 %v3440_v44, %v3436_v45  ;;  %5808 = vmatprep.subr.bf16.mxu1 %v6855_v35 }
 0x3c7   : > { %v3445_v53 = vrot.slane %v3443_v60, 1  ;;  %v8680_v26 = vsel %vm919_vm0, %v3678_v50, %v3679_v33  ;;  %5809 = vmatpush3.bf16.msra.mxu1 %v6856_v34 }
 0x3c8   : > { %10046 = vst [vmem:[#allocation30_spill] sm:$0xff] %v8680_v26  ;;  %v3321_v14 = vsel %vm3183_vm3, %v3267_v48, 0.0  ;;  %v3268_v51 = vmax.f32 %v6370_v49, %v3214_v10 }
 0x3c9   : > { %v3020_v2 = vpop.f32.mrb[28].mxu0  ;;  %v8685_v28 = vsel %vm578_vm1, %v3441_v4, %v3445_v53 }
 0x3ca   : > { %v3371_v47 = vpack.c.bf16 %v3268_v51, %v3321_v14  ;;  %v8687_v42 = vpack.c.bf16 %v3268_v51, %v3267_v48  ;;  %v6371_v9 = vadd.f32 %v3020_v2, %v8453_v29  ;;  %v6202_v37 = vpop.f32.mrb[29].mxu0  ;;  %4229 = vmatprep.mubr.bf16.mxu1 %v8685_v28 }
 0x3cb   : > { %v3023_v20 = vpop.f32.mrb[30].mxu0  ;;  %5494 = vmatmul.mubr.msk.bf16.gmra.mrb[124].mxu1 %vm8632_vm6, %v8669_v55 }
 0x3cc   : > { %v3215_v53 = vmul.f32 0.2, %v6371_v9  ;;  %v6372_v49 = vadd.f32 %v3023_v20, %v8460_v54  ;;  %v6203_v29 = vpop.f32.mrb[31].mxu0  ;;  %v3450_v62 = vshll.u32 %v3371_v47, 16  ;;  %v3448_v14 = vshrl.u32 %v3371_v47, 16 }
 0x3cd   : > { %v3681_v54 = vrot.slane %v3371_v47, 1 }
 0x3ce   : > { %v3269_v45 = vmax.f32 %v6371_v9, %v3215_v53  ;;  %v3216_v44 = vmul.f32 0.2, %v6372_v49  ;;  %v3452_v48 = vrot.slane %v3450_v62, 1 }
 0x3d0   : > { %v3323_v60 = vsel %vm3194_vm4, %v3269_v45, 0.0  ;;  %v3270_v51 = vmax.f32 %v6372_v49, %v3216_v44  ;;  %v3453_v53 = vor.u32 %v3452_v48, %v3448_v14 }
 0x3d1   : > { %v3372_v50 = vpack.c.bf16 %v3323_v60, %v3323_v60  ;;  %v3028_v33 = vpop.f32.mrb[32].mxu0 }
 0x3d2   : > { %v6373_v10 = vadd.f32 %v3028_v33, %v8468_v40  ;;  %v6206_v4 = vpop.f32.mrb[33].mxu0  ;;  %v3324_v40 = vsel %vm3183_vm3, %v3270_v51, 0.0 }
 0x3d3   : > { %v3031_v2 = vpop.f32.mrb[34].mxu0  ;;  %v3455_v37 = vshll.u32 %v3372_v50, 16  ;;  %v3682_v20 = vrot.slane %v3372_v50, 1 }
 0x3d4   : > { %v3217_v35 = vmul.f32 0.2, %v6373_v10  ;;  %v6374_v34 = vadd.f32 %v3031_v2, %v8472_v8  ;;  %v6207_v9 = vpop.f32.mrb[35].mxu0 }
 0x3d5   : > { %v3457_v29 = vrot.slane %v3455_v37, 1  ;;  %v8706_v45 = vsel %vm919_vm0, %v3681_v54, %v3682_v20  ;;  %v6857_v9 = vld [vmem:[%s9801_s2 + $0xf8] sm:$0xff]  }
 0x3d6   : > { %10047 = vst [vmem:[#allocation32_spill] sm:$0xff] %v8706_v45  ;;  %v3271_v60 = vmax.f32 %v6373_v10, %v3217_v35  ;;  %v3218_v62 = vmul.f32 0.2, %v6374_v34  ;;  %5810 = vmatprep.subr.bf16.mxu1 %v6857_v9 }
 0x3d7   : > { %v8711_v49 = vsel %vm578_vm1, %v3453_v53, %v3457_v29 }
 0x3d8   : > { %v3373_v44 = vpack.c.bf16 %v3271_v60, %v3324_v40  ;;  %v8713_v47 = vpack.c.bf16 %v3271_v60, %v3270_v51  ;;  %v3272_v50 = vmax.f32 %v6374_v34, %v3218_v62  ;;  %4237 = vmatprep.mubr.bf16.mxu1 %v8711_v49  ;;  %v6858_v40 = vld [vmem:[%s9801_s2 + $0xb8] sm:$0xff]  }
 0x3d9   : > { %v3036_v8 = vpop.f32.mrb[36].mxu0  ;;  %5497 = vmatmul.mubr.msk.bf16.gmra.mrb[128].mxu1 %vm8632_vm6, %v8687_v42 }
 0x3da   : > { %v3326_v33 = vsel %vm3194_vm4, %v3272_v50, 0.0  ;;  %v6375_v48 = vadd.f32 %v3036_v8, %v8475_v30  ;;  %v6210_v10 = vpop.f32.mrb[37].mxu0  ;;  %v3462_v4 = vshll.u32 %v3373_v44, 16  ;;  %v3460_v20 = vshrl.u32 %v3373_v44, 16  ;;  %5811 = vmatpush3.bf16.msra.mxu1 %v6858_v40 }
 0x3db   : > { %v3374_v14 = vpack.c.bf16 %v3326_v33, %v3326_v33  ;;  %v3039_v2 = vpop.f32.mrb[38].mxu0  ;;  %v3684_v53 = vrot.slane %v3373_v44, 1 }
 0x3dc   : > { %v3219_v37 = vmul.f32 0.2, %v6375_v48  ;;  %v6376_v51 = vadd.f32 %v3039_v2, %v8479_v16  ;;  %v6211_v54 = vpop.f32.mrb[39].mxu0  ;;  %v3464_v35 = vrot.slane %v3462_v4, 1 }
 0x3dd   : > { %v3467_v34 = vshll.u32 %v3374_v14, 16  ;;  %v3685_v29 = vrot.slane %v3374_v14, 1 }
 0x3de   : > { %v3273_v60 = vmax.f32 %v6375_v48, %v3219_v37  ;;  %v3220_v62 = vmul.f32 0.2, %v6376_v51  ;;  %v3465_v30 = vor.u32 %v3464_v35, %v3460_v20 }
 0x3df   : > { %v3469_v50 = vrot.slane %v3467_v34, 1  ;;  %v8730_v16 = vsel %vm919_vm0, %v3684_v53, %v3685_v29  ;;  %v6859_v34 = vld [vmem:[%s9801_s2 + $0x140] sm:$0xff]  }
 0x3e0   : > { %10048 = vst [vmem:[#allocation44_spill] sm:$0xff] %v8730_v16  ;;  %v3327_v8 = vsel %vm3183_vm3, %v3273_v60, 0.0  ;;  %v3274_v33 = vmax.f32 %v6376_v51, %v3220_v62  ;;  %5908 = vmatprep.subr.bf16.mxu1 %v6859_v34 }
 0x3e1   : > { %v3044_v10 = vpop.f32.mrb[40].mxu0  ;;  %v8735_v44 = vsel %vm578_vm1, %v3465_v30, %v3469_v50 }
 0x3e2   : > { %v3375_v48 = vpack.c.bf16 %v3274_v33, %v3327_v8  ;;  %v8737_v4 = vpack.c.bf16 %v3274_v33, %v3273_v60  ;;  %v6377_v14 = vadd.f32 %v3044_v10, %v8482_v61  ;;  %v6214_v2 = vpop.f32.mrb[41].mxu0  ;;  %4245 = vmatprep.mubr.bf16.mxu1 %v8735_v44 }
 0x3e3   : > { %v3047_v37 = vpop.f32.mrb[42].mxu0  ;;  %5500 = vmatmul.mubr.msk.bf16.gmra.mrb[132].mxu1 %vm8632_vm6, %v8713_v47 }
 0x3e4   : > { %v3221_v54 = vmul.f32 0.2, %v6377_v14  ;;  %v6378_v51 = vadd.f32 %v3047_v37, %v8486_v58  ;;  %v6215_v20 = vpop.f32.mrb[43].mxu0  ;;  %v3474_v35 = vshll.u32 %v3375_v48, 16  ;;  %v3472_v50 = vshrl.u32 %v3375_v48, 16 }
 0x3e5   : > { %v3687_v10 = vrot.slane %v3375_v48, 1 }
 0x3e6   : > { %v3275_v9 = vmax.f32 %v6377_v14, %v3221_v54  ;;  %v3222_v53 = vmul.f32 0.2, %v6378_v51  ;;  %v3476_v62 = vrot.slane %v3474_v35, 1 }
 0x3e8   : > { %v3329_v61 = vsel %vm3194_vm4, %v3275_v9, 0.0  ;;  %v3276_v58 = vmax.f32 %v6378_v51, %v3222_v53  ;;  %v3477_v20 = vor.u32 %v3476_v62, %v3472_v50 }
 0x3e9   : > { %v3376_v29 = vpack.c.bf16 %v3329_v61, %v3329_v61  ;;  %v3052_v60 = vpop.f32.mrb[44].mxu0 }
 0x3ea   : > { %v6379_v30 = vadd.f32 %v3052_v60, %v8489_v24  ;;  %v6218_v40 = vpop.f32.mrb[45].mxu0  ;;  %v3330_v24 = vsel %vm3183_vm3, %v3276_v58, 0.0 }
 0x3eb   : > { %v3055_v8 = vpop.f32.mrb[46].mxu0  ;;  %v3479_v33 = vshll.u32 %v3376_v29, 16  ;;  %v3688_v2 = vrot.slane %v3376_v29, 1 }
 0x3ec   : > { %v3223_v37 = vmul.f32 0.2, %v6379_v30  ;;  %v6380_v14 = vadd.f32 %v3055_v8, %v8493_v38  ;;  %v6219_v54 = vpop.f32.mrb[47].mxu0 }
 0x3ed   : > { %v3481_v34 = vrot.slane %v3479_v33, 1  ;;  %v8753_v9 = vsel %vm919_vm0, %v3687_v10, %v3688_v2 }
 0x3ee   : > { %10049 = vst [vmem:[#allocation47_spill] sm:$0xff] %v8753_v9  ;;  %v3277_v61 = vmax.f32 %v6379_v30, %v3223_v37  ;;  %v3224_v35 = vmul.f32 0.2, %v6380_v14 }
 0x3ef   : > { %v8758_v51 = vsel %vm578_vm1, %v3477_v20, %v3481_v34 }
 0x3f0   : > { %10050 = vst [vmem:[#allocation33_spill] sm:$0xff] %v8758_v51  ;;  %v3377_v53 = vpack.c.bf16 %v3277_v61, %v3330_v24  ;;  %v8760_v48 = vpack.c.bf16 %v3277_v61, %v3276_v58  ;;  %v3278_v29 = vmax.f32 %v6380_v14, %v3224_v35  ;;  %4253 = vmatprep.mubr.bf16.mxu1 %v8758_v51  ;;  %v2425_v24 = vpop.f32.mrb[108].mxu1 }
 0x3f1   : > { %v3060_v38 = vpop.f32.mrb[48].mxu0  ;;  %5503 = vmatmul.mubr.msk.bf16.gmra.mrb[136].mxu1 %vm8632_vm6, %v8737_v4  ;;  %v2427_v51 = vpop.f32.mrb[109].mxu1 }
 0x3f2   : > { %v3332_v60 = vsel %vm3194_vm4, %v3278_v29, 0.0  ;;  %v6381_v62 = vadd.f32 %v3060_v38, %v8496_v7  ;;  %v6222_v30 = vpop.f32.mrb[49].mxu0  ;;  %v3486_v40 = vshll.u32 %v3377_v53, 16  ;;  %v3484_v2 = vshrl.u32 %v3377_v53, 16 }
 0x3f3   : > { %v3378_v50 = vpack.c.bf16 %v3332_v60, %v3332_v60  ;;  %v3063_v8 = vpop.f32.mrb[50].mxu0  ;;  %v3690_v54 = vrot.slane %v3377_v53, 1 }
 0x3f4   : > { %v3225_v33 = vmul.f32 0.2, %v6381_v62  ;;  %v6382_v58 = vadd.f32 %v3063_v8, %v8500_v5  ;;  %v6223_v10 = vpop.f32.mrb[51].mxu0  ;;  %v3488_v37 = vrot.slane %v3486_v40, 1  ;;  %v2428_v5 = vpop.f32.mrb[110].mxu1 }
 0x3f5   : > { %v3491_v14 = vshll.u32 %v3378_v50, 16  ;;  %v3691_v20 = vrot.slane %v3378_v50, 1  ;;  %v2430_v53 = vpop.f32.mrb[111].mxu1 }
 0x3f6   : > { %v3279_v34 = vmax.f32 %v6381_v62, %v3225_v33  ;;  %v3226_v61 = vmul.f32 0.2, %v6382_v58  ;;  %v3489_v35 = vor.u32 %v3488_v37, %v3484_v2 }
 0x3f7   : > { %v3493_v29 = vrot.slane %v3491_v14, 1  ;;  %v8771_v7 = vsel %vm919_vm0, %v3690_v54, %v3691_v20  ;;  %v5700_v54 = vpop.f32.mrb[112].mxu1 }
 0x3f8   : > { %10051 = vst [vmem:[#allocation38_spill] sm:$0xff] %v8771_v7  ;;  %v3333_v38 = vsel %vm3183_vm3, %v3279_v34, 0.0  ;;  %v3280_v60 = vmax.f32 %v6382_v58, %v3226_v61 }
 0x3f9   : > { %v3068_v30 = vpop.f32.mrb[52].mxu0  ;;  %v8776_v40 = vsel %vm578_vm1, %v3489_v35, %v3493_v29 }
 0x3fa   : > { %10052 = vst [vmem:[#allocation45_spill] sm:$0xff] %v8776_v40  ;;  %v3379_v50 = vpack.c.bf16 %v3280_v60, %v3333_v38  ;;  %v8778_v62 = vpack.c.bf16 %v3280_v60, %v3279_v34  ;;  %v6383_v8 = vadd.f32 %v3068_v30, %v8503_v36  ;;  %v6226_v33 = vpop.f32.mrb[53].mxu0  ;;  %4261 = vmatprep.mubr.bf16.mxu1 %v8776_v40  ;;  %v5701_v34 = vpop.f32.mrb[113].mxu1 }
 0x3fb   : > { %v3071_v51 = vpop.f32.mrb[54].mxu0  ;;  %5506 = vmatmul.mubr.msk.bf16.gmra.mrb[140].mxu1 %vm8632_vm6, %v8760_v48  ;;  %v8788_v61 = vadd.f32 %v5701_v34, %v5700_v54  ;;  %v5703_v33 = vpop.f32.mrb[114].mxu1 }
 0x3fc   : > { %10053 = vst [vmem:[#allocation48_spill] sm:$0xff] %v8778_v62  ;;  %v3227_v58 = vmul.f32 0.2, %v6383_v8  ;;  %v6384_v10 = vadd.f32 %v3071_v51, %v8507_v13  ;;  %v6227_v2 = vpop.f32.mrb[55].mxu0  ;;  %v3498_v37 = vshll.u32 %v3379_v50, 16  ;;  %v3496_v5 = vshrl.u32 %v3379_v50, 16 }
 0x3fe   : > { %v3281_v14 = vmax.f32 %v6383_v8, %v3227_v58  ;;  %v3228_v20 = vmul.f32 0.2, %v6384_v10  ;;  %v3500_v29 = vrot.slane %v3498_v37, 1  ;;  %v3693_v8 = vrot.slane %v3379_v50, 1 }
 0x400   : > { %v3335_v36 = vsel %vm3194_vm4, %v3281_v14, 0.0  ;;  %v3282_v30 = vmax.f32 %v6384_v10, %v3228_v20  ;;  %v5704_v14 = vpop.f32.mrb[115].mxu1  ;;  %v3501_v54 = vor.u32 %v3500_v29, %v3496_v5 }
 0x401   : > { %v3380_v35 = vpack.c.bf16 %v3335_v36, %v3335_v36  ;;  %v3076_v24 = vpop.f32.mrb[56].mxu0  ;;  %v8792_v36 = vadd.f32 %v5704_v14, %v5703_v33 }
 0x402   : > { %v6385_v38 = vadd.f32 %v3076_v24, %v8510_v41  ;;  %v6230_v60 = vpop.f32.mrb[57].mxu0  ;;  %v3336_v10 = vsel %vm3183_vm3, %v3282_v30, 0.0 }
 0x403   : > { %v3079_v13 = vpop.f32.mrb[58].mxu0  ;;  %v3503_v53 = vshll.u32 %v3380_v35, 16  ;;  %v3694_v51 = vrot.slane %v3380_v35, 1  ;;  %10054 = vst [vmem:[#allocation50_spill] sm:$0xff] %v8792_v36 }
 0x404   : > { %v3229_v58 = vmul.f32 0.2, %v6385_v38  ;;  %v6386_v2 = vadd.f32 %v3079_v13, %v8514_v17  ;;  %v6231_v40 = vpop.f32.mrb[59].mxu0 }
 0x405   : > { %v3505_v34 = vrot.slane %v3503_v53, 1  ;;  %v8795_v37 = vsel %vm919_vm0, %v3693_v8, %v3694_v51 }
 0x406   : > { %10055 = vst [vmem:[#allocation8_spill] sm:$0xff] %v8795_v37  ;;  %v3283_v41 = vmax.f32 %v6385_v38, %v3229_v58  ;;  %v3230_v24 = vmul.f32 0.2, %v6386_v2 }
 0x407   : > { %v8800_v50 = vsel %vm578_vm1, %v3501_v54, %v3505_v34 }
 0x408   : > { %v3381_v20 = vpack.c.bf16 %v3283_v41, %v3336_v10  ;;  %v8802_v35 = vpack.c.bf16 %v3283_v41, %v3282_v30  ;;  %v3284_v17 = vmax.f32 %v6386_v2, %v3230_v24  ;;  %4269 = vmatprep.mubr.bf16.mxu1 %v8800_v50 }
 0x409   : > { %v3084_v40 = vpop.f32.mrb[60].mxu0  ;;  %5509 = vmatmul.mubr.msk.bf16.gmra.mrb[144].mxu1 %vm8632_vm6, %v8778_v62 }
 0x40a   : > { %10056 = vst [vmem:[#allocation9_spill] sm:$0xff] %v8802_v35  ;;  %v3338_v29 = vsel %vm3194_vm4, %v3284_v17, 0.0  ;;  %v6387_v38 = vadd.f32 %v3084_v40, %v8517_v23  ;;  %v6234_v60 = vpop.f32.mrb[61].mxu0  ;;  %v3510_v5 = vshll.u32 %v3381_v20, 16  ;;  %v3508_v51 = vshrl.u32 %v3381_v20, 16 }
 0x40b   : > { %v3382_v13 = vpack.c.bf16 %v3338_v29, %v3338_v29  ;;  %v3087_v53 = vpop.f32.mrb[62].mxu0  ;;  %v3696_v14 = vrot.slane %v3381_v20, 1 }
 0x40c   : > { %v3231_v33 = vmul.f32 0.2, %v6387_v38  ;;  %v6388_v30 = vadd.f32 %v3087_v53, %v8521_v46  ;;  %v6235_v8 = vpop.f32.mrb[63].mxu0  ;;  %v3512_v58 = vrot.slane %v3510_v5, 1 }
 0x40d   : > { %v3515_v2 = vshll.u32 %v3382_v13, 16  ;;  %v3697_v54 = vrot.slane %v3382_v13, 1 }
 0x40e   : > { %v3285_v34 = vmax.f32 %v6387_v38, %v3231_v33  ;;  %v3232_v41 = vmul.f32 0.2, %v6388_v30  ;;  %v3513_v24 = vor.u32 %v3512_v58, %v3508_v51 }
 0x40f   : > { %v3517_v10 = vrot.slane %v3515_v2, 1  ;;  %v8813_v17 = vsel %vm919_vm0, %v3696_v14, %v3697_v54 }
 0x410   : > { %10057 = vst [vmem:[#allocation36_spill] sm:$0xff] %v8813_v17  ;;  %v3339_v23 = vsel %vm3183_vm3, %v3285_v34, 0.0  ;;  %v3286_v40 = vmax.f32 %v6388_v30, %v3232_v41 }
 0x411   : > { %v3092_v29 = vpop.f32.mrb[64].mxu0  ;;  %v8818_v46 = vsel %vm578_vm1, %v3513_v24, %v3517_v10 }
 0x412   : > { %v3383_v60 = vpack.c.bf16 %v3286_v40, %v3339_v23  ;;  %v8820_v5 = vpack.c.bf16 %v3286_v40, %v3285_v34  ;;  %v6389_v20 = vadd.f32 %v3092_v29, %v8530_v12  ;;  %v6238_v38 = vpop.f32.mrb[65].mxu0  ;;  %4277 = vmatprep.mubr.bf16.mxu1 %v8818_v46 }
 0x413   : > { %v3095_v13 = vpop.f32.mrb[66].mxu0  ;;  %5512 = vmatmul.mubr.msk.bf16.gmra.mrb[148].mxu1 %vm8632_vm6, %v8802_v35 }
 0x414   : > { %10058 = vst [vmem:[#allocation35_spill] sm:$0xff] %v8820_v5  ;;  %v3233_v53 = vmul.f32 0.2, %v6389_v20  ;;  %v6390_v33 = vadd.f32 %v3095_v13, %v8534_v31  ;;  %v6239_v30 = vpop.f32.mrb[67].mxu0  ;;  %v3522_v8 = vshll.u32 %v3383_v60, 16  ;;  %v3520_v24 = vshrl.u32 %v3383_v60, 16 }
 0x415   : > { %v3699_v29 = vrot.slane %v3383_v60, 1 }
 0x416   : > { %v3287_v51 = vmax.f32 %v6389_v20, %v3233_v53  ;;  %v3234_v58 = vmul.f32 0.2, %v6390_v33  ;;  %v3524_v54 = vrot.slane %v3522_v8, 1 }
 0x418   : > { %v3341_v2 = vsel %vm3194_vm4, %v3287_v51, 0.0  ;;  %v3288_v10 = vmax.f32 %v6390_v33, %v3234_v58  ;;  %v3525_v53 = vor.u32 %v3524_v54, %v3520_v24 }
 0x419   : > { %v3384_v14 = vpack.c.bf16 %v3341_v2, %v3341_v2  ;;  %v3100_v12 = vpop.f32.mrb[68].mxu0 }
 0x41a   : > { %v6391_v34 = vadd.f32 %v3100_v12, %v8537_v32  ;;  %v6242_v41 = vpop.f32.mrb[69].mxu0  ;;  %v3342_v32 = vsel %vm3183_vm3, %v3288_v10, 0.0 }
 0x41b   : > { %v3103_v23 = vpop.f32.mrb[70].mxu0  ;;  %v3527_v40 = vshll.u32 %v3384_v14, 16  ;;  %v3700_v38 = vrot.slane %v3384_v14, 1 }
 0x41c   : > { %v3235_v31 = vmul.f32 0.2, %v6391_v34  ;;  %v6392_v13 = vadd.f32 %v3103_v23, %v8541_v19  ;;  %v6243_v20 = vpop.f32.mrb[71].mxu0 }
 0x41d   : > { %v3529_v30 = vrot.slane %v3527_v40, 1  ;;  %v8833_v51 = vsel %vm919_vm0, %v3699_v29, %v3700_v38 }
 0x41e   : > { %10059 = vst [vmem:[#allocation10_spill] sm:$0xff] %v8833_v51  ;;  %v3289_v2 = vmax.f32 %v6391_v34, %v3235_v31  ;;  %v3236_v8 = vmul.f32 0.2, %v6392_v13 }
 0x41f   : > { %v8838_v33 = vsel %vm578_vm1, %v3525_v53, %v3529_v30 }
 0x420   : > { %v3385_v58 = vpack.c.bf16 %v3289_v2, %v3342_v32  ;;  %v8840_v60 = vpack.c.bf16 %v3289_v2, %v3288_v10  ;;  %v3290_v14 = vmax.f32 %v6392_v13, %v3236_v8  ;;  %4285 = vmatprep.mubr.bf16.mxu1 %v8838_v33 }
 0x421   : > { %v3108_v19 = vpop.f32.mrb[72].mxu0  ;;  %5515 = vmatmul.mubr.msk.bf16.gmra.mrb[152].mxu1 %vm8632_vm6, %v8820_v5 }
 0x422   : > { %10060 = vst [vmem:[#allocation39_spill] sm:$0xff] %v8840_v60  ;;  %v3344_v12 = vsel %vm3194_vm4, %v3290_v14, 0.0  ;;  %v6393_v54 = vadd.f32 %v3108_v19, %v8552_v1  ;;  %v6246_v34 = vpop.f32.mrb[73].mxu0  ;;  %v3534_v41 = vshll.u32 %v3385_v58, 16  ;;  %v3532_v38 = vshrl.u32 %v3385_v58, 16 }
 0x423   : > { %v3386_v24 = vpack.c.bf16 %v3344_v12, %v3344_v12  ;;  %v3111_v23 = vpop.f32.mrb[74].mxu0  ;;  %v3702_v20 = vrot.slane %v3385_v58, 1 }
 0x424   : > { %v3237_v40 = vmul.f32 0.2, %v6393_v54  ;;  %v6394_v10 = vadd.f32 %v3111_v23, %v8561_v39  ;;  %v6247_v29 = vpop.f32.mrb[75].mxu0  ;;  %v3536_v31 = vrot.slane %v3534_v41, 1 }
 0x425   : > { %v3539_v13 = vshll.u32 %v3386_v24, 16  ;;  %v3703_v53 = vrot.slane %v3386_v24, 1 }
 0x426   : > { %v3291_v30 = vmax.f32 %v6393_v54, %v3237_v40  ;;  %v3238_v2 = vmul.f32 0.2, %v6394_v10  ;;  %v3537_v8 = vor.u32 %v3536_v31, %v3532_v38 }
 0x427   : > { %v3541_v32 = vrot.slane %v3539_v13, 1  ;;  %v8851_v14 = vsel %vm919_vm0, %v3702_v20, %v3703_v53 }
 0x428   : > { %10061 = vst [vmem:[#allocation11_spill] sm:$0xff] %v8851_v14  ;;  %v3345_v1 = vsel %vm3183_vm3, %v3291_v30, 0.0  ;;  %v3292_v19 = vmax.f32 %v6394_v10, %v3238_v2 }
 0x429   : > { %v3116_v12 = vpop.f32.mrb[76].mxu0  ;;  %v8856_v39 = vsel %vm578_vm1, %v3537_v8, %v3541_v32 }
 0x42a   : > { %v3387_v34 = vpack.c.bf16 %v3292_v19, %v3345_v1  ;;  %v8858_v41 = vpack.c.bf16 %v3292_v19, %v3291_v30  ;;  %v6395_v58 = vadd.f32 %v3116_v12, %v8565_v56  ;;  %v6250_v54 = vpop.f32.mrb[77].mxu0  ;;  %4293 = vmatprep.mubr.bf16.mxu1 %v8856_v39 }
 0x42b   : > { %v3119_v24 = vpop.f32.mrb[78].mxu0  ;;  %5518 = vmatmul.mubr.msk.bf16.gmra.mrb[156].mxu1 %vm8632_vm6, %v8840_v60 }
 0x42c   : > { %10062 = vst [vmem:[#allocation41_spill] sm:$0xff] %v8858_v41  ;;  %v3239_v23 = vmul.f32 0.2, %v6395_v58  ;;  %v6396_v40 = vadd.f32 %v3119_v24, %v8569_v52  ;;  %v6251_v10 = vpop.f32.mrb[79].mxu0  ;;  %v3546_v29 = vshll.u32 %v3387_v34, 16  ;;  %v3544_v8 = vshrl.u32 %v3387_v34, 16 }
 0x42d   : > { %v3705_v12 = vrot.slane %v3387_v34, 1 }
 0x42e   : > { %v3293_v38 = vmax.f32 %v6395_v58, %v3239_v23  ;;  %v3240_v31 = vmul.f32 0.2, %v6396_v40  ;;  %v3548_v53 = vrot.slane %v3546_v29, 1 }
 0x430   : > { %v3347_v13 = vsel %vm3194_vm4, %v3293_v38, 0.0  ;;  %v3294_v32 = vmax.f32 %v6396_v40, %v3240_v31  ;;  %v3549_v23 = vor.u32 %v3548_v53, %v3544_v8 }
 0x431   : > { %v3388_v20 = vpack.c.bf16 %v3347_v13, %v3347_v13  ;;  %v3124_v56 = vpop.f32.mrb[80].mxu0 }
 0x432   : > { %v6397_v30 = vadd.f32 %v3124_v56, %v8577_v6  ;;  %v6254_v2 = vpop.f32.mrb[81].mxu0  ;;  %v3348_v6 = vsel %vm3183_vm3, %v3294_v32, 0.0 }
 0x433   : > { %v3127_v1 = vpop.f32.mrb[82].mxu0  ;;  %v3551_v19 = vshll.u32 %v3388_v20, 16  ;;  %v3706_v54 = vrot.slane %v3388_v20, 1 }
 0x434   : > { %v3241_v52 = vmul.f32 0.2, %v6397_v30  ;;  %v6398_v24 = vadd.f32 %v3127_v1, %v8579_v21  ;;  %v6255_v58 = vpop.f32.mrb[83].mxu0 }
 0x435   : > { %v3553_v10 = vrot.slane %v3551_v19, 1  ;;  %v8871_v38 = vsel %vm919_vm0, %v3705_v12, %v3706_v54 }
 0x436   : > { %10063 = vst [vmem:[#allocation12_spill] sm:$0xff] %v8871_v38  ;;  %v3295_v13 = vmax.f32 %v6397_v30, %v3241_v52  ;;  %v3242_v29 = vmul.f32 0.2, %v6398_v24 }
 0x437   : > { %v8876_v40 = vsel %vm578_vm1, %v3549_v23, %v3553_v10 }
 0x438   : > { %v3389_v31 = vpack.c.bf16 %v3295_v13, %v3348_v6  ;;  %v8878_v34 = vpack.c.bf16 %v3295_v13, %v3294_v32  ;;  %v3296_v20 = vmax.f32 %v6398_v24, %v3242_v29  ;;  %4301 = vmatprep.mubr.bf16.mxu1 %v8876_v40 }
 0x439   : > { %v3132_v21 = vpop.f32.mrb[84].mxu0  ;;  %5521 = vmatmul.mubr.msk.bf16.gmra.mrb[160].mxu1 %vm8632_vm6, %v8858_v41 }
 0x43a   : > { %10064 = vst [vmem:[#allocation46_spill] sm:$0xff] %v8878_v34  ;;  %v3350_v56 = vsel %vm3194_vm4, %v3296_v20, 0.0  ;;  %v6399_v53 = vadd.f32 %v3132_v21, %v8581_v57  ;;  %v6258_v30 = vpop.f32.mrb[85].mxu0  ;;  %v3558_v2 = vshll.u32 %v3389_v31, 16  ;;  %v3556_v54 = vshrl.u32 %v3389_v31, 16 }
 0x43b   : > { %v3390_v8 = vpack.c.bf16 %v3350_v56, %v3350_v56  ;;  %v3135_v1 = vpop.f32.mrb[86].mxu0  ;;  %v3708_v58 = vrot.slane %v3389_v31, 1 }
 0x43c   : > { %v3243_v19 = vmul.f32 0.2, %v6399_v53  ;;  %v6400_v32 = vadd.f32 %v3135_v1, %v8583_v27  ;;  %v6259_v12 = vpop.f32.mrb[87].mxu0  ;;  %v3560_v52 = vrot.slane %v3558_v2, 1 }
 0x43d   : > { %v3563_v24 = vshll.u32 %v3390_v8, 16  ;;  %v3709_v23 = vrot.slane %v3390_v8, 1 }
 0x43e   : > { %v3297_v10 = vmax.f32 %v6399_v53, %v3243_v19  ;;  %v3244_v13 = vmul.f32 0.2, %v6400_v32  ;;  %v3561_v29 = vor.u32 %v3560_v52, %v3556_v54 }
 0x43f   : > { %v3565_v6 = vrot.slane %v3563_v24, 1  ;;  %v8889_v20 = vsel %vm919_vm0, %v3708_v58, %v3709_v23 }
 0x440   : > { %v3351_v57 = vsel %vm3183_vm3, %v3297_v10, 0.0  ;;  %v3298_v21 = vmax.f32 %v6400_v32, %v3244_v13 }
 0x441   : > { %v3140_v56 = vpop.f32.mrb[88].mxu0  ;;  %v8894_v27 = vsel %vm578_vm1, %v3561_v29, %v3565_v6 }
 0x442   : > { %10065 = vst [vmem:[#allocation49_spill] sm:$0xff] %v8894_v27  ;;  %v3391_v30 = vpack.c.bf16 %v3298_v21, %v3351_v57  ;;  %v8896_v2 = vpack.c.bf16 %v3298_v21, %v3297_v10  ;;  %v6401_v31 = vadd.f32 %v3140_v56, %v8592_v15  ;;  %v6262_v53 = vpop.f32.mrb[89].mxu0  ;;  %4309 = vmatprep.mubr.bf16.mxu1 %v8894_v27  ;;  %v10067_v10 = vld [vmem:[#allocation23_spill] sm:$0xff] }
 0x443   : > { %v3143_v8 = vpop.f32.mrb[90].mxu0  ;;  %5524 = vmatmul.mubr.msk.bf16.gmra.mrb[164].mxu1 %vm8632_vm6, %v8878_v34 }
 0x444   : > { %10066 = vst [vmem:[#allocation51_spill] sm:$0xff] %v8896_v2  ;;  %v3245_v1 = vmul.f32 0.2, %v6401_v31  ;;  %v6402_v19 = vadd.f32 %v3143_v8, %v8596_v3  ;;  %v6263_v32 = vpop.f32.mrb[91].mxu0  ;;  %v3570_v12 = vshll.u32 %v3391_v30, 16  ;;  %v3568_v6 = vshrl.u32 %v3391_v30, 16 }
 0x445   : > { %v3711_v53 = vrot.slane %v3391_v30, 1  ;;  %v10068_v8 = vld [vmem:[#allocation27_spill] sm:$0xff] }
 0x446   : > { %v3299_v54 = vmax.f32 %v6401_v31, %v3245_v1  ;;  %v3246_v52 = vmul.f32 0.2, %v6402_v19  ;;  %v3572_v23 = vrot.slane %v3570_v12, 1 }
 0x448   : > { %v3353_v24 = vsel %vm3194_vm4, %v3299_v54, 0.0  ;;  %v3300_v57 = vmax.f32 %v6402_v19, %v3246_v52  ;;  %v3573_v1 = vor.u32 %v3572_v23, %v3568_v6 }
 0x449   : > { %v3392_v58 = vpack.c.bf16 %v3353_v24, %v3353_v24  ;;  %v3148_v15 = vpop.f32.mrb[96].mxu0 }
 0x44a   : > { %v6403_v13 = vadd.f32 %v3148_v15, %v10067_v10  ;;  %v6266_v29 = vpop.f32.mrb[97].mxu0  ;;  %v3354_v15 = vsel %vm3183_vm3, %v3300_v57, 0.0 }
 0x44b   : > { %v3151_v21 = vpop.f32.mrb[98].mxu0  ;;  %v3575_v56 = vshll.u32 %v3392_v58, 16  ;;  %v3712_v27 = vrot.slane %v3392_v58, 1 }
 0x44c   : > { %v3247_v3 = vmul.f32 0.2, %v6403_v13  ;;  %v6404_v32 = vadd.f32 %v3151_v21, %v10068_v8  ;;  %v6267_v31 = vpop.f32.mrb[99].mxu0 }
 0x44d   : > { %v3577_v36 = vrot.slane %v3575_v56, 1  ;;  %v8909_v54 = vsel %vm919_vm0, %v3711_v53, %v3712_v27 }
 0x44e   : > { %v3301_v24 = vmax.f32 %v6403_v13, %v3247_v3  ;;  %v3248_v12 = vmul.f32 0.2, %v6404_v32 }
 0x44f   : > { %v8914_v19 = vsel %vm578_vm1, %v3573_v1, %v3577_v36 }
 0x450   : > { %v3393_v52 = vpack.c.bf16 %v3301_v24, %v3354_v15  ;;  %v8916_v30 = vpack.c.bf16 %v3301_v24, %v3300_v57  ;;  %v3302_v58 = vmax.f32 %v6404_v32, %v3248_v12  ;;  %4317 = vmatprep.mubr.bf16.mxu1 %v8914_v19 }
 0x451   : > { %v3156_v10 = vpop.f32.mrb[100].mxu0  ;;  %5527 = vmatmul.mubr.msk.bf16.gmra.mrb[168].mxu1 %vm8632_vm6, %v8896_v2 }
 0x452   : > { %10069 = vst [vmem:[#allocation40_spill] sm:$0xff] %v8916_v30  ;;  %v3356_v27 = vsel %vm3194_vm4, %v3302_v58, 0.0  ;;  %v6405_v23 = vadd.f32 %v3156_v10, %v8623_v43  ;;  %v6270_v13 = vpop.f32.mrb[101].mxu0  ;;  %v3582_v29 = vshll.u32 %v3393_v52, 16  ;;  %v3580_v53 = vshrl.u32 %v3393_v52, 16 }
 0x453   : > { %v3394_v36 = vpack.c.bf16 %v3356_v27, %v3356_v27  ;;  %v3159_v6 = vpop.f32.mrb[102].mxu0  ;;  %v3714_v32 = vrot.slane %v3393_v52, 1 }
 0x454   : > { %v3249_v21 = vmul.f32 0.2, %v6405_v23  ;;  %v6406_v57 = vadd.f32 %v3159_v6, %v8636_v18  ;;  %v6271_v56 = vpop.f32.mrb[103].mxu0  ;;  %v3584_v3 = vrot.slane %v3582_v29, 1 }
 0x455   : > { %v3587_v8 = vshll.u32 %v3394_v36, 16  ;;  %v3715_v31 = vrot.slane %v3394_v36, 1 }
 0x456   : > { %v3303_v1 = vmax.f32 %v6405_v23, %v3249_v21  ;;  %v3250_v24 = vmul.f32 0.2, %v6406_v57  ;;  %v3585_v12 = vor.u32 %v3584_v3, %v3580_v53  ;;  %v10071_v21 = vld [vmem:[#allocation24_spill] sm:$0xff]  ;;  %v10072_v53 = vmov 0.0|0.0  }
 0x457   : > { %v3589_v15 = vrot.slane %v3587_v8, 1  ;;  %v8927_v58 = vsel %vm919_vm0, %v3714_v32, %v3715_v31  ;;  %v8945_v3 = vrot.slane %v10072_v53, 1  ;;  %v6860_v8 = vld [vmem:[%s9801_s2 + $0x100] sm:$0xff]  }
 0x458   : > { %v3357_v43 = vsel %vm3183_vm3, %v3303_v1, 0.0  ;;  %v3304_v10 = vmax.f32 %v6406_v57, %v3250_v24 }
 0x459   : > { %v3164_v27 = vpop.f32.mrb[104].mxu0  ;;  %v8932_v18 = vsel %vm578_vm1, %v3585_v12, %v3589_v15  ;;  %10073 = vst [vmem:[#allocation14_spill] sm:$0xff] %v8945_v3 }
 0x45a   : > { %v3395_v13 = vpack.c.bf16 %v3304_v10, %v3357_v43  ;;  %v8934_v29 = vpack.c.bf16 %v3304_v10, %v3303_v1  ;;  %v6407_v52 = vadd.f32 %v3164_v27, %v8649_v22  ;;  %v6274_v23 = vpop.f32.mrb[105].mxu0  ;;  %4325 = vmatprep.mubr.bf16.mxu1 %v8932_v18  ;;  %v6861_v1 = vld [vmem:[%s9801_s2 + $0x148] sm:$0xff]  }
 0x45b   : > { %v3167_v36 = vpop.f32.mrb[106].mxu0  ;;  %5530 = vmatmul.mubr.msk.bf16.gmra.mrb[172].mxu1 %vm8632_vm6, %v8916_v30 }
 0x45c   : > { %10070 = vst [vmem:[#allocation13_spill] sm:$0xff] %v8934_v29  ;;  %v3251_v63 = vmul.f32 0.2, %v6407_v52  ;;  %v6275_v6 = vpop.f32.mrb[107].mxu0  ;;  %5533 = vmatprep.mubr.msk.bf16.mxu1 %vm8632_vm6, %v10071_v21  ;;  %v3594_v57 = vshll.u32 %v3395_v13, 16  ;;  %v3592_v24 = vshrl.u32 %v3395_v13, 16 }
 0x45d   : > { %v3717_v15 = vrot.slane %v3395_v13, 1  ;;  %v6864_v36 = vld [vmem:[%s9801_s2 + $0x110] sm:$0xff]   ;;  %v10074_v6 = vld [vmem:[#allocation42_spill] sm:$0xff]  ;;  %v6866_v21 = vld [vmem:[%s9801_s2 + $0x118] sm:$0xff]  }
 0x45e   : > { %v3305_v56 = vmax.f32 %v6407_v52, %v3251_v63  ;;  %v3596_v32 = vrot.slane %v3594_v57, 1  ;;  %v6863_v52 = vld [vmem:[%s9801_s2 + $0x150] sm:$0xff]   ;;  %v6865_v63 = vld [vmem:[%s9801_s2 + $0x158] sm:$0xff]   ;;  %v6867_v57 = vld [vmem:[%s9801_s2 + $0x160] sm:$0xff]  }
 0x460   : > { %v3359_v22 = vsel %vm3194_vm4, %v3305_v56, 0.0  ;;  %v3597_v10 = vor.u32 %v3596_v32, %v3592_v24  ;;  %v6868_v56 = vld [vmem:[%s9801_s2 + $0x120] sm:$0xff]   ;;  %v6871_v32 = vld [vmem:[%s9801_s2 + $0x170] sm:$0xff]   ;;  %v6874_v24 = vld [vmem:[%s9801_s2 + $0x138] sm:$0xff]  }
 0x461   : > { %v3396_v31 = vpack.c.bf16 %v3359_v22, %v3359_v22  ;;  %v6869_v22 = vld [vmem:[%s9801_s2 + $0x168] sm:$0xff]  }
 0x463   : > { %v3599_v12 = vshll.u32 %v3396_v31, 16  ;;  %4367 = vmatmul.mubr.bf16.vlgmr.msra.gmra.mrb[176].mxu1 %v8945_v3  ;;  %v3718_v43 = vrot.slane %v3396_v31, 1  ;;  %v6872_v31 = vld [vmem:[%s9801_s2 + $0x130] sm:$0xff]  }
 0x464   : > { %5536 = vmatprep.mubr.msk.bf16.mxu1 %vm8632_vm6, %v8641_v0  ;;  %5909 = vmatpush3.bf16.msra.mxu1 %v6860_v8  ;;  %v6870_v8 = vld [vmem:[%s9801_s2 + $0x128] sm:$0xff]  }
 0x465   : > { %v3601_v27 = vrot.slane %v3599_v12, 1  ;;  %5910 = vmatprep.subr.bf16.mxu1 %v6861_v1  ;;  %v8966_v23 = vsel %vm919_vm0, %v3717_v15, %v3718_v43  ;;  %v6873_v1 = vld [vmem:[%s9801_s2 + $0x178] sm:$0xff]   ;;  %v6875_v12 = vld [vmem:[%s9801_s2 + $0x1c0] sm:$0xff]  }
 0x467   : > { %v8969_v13 = vsel %vm578_vm1, %v3597_v10, %v3601_v27 }
 0x468   : > { %5911 = vmatpush3.bf16.msra.mxu1 %v6862_v11 }
 0x469   : > { %5912 = vmatprep.subr.bf16.mxu1 %v6863_v52 }
 0x46b   : > { %4375 = vmatmul.mubr.bf16.gmra.mrb[180].mxu1 %v10074_v6 }
 0x46c   : > { %5539 = vmatprep.mubr.msk.bf16.mxu1 %vm8632_vm6, %v8669_v55  ;;  %5913 = vmatpush3.bf16.msra.mxu1 %v6864_v36 }
 0x46d   : > { %5914 = vmatprep.subr.bf16.mxu1 %v6865_v63 }
 0x470   : > { %5915 = vmatpush3.bf16.msra.mxu1 %v6866_v21 }
 0x471   : > { %5916 = vmatprep.subr.bf16.mxu1 %v6867_v57 }
 0x473   : > { %4383 = vmatmul.mubr.bf16.gmra.mrb[184].mxu1 %v8662_v59 }
 0x474   : > { %5542 = vmatprep.mubr.msk.bf16.mxu1 %vm8632_vm6, %v8687_v42  ;;  %5917 = vmatpush3.bf16.msra.mxu1 %v6868_v56 }
 0x475   : > { %5918 = vmatprep.subr.bf16.mxu1 %v6869_v22 }
 0x478   : > { %5919 = vmatpush3.bf16.msra.mxu1 %v6870_v8 }
 0x479   : > { %5920 = vmatprep.subr.bf16.mxu1 %v6871_v32 }
 0x47b   : > { %4391 = vmatmul.mubr.bf16.gmra.mrb[188].mxu1 %v8680_v26 }
 0x47c   : > { %5545 = vmatprep.mubr.msk.bf16.mxu1 %vm8632_vm6, %v8713_v47  ;;  %5921 = vmatpush3.bf16.msra.mxu1 %v6872_v31 }
 0x47d   : > { %5922 = vmatprep.subr.bf16.mxu1 %v6873_v1 }
 0x480   : > { %5923 = vmatpush3.bf16.msra.mxu1 %v6874_v24 }
 0x481   : > { %6020 = vmatprep.subr.bf16.mxu1 %v6875_v12 }
 0x483   : > { %4399 = vmatmul.mubr.bf16.gmra.mrb[192].mxu1 %v8706_v45 }
 0x484   : > { %5548 = vmatprep.mubr.msk.bf16.mxu1 %vm8632_vm6, %v8737_v4 }
 0x486   : > { %v5706_v15 = vpop.f32.mrb[116].mxu1 }
 0x487   : > { %v5707_v43 = vpop.f32.mrb[117].mxu1 }
 0x488   : > { %v9023_v11 = vadd.f32 %v5707_v43, %v5706_v15  ;;  %v5709_v10 = vpop.f32.mrb[118].mxu1 }
 0x489   : > { %v5710_v27 = vpop.f32.mrb[119].mxu1 }
 0x48a   : > { %v9025_v52 = vadd.f32 %v5710_v27, %v5709_v10 }
 0x48b   : > { %4407 = vmatmul.mubr.bf16.gmra.mrb[196].mxu1 %v8730_v16 }
 0x48c   : > { %5551 = vmatprep.mubr.msk.bf16.mxu1 %vm8632_vm6, %v8760_v48 }
 0x493   : > { %4415 = vmatmul.mubr.bf16.gmra.mrb[200].mxu1 %v8753_v9 }
 0x494   : > { %v5712_v36 = vpop.f32.mrb[120].mxu1  ;;  %5554 = vmatprep.mubr.msk.bf16.mxu1 %vm8632_vm6, %v8778_v62  ;;  %v10081_v62 = vld [vmem:[#allocation45_spill] sm:$0xff] }
 0x495   : > { %v5713_v63 = vpop.f32.mrb[121].mxu1 }
 0x496   : > { %v9035_v21 = vadd.f32 %v5713_v63, %v5712_v36  ;;  %v5715_v57 = vpop.f32.mrb[122].mxu1 }
 0x497   : > { %v5716_v56 = vpop.f32.mrb[123].mxu1 }
 0x498   : > { %v9037_v22 = vadd.f32 %v5716_v56, %v5715_v57 }
 0x49b   : > { %4423 = vmatmul.mubr.bf16.gmra.mrb[204].mxu1 %v8771_v7 }
 0x49c   : > { %5557 = vmatprep.mubr.msk.bf16.mxu1 %vm8632_vm6, %v8802_v35 }
 0x49e   : > { %v5718_v8 = vpop.f32.mrb[124].mxu1 }
 0x49f   : > { %v5719_v32 = vpop.f32.mrb[125].mxu1 }
 0x4a0   : > { %v9043_v31 = vadd.f32 %v5719_v32, %v5718_v8  ;;  %v5721_v1 = vpop.f32.mrb[126].mxu1 }
 0x4a1   : > { %v5722_v24 = vpop.f32.mrb[127].mxu1 }
 0x4a2   : > { %v9045_v12 = vadd.f32 %v5722_v24, %v5721_v1 }
 0x4a3   : > { %4431 = vmatmul.mubr.bf16.gmra.mrb[208].mxu1 %v8795_v37 }
 0x4a4   : > { %5560 = vmatprep.mubr.msk.bf16.mxu1 %vm8632_vm6, %v8820_v5 }
 0x4ab   : > { %4439 = vmatmul.mubr.bf16.gmra.mrb[212].mxu1 %v8813_v17 }
 0x4ac   : > { %v5724_v15 = vpop.f32.mrb[128].mxu1  ;;  %5563 = vmatprep.mubr.msk.bf16.mxu1 %vm8632_vm6, %v8840_v60 }
 0x4ad   : > { %v5725_v43 = vpop.f32.mrb[129].mxu1 }
 0x4ae   : > { %v9055_v10 = vadd.f32 %v5725_v43, %v5724_v15  ;;  %v5727_v27 = vpop.f32.mrb[130].mxu1 }
 0x4af   : > { %v5728_v36 = vpop.f32.mrb[131].mxu1 }
 0x4b0   : > { %v9057_v63 = vadd.f32 %v5728_v36, %v5727_v27 }
 0x4b3   : > { %4447 = vmatmul.mubr.bf16.gmra.mrb[216].mxu1 %v8833_v51 }
 0x4b4   : > { %5566 = vmatprep.mubr.msk.bf16.mxu1 %vm8632_vm6, %v8858_v41  ;;  %v10076_v41 = vld [vmem:[#allocation43_spill] sm:$0xff] }
 0x4b6   : > { %v5730_v57 = vpop.f32.mrb[132].mxu1 }
 0x4b7   : > { %v5731_v56 = vpop.f32.mrb[133].mxu1 }
 0x4b8   : > { %v9063_v8 = vadd.f32 %v5731_v56, %v5730_v57  ;;  %v5733_v32 = vpop.f32.mrb[134].mxu1 }
 0x4b9   : > { %v5734_v1 = vpop.f32.mrb[135].mxu1 }
 0x4ba   : > { %v9065_v24 = vadd.f32 %v5734_v1, %v5733_v32 }
 0x4bb   : > { %4455 = vmatmul.mubr.bf16.gmra.mrb[220].mxu1 %v8851_v14 }
 0x4bc   : > { %5569 = vmatprep.mubr.msk.bf16.mxu1 %vm8632_vm6, %v8878_v34 }
 0x4c3   : > { %4463 = vmatmul.mubr.bf16.gmra.mrb[224].mxu1 %v8871_v38 }
 0x4c4   : > { %v5736_v15 = vpop.f32.mrb[136].mxu1  ;;  %5572 = vmatprep.mubr.msk.bf16.mxu1 %vm8632_vm6, %v8896_v2 }
 0x4c5   : > { %v5737_v43 = vpop.f32.mrb[137].mxu1 }
 0x4c6   : > { %v9075_v27 = vadd.f32 %v5737_v43, %v5736_v15  ;;  %v5739_v36 = vpop.f32.mrb[138].mxu1 }
 0x4c7   : > { %v5740_v57 = vpop.f32.mrb[139].mxu1 }
 0x4c8   : > { %v9077_v56 = vadd.f32 %v5740_v57, %v5739_v36 }
 0x4cb   : > { %4471 = vmatmul.mubr.bf16.gmra.mrb[228].mxu1 %v8889_v20 }
 0x4cc   : > { %5575 = vmatprep.mubr.msk.bf16.mxu1 %vm8632_vm6, %v8916_v30 }
 0x4ce   : > { %v5742_v32 = vpop.f32.mrb[140].mxu1 }
 0x4cf   : > { %v5743_v1 = vpop.f32.mrb[141].mxu1 }
 0x4d0   : > { %v9083_v3 = vadd.f32 %v5743_v1, %v5742_v32  ;;  %v5745_v53 = vpop.f32.mrb[142].mxu1 }
 0x4d1   : > { %v5746_v34 = vpop.f32.mrb[143].mxu1 }
 0x4d2   : > { %v9085_v2 = vadd.f32 %v5746_v34, %v5745_v53  ;;  %v6876_v34 = vld [vmem:[%s9801_s2 + $0x180] sm:$0xff]   ;;  %v6877_v53 = vld [vmem:[%s9801_s2 + $0x1c8] sm:$0xff]  }
 0x4d3   : > { %4479 = vmatmul.mubr.bf16.gmra.mrb[232].mxu1 %v8909_v54 }
 0x4d4   : > { %5578 = vmatprep.mubr.msk.bf16.mxu1 %vm8632_vm6, %v8934_v29  ;;  %v10075_v29 = vld [vmem:[#allocation31_spill] sm:$0xff] }
 0x4db   : > { %4487 = vmatmul.mubr.bf16.gmra.mrb[236].mxu1 %v8927_v58 }
 0x4dc   : > { %v5748_v15 = vpop.f32.mrb[144].mxu1  ;;  %4527 = vmatprep.mubr.bf16.mxu1 %v10074_v6  ;;  %v6878_v6 = vld [vmem:[%s9801_s2 + $0x188] sm:$0xff]  }
 0x4dd   : > { %v5749_v43 = vpop.f32.mrb[145].mxu1 }
 0x4de   : > { %v9093_v36 = vadd.f32 %v5749_v43, %v5748_v15  ;;  %v5751_v57 = vpop.f32.mrb[146].mxu1  ;;  %v6879_v15 = vld [vmem:[%s9801_s2 + $0x1d0] sm:$0xff]  }
 0x4df   : > { %v5752_v32 = vpop.f32.mrb[147].mxu1 }
 0x4e0   : > { %v9095_v1 = vadd.f32 %v5752_v32, %v5751_v57 }
 0x4e3   : > { %4528 = vmatmul.mubr.bf16.vlgmr.msra.gmra.mrb[240].mxu1 %v10075_v29  ;;  %v6880_v29 = vld [vmem:[%s9801_s2 + $0x190] sm:$0xff]  }
 0x4e4   : > { %4535 = vmatprep.mubr.bf16.mxu1 %v8662_v59  ;;  %6021 = vmatpush3.bf16.msra.mxu1 %v6876_v34 }
 0x4e5   : > { %6022 = vmatprep.subr.bf16.mxu1 %v6877_v53  ;;  %v6881_v53 = vld [vmem:[%s9801_s2 + $0x1d8] sm:$0xff]  }
 0x4e6   : > { %v5754_v43 = vpop.f32.mrb[148].mxu1 }
 0x4e7   : > { %v5755_v57 = vpop.f32.mrb[149].mxu1 }
 0x4e8   : > { %v9111_v32 = vadd.f32 %v5755_v57, %v5754_v43  ;;  %v5757_v30 = vpop.f32.mrb[150].mxu1  ;;  %6023 = vmatpush3.bf16.msra.mxu1 %v6878_v6  ;;  %v6882_v6 = vld [vmem:[%s9801_s2 + $0x198] sm:$0xff]   ;;  %v6885_v43 = vld [vmem:[%s9801_s2 + $0x1e8] sm:$0xff]  }
 0x4e9   : > { %v5758_v34 = vpop.f32.mrb[151].mxu1  ;;  %6024 = vmatprep.subr.bf16.mxu1 %v6879_v15  ;;  %v6883_v15 = vld [vmem:[%s9801_s2 + $0x1e0] sm:$0xff]  }
 0x4ea   : > { %v9119_v59 = vadd.f32 %v5758_v34, %v5757_v30  ;;  %v6884_v30 = vld [vmem:[%s9801_s2 + $0x1a0] sm:$0xff]  }
 0x4eb   : > { %4536 = vmatmul.mubr.bf16.gmra.mrb[244].mxu1 %v10076_v41 }
 0x4ec   : > { %4543 = vmatprep.mubr.bf16.mxu1 %v8680_v26  ;;  %6025 = vmatpush3.bf16.msra.mxu1 %v6880_v29  ;;  %v6886_v29 = vld [vmem:[%s9801_s2 + $0x1a8] sm:$0xff]  }
 0x4ed   : > { %6026 = vmatprep.subr.bf16.mxu1 %v6881_v53  ;;  %v6887_v53 = vld [vmem:[%s9801_s2 + $0x1f0] sm:$0xff]  }
 0x4f0   : > { %6027 = vmatpush3.bf16.msra.mxu1 %v6882_v6 }
 0x4f1   : > { %6028 = vmatprep.subr.bf16.mxu1 %v6883_v15 }
 0x4f3   : > { %4544 = vmatmul.mubr.bf16.gmra.mrb[248].mxu1 %v8685_v28 }
 0x4f4   : > { %v5760_v57 = vpop.f32.mrb[152].mxu1  ;;  %4551 = vmatprep.mubr.bf16.mxu1 %v8706_v45  ;;  %6029 = vmatpush3.bf16.msra.mxu1 %v6884_v30  ;;  %v6888_v30 = vld [vmem:[%s9801_s2 + $0x1b0] sm:$0xff]  }
 0x4f5   : > { %v5761_v34 = vpop.f32.mrb[153].mxu1  ;;  %6030 = vmatprep.subr.bf16.mxu1 %v6885_v43  ;;  %v6889_v43 = vld [vmem:[%s9801_s2 + $0x1f8] sm:$0xff]  }
 0x4f6   : > { %v9143_v6 = vadd.f32 %v5761_v34, %v5760_v57  ;;  %v5763_v15 = vpop.f32.mrb[154].mxu1  ;;  %v9161_v57 = vld [vmem:[%s9801_s2 + $0x200] sm:$0xff]  }
 0x4f7   : > { %v5764_v26 = vpop.f32.mrb[155].mxu1 }
 0x4f8   : > { %v9145_v60 = vadd.f32 %v5764_v26, %v5763_v15  ;;  %6031 = vmatpush3.bf16.msra.mxu1 %v6886_v29  ;;  %v6890_v26 = vld [vmem:[%s9801_s2 + $0x1b8] sm:$0xff]  }
 0x4f9   : > { %6032 = vmatprep.subr.bf16.mxu1 %v6887_v53 }
 0x4fa   : > { %10077 = vst [vmem:[#allocation15_spill] sm:$0xff] %v9145_v60 }
 0x4fb   : > { %4552 = vmatmul.mubr.bf16.gmra.mrb[252].mxu1 %v8711_v49 }
 0x4fc   : > { %4559 = vmatprep.mubr.bf16.mxu1 %v8730_v16  ;;  %6033 = vmatpush3.bf16.msra.mxu1 %v6888_v30 }
 0x4fd   : > { %6034 = vmatprep.subr.bf16.mxu1 %v6889_v43  ;;  %v10080_v43 = vld [vmem:[#allocation33_spill] sm:$0xff] }
 0x4fe   : > { %v5766_v29 = vpop.f32.mrb[156].mxu1 }
 0x4ff   : > { %v5767_v34 = vpop.f32.mrb[157].mxu1 }
 0x500   : > { %v9163_v53 = vadd.f32 %v5767_v34, %v5766_v29  ;;  %v5769_v15 = vpop.f32.mrb[158].mxu1  ;;  %6035 = vmatpush3.bf16.msra.mxu1 %v6890_v26 }
 0x501   : > { %v5770_v45 = vpop.f32.mrb[159].mxu1  ;;  %6280 = vmatprep.subr.bf16.mxu1 %v9161_v57 }
 0x502   : > { %10078 = vst [vmem:[#allocation16_spill] sm:$0xff] %v9163_v53  ;;  %v9166_v30 = vadd.f32 %v5770_v45, %v5769_v15 }
 0x503   : > { %4560 = vmatmul.mubr.bf16.gmra.mrb[0].mxu1 %v8735_v44 }
 0x504   : > { %10079 = vst [vmem:[#allocation17_spill] sm:$0xff] %v9166_v30  ;;  %4567 = vmatprep.mubr.bf16.mxu1 %v8753_v9 }
 0x50b   : > { %4568 = vmatmul.mubr.bf16.gmra.mrb[104].mxu1 %v10080_v43 }
 0x50c   : > { %v5772_v16 = vpop.f32.mrb[160].mxu1  ;;  %4575 = vmatprep.mubr.bf16.mxu1 %v8771_v7 }
 0x50d   : > { %v5773_v5 = vpop.f32.mrb[161].mxu1 }
 0x50e   : > { %v9172_v35 = vadd.f32 %v5773_v5, %v5772_v16  ;;  %v5775_v29 = vpop.f32.mrb[162].mxu1 }
 0x50f   : > { %v5776_v34 = vpop.f32.mrb[163].mxu1 }
 0x510   : > { %v9174_v26 = vadd.f32 %v5776_v34, %v5775_v29 }
 0x513   : > { %4576 = vmatmul.mubr.bf16.gmra.mrb[4].mxu1 %v10081_v62 }
 0x514   : > { %4583 = vmatprep.mubr.bf16.mxu1 %v8795_v37 }
 0x516   : > { %v5778_v45 = vpop.f32.mrb[164].mxu1 }
 0x517   : > { %v5779_v15 = vpop.f32.mrb[165].mxu1 }
 0x518   : > { %v9178_v30 = vadd.f32 %v5779_v15, %v5778_v45  ;;  %v5781_v9 = vpop.f32.mrb[166].mxu1 }
 0x519   : > { %v5782_v53 = vpop.f32.mrb[167].mxu1 }
 0x51a   : > { %v9180_v60 = vadd.f32 %v5782_v53, %v5781_v9 }
 0x51b   : > { %4584 = vmatmul.mubr.bf16.gmra.mrb[8].mxu1 %v8800_v50 }
 0x51c   : > { %10082 = vst [vmem:[#allocation18_spill] sm:$0xff] %v9180_v60  ;;  %4591 = vmatprep.mubr.bf16.mxu1 %v8813_v17 }
 0x523   : > { %4592 = vmatmul.mubr.bf16.gmra.mrb[12].mxu1 %v8818_v46 }
 0x524   : > { %v5784_v16 = vpop.f32.mrb[168].mxu1  ;;  %4599 = vmatprep.mubr.bf16.mxu1 %v8833_v51 }
 0x525   : > { %v5785_v5 = vpop.f32.mrb[169].mxu1 }
 0x526   : > { %v9186_v29 = vadd.f32 %v5785_v5, %v5784_v16  ;;  %v5787_v34 = vpop.f32.mrb[170].mxu1 }
 0x527   : > { %v5788_v37 = vpop.f32.mrb[171].mxu1 }
 0x528   : > { %10083 = vst [vmem:[#allocation19_spill] sm:$0xff] %v9186_v29  ;;  %v9188_v45 = vadd.f32 %v5788_v37, %v5787_v34  ;;  %v10088_v29 = vld [vmem:[#allocation49_spill] sm:$0xff] }
 0x52a   : > { %10084 = vst [vmem:[#allocation20_spill] sm:$0xff] %v9188_v45 }
 0x52b   : > { %4600 = vmatmul.mubr.bf16.gmra.mrb[16].mxu1 %v8838_v33 }
 0x52c   : > { %4607 = vmatprep.mubr.bf16.mxu1 %v8851_v14 }
 0x52e   : > { %v5790_v9 = vpop.f32.mrb[172].mxu1 }
 0x52f   : > { %v5791_v53 = vpop.f32.mrb[173].mxu1 }
 0x530   : > { %v9192_v15 = vadd.f32 %v5791_v53, %v5790_v9  ;;  %v5793_v17 = vpop.f32.mrb[174].mxu1  ;;  %v10087_v9 = vld [vmem:[#allocation50_spill] sm:$0xff] }
 0x531   : > { %v5794_v7 = vpop.f32.mrb[175].mxu1 }
 0x532   : > { %10085 = vst [vmem:[#allocation21_spill] sm:$0xff] %v9192_v15  ;;  %v9194_v60 = vadd.f32 %v5794_v7, %v5793_v17 }
 0x533   : > { %4608 = vmatmul.mubr.bf16.gmra.mrb[20].mxu1 %v8856_v39 }
 0x534   : > { %10086 = vst [vmem:[#allocation22_spill] sm:$0xff] %v9194_v60  ;;  %4615 = vmatprep.mubr.bf16.mxu1 %v8871_v38 }
 0x536   : > { %v5812_v16 = vpop.f32.mrb[176].mxu1 }
 0x537   : > { %v5813_v5 = vpop.f32.mrb[177].mxu1 }
 0x538   : > { %v5814_v37 = vadd.f32 %v5813_v5, %v5812_v16  ;;  %v5815_v34 = vpop.f32.mrb[178].mxu1 }
 0x539   : > { %v5816_v51 = vpop.f32.mrb[179].mxu1 }
 0x53a   : > { %v9199_v45 = vadd.f32 %v5814_v37, %v8788_v61  ;;  %v5817_v14 = vadd.f32 %v5816_v51, %v5815_v34 }
 0x53b   : > { %4616 = vmatmul.mubr.bf16.gmra.mrb[24].mxu1 %v8876_v40 }
 0x53c   : > { %v9203_v53 = vadd.f32 %v5817_v14, %v10087_v9  ;;  %4623 = vmatprep.mubr.bf16.mxu1 %v8889_v20 }
 0x53e   : > { %v5818_v7 = vpop.f32.mrb[180].mxu1 }
 0x53f   : > { %v5819_v17 = vpop.f32.mrb[181].mxu1 }
 0x540   : > { %v5820_v60 = vadd.f32 %v5819_v17, %v5818_v7  ;;  %v5821_v38 = vpop.f32.mrb[182].mxu1 }
 0x541   : > { %v5822_v15 = vpop.f32.mrb[183].mxu1 }
 0x542   : > { %v9207_v16 = vadd.f32 %v5820_v60, %v9023_v11  ;;  %v5823_v5 = vadd.f32 %v5822_v15, %v5821_v38 }
 0x543   : > { %4624 = vmatmul.mubr.bf16.gmra.mrb[28].mxu1 %v10088_v29 }
 0x544   : > { %v9211_v61 = vadd.f32 %v5823_v5, %v9025_v52  ;;  %4631 = vmatprep.mubr.bf16.mxu1 %v8909_v54 }
 0x546   : > { %v5824_v51 = vpop.f32.mrb[184].mxu1 }
 0x547   : > { %v5825_v14 = vpop.f32.mrb[185].mxu1 }
 0x548   : > { %v5826_v37 = vadd.f32 %v5825_v14, %v5824_v51  ;;  %v5827_v34 = vpop.f32.mrb[186].mxu1 }
 0x549   : > { %v5828_v9 = vpop.f32.mrb[187].mxu1 }
 0x54a   : > { %v9215_v7 = vadd.f32 %v5826_v37, %v9035_v21  ;;  %v5829_v17 = vadd.f32 %v5828_v9, %v5827_v34 }
 0x54b   : > { %4632 = vmatmul.mubr.bf16.gmra.mrb[32].mxu1 %v8914_v19 }
 0x54c   : > { %v9219_v60 = vadd.f32 %v5829_v17, %v9037_v22  ;;  %4639 = vmatprep.mubr.bf16.mxu1 %v8927_v58 }
 0x54e   : > { %v5830_v38 = vpop.f32.mrb[188].mxu1 }
 0x54f   : > { %v5831_v11 = vpop.f32.mrb[189].mxu1 }
 0x550   : > { %v5832_v52 = vadd.f32 %v5831_v11, %v5830_v38  ;;  %v5833_v15 = vpop.f32.mrb[190].mxu1 }
 0x551   : > { %v5834_v5 = vpop.f32.mrb[191].mxu1 }
 0x552   : > { %v9223_v51 = vadd.f32 %v5832_v52, %v9043_v31  ;;  %v5835_v14 = vadd.f32 %v5834_v5, %v5833_v15 }
 0x553   : > { %4640 = vmatmul.mubr.bf16.gmra.mrb[36].mxu1 %v8932_v18 }
 0x554   : > { %v9227_v21 = vadd.f32 %v5835_v14, %v9045_v12  ;;  %4647 = vmatprep.mubr.bf16.mxu1 %v8966_v23 }
 0x556   : > { %v5836_v22 = vpop.f32.mrb[192].mxu1 }
 0x557   : > { %v5837_v37 = vpop.f32.mrb[193].mxu1 }
 0x558   : > { %v5838_v34 = vadd.f32 %v5837_v37, %v5836_v22  ;;  %v5839_v9 = vpop.f32.mrb[194].mxu1  ;;  %v6892_v22 = vld [vmem:[%s9801_s2 + $0x208] sm:$0xff]  }
 0x559   : > { %v5840_v17 = vpop.f32.mrb[195].mxu1 }
 0x55a   : > { %v9231_v38 = vadd.f32 %v5838_v34, %v9055_v10  ;;  %v5841_v11 = vadd.f32 %v5840_v17, %v5839_v9 }
 0x55b   : > { %4648 = vmatmul.mubr.bf16.gmra.mrb[40].mxu1 %v8969_v13 }
 0x55c   : > { %v9235_v31 = vadd.f32 %v5841_v11, %v9057_v63  ;;  %4688 = vmatprep.mubr.bf16.mxu1 %v10076_v41  ;;  %v6893_v41 = vld [vmem:[%s9801_s2 + $0x210] sm:$0xff]  }
 0x55e   : > { %v5842_v12 = vpop.f32.mrb[196].mxu1 }
 0x55f   : > { %v5843_v52 = vpop.f32.mrb[197].mxu1 }
 0x560   : > { %v5844_v15 = vadd.f32 %v5843_v52, %v5842_v12  ;;  %v5845_v5 = vpop.f32.mrb[198].mxu1  ;;  %v6895_v12 = vld [vmem:[%s9801_s2 + $0x220] sm:$0xff]  }
 0x561   : > { %v5846_v14 = vpop.f32.mrb[199].mxu1 }
 0x562   : > { %v9242_v10 = vadd.f32 %v5844_v15, %v9063_v8  ;;  %v5847_v37 = vadd.f32 %v5846_v14, %v5845_v5 }
 0x563   : > { %5581 = vmatmul.mubr.msk.bf16.vlgmr.msra.gmra.mrb[44].mxu1 %vm8632_vm6, %v8641_v0  ;;  %v6894_v0 = vld [vmem:[%s9801_s2 + $0x218] sm:$0xff]  }
 0x564   : > { %v9248_v63 = vadd.f32 %v5847_v37, %v9065_v24  ;;  %4696 = vmatprep.mubr.bf16.mxu1 %v8685_v28  ;;  %6281 = vmatpush3.bf16.msra.mxu1 %v9161_v57  ;;  %v6897_v37 = vld [vmem:[%s9801_s2 + $0x230] sm:$0xff]  }
 0x565   : > { %6282 = vmatprep.subr.bf16.mxu1 %v6892_v22 }
 0x566   : > { %v5848_v34 = vpop.f32.mrb[200].mxu1 }
 0x567   : > { %v5849_v8 = vpop.f32.mrb[201].mxu1 }
 0x568   : > { %v5850_v9 = vadd.f32 %v5849_v8, %v5848_v34  ;;  %v5851_v17 = vpop.f32.mrb[202].mxu1  ;;  %6283 = vmatpush3.bf16.msra.mxu1 %v6892_v22 }
 0x569   : > { %v5852_v11 = vpop.f32.mrb[203].mxu1  ;;  %6284 = vmatprep.subr.bf16.mxu1 %v6893_v41 }
 0x56a   : > { %v9259_v28 = vadd.f32 %v5850_v9, %v9075_v27  ;;  %v5853_v24 = vadd.f32 %v5852_v11, %v5851_v17 }
 0x56b   : > { %5584 = vmatmul.mubr.msk.bf16.gmra.mrb[48].mxu1 %vm8632_vm6, %v8669_v55  ;;  %v6896_v55 = vld [vmem:[%s9801_s2 + $0x228] sm:$0xff]  }
 0x56c   : > { %v9265_v57 = vadd.f32 %v5853_v24, %v9077_v56  ;;  %4704 = vmatprep.mubr.bf16.mxu1 %v8711_v49  ;;  %6285 = vmatpush3.bf16.msra.mxu1 %v6893_v41 }
 0x56d   : > { %6286 = vmatprep.subr.bf16.mxu1 %v6894_v0 }
 0x56e   : > { %v5854_v52 = vpop.f32.mrb[204].mxu1 }
 0x56f   : > { %v5855_v15 = vpop.f32.mrb[205].mxu1 }
 0x570   : > { %v5856_v27 = vadd.f32 %v5855_v15, %v5854_v52  ;;  %v5857_v5 = vpop.f32.mrb[206].mxu1  ;;  %6287 = vmatpush3.bf16.msra.mxu1 %v6894_v0 }
 0x571   : > { %v5858_v14 = vpop.f32.mrb[207].mxu1  ;;  %6288 = vmatprep.subr.bf16.mxu1 %v6895_v12 }
 0x572   : > { %v9275_v56 = vadd.f32 %v5856_v27, %v9083_v3  ;;  %v5859_v49 = vadd.f32 %v5858_v14, %v5857_v5 }
 0x573   : > { %5587 = vmatmul.mubr.msk.bf16.gmra.mrb[52].mxu1 %vm8632_vm6, %v8687_v42  ;;  %v6898_v42 = vld [vmem:[%s9801_s2 + $0x238] sm:$0xff]  }
 0x574   : > { %v9281_v22 = vadd.f32 %v5859_v49, %v9085_v2  ;;  %4712 = vmatprep.mubr.bf16.mxu1 %v8735_v44  ;;  %6289 = vmatpush3.bf16.msra.mxu1 %v6895_v12  ;;  %v10089_v49 = vld [vmem:[#allocation15_spill] sm:$0xff] }
 0x575   : > { %6290 = vmatprep.subr.bf16.mxu1 %v6896_v55 }
 0x576   : > { %v5860_v41 = vpop.f32.mrb[208].mxu1 }
 0x577   : > { %v5861_v34 = vpop.f32.mrb[209].mxu1 }
 0x578   : > { %v5862_v3 = vadd.f32 %v5861_v34, %v5860_v41  ;;  %v5863_v8 = vpop.f32.mrb[210].mxu1  ;;  %6291 = vmatpush3.bf16.msra.mxu1 %v6896_v55 }
 0x579   : > { %v5864_v9 = vpop.f32.mrb[211].mxu1  ;;  %6292 = vmatprep.subr.bf16.mxu1 %v6897_v37 }
 0x57a   : > { %v9291_v2 = vadd.f32 %v5862_v3, %v9093_v36  ;;  %v5865_v44 = vadd.f32 %v5864_v9, %v5863_v8  ;;  %v10090_v3 = vld [vmem:[#allocation16_spill] sm:$0xff] }
 0x57b   : > { %5590 = vmatmul.mubr.msk.bf16.gmra.mrb[56].mxu1 %vm8632_vm6, %v8713_v47  ;;  %v10091_v9 = vld [vmem:[#allocation48_spill] sm:$0xff] }
 0x57c   : > { %v9297_v17 = vadd.f32 %v5865_v44, %v9095_v1  ;;  %4720 = vmatprep.mubr.bf16.mxu1 %v10080_v43  ;;  %6293 = vmatpush3.bf16.msra.mxu1 %v6897_v37 }
 0x57d   : > { %6294 = vmatprep.subr.bf16.mxu1 %v6898_v42 }
 0x57e   : > { %v5866_v11 = vpop.f32.mrb[212].mxu1 }
 0x57f   : > { %v5867_v0 = vpop.f32.mrb[213].mxu1 }
 0x580   : > { %v5868_v24 = vadd.f32 %v5867_v0, %v5866_v11  ;;  %v5869_v12 = vpop.f32.mrb[214].mxu1  ;;  %6295 = vmatpush3.bf16.msra.mxu1 %v6898_v42  ;;  %v10092_v42 = vld [vmem:[#allocation17_spill] sm:$0xff] }
 0x581   : > { %v5870_v52 = vpop.f32.mrb[215].mxu1 }
 0x582   : > { %v9301_v36 = vadd.f32 %v5868_v24, %v9111_v32  ;;  %v5871_v15 = vadd.f32 %v5870_v52, %v5869_v12 }
 0x583   : > { %5593 = vmatmul.mubr.msk.bf16.gmra.mrb[60].mxu1 %vm8632_vm6, %v8737_v4 }
 0x584   : > { %v9307_v47 = vadd.f32 %v5871_v15, %v9119_v59  ;;  %4728 = vmatprep.mubr.bf16.mxu1 %v10081_v62  ;;  %v10093_v15 = vld [vmem:[#allocation9_spill] sm:$0xff] }
 0x586   : > { %v5872_v1 = vpop.f32.mrb[216].mxu1 }
 0x587   : > { %v5873_v43 = vpop.f32.mrb[217].mxu1 }
 0x588   : > { %v5874_v27 = vadd.f32 %v5873_v43, %v5872_v1  ;;  %v5875_v5 = vpop.f32.mrb[218].mxu1  ;;  %v10094_v1 = vld [vmem:[#allocation7_spill] sm:$0xff] }
 0x589   : > { %v5876_v14 = vpop.f32.mrb[219].mxu1  ;;  %v1156_v43 = vunpack.c.h.b16 %v10094_v1 }
 0x58a   : > { %v9311_v55 = vadd.f32 %v5874_v27, %v9143_v6  ;;  %v5877_v32 = vadd.f32 %v5876_v14, %v5875_v5  ;;  %v10095_v27 = vld [vmem:[#allocation5_spill] sm:$0xff] }
 0x58b   : > { %5596 = vmatmul.mubr.msk.bf16.gmra.mrb[64].mxu1 %vm8632_vm6, %v8760_v48  ;;  %v10096_v5 = vrot.slane %v10095_v27, 1 }
 0x58c   : > { %v9317_v4 = vadd.f32 %v5877_v32, %v10089_v49  ;;  %4736 = vmatprep.mubr.bf16.mxu1 %v8800_v50 }
 0x58d   : > { %v1159_v14 = vunpack.c.l.b16 %v10096_v5 }
 0x58e   : > { %v5878_v59 = vpop.f32.mrb[220].mxu1 }
 0x58f   : > { %v5879_v62 = vpop.f32.mrb[221].mxu1  ;;  %v1330_v32 = vpack.c.b16 %v1159_v14, %v1156_v43  ;;  %v10102_v14 = vld [vmem:[#allocation21_spill] sm:$0xff] }
 0x590   : > { %v5880_v37 = vadd.f32 %v5879_v62, %v5878_v59  ;;  %v5881_v41 = vpop.f32.mrb[222].mxu1 }
 0x591   : > { %v5882_v34 = vpop.f32.mrb[223].mxu1  ;;  %6277 = vmatmul.mubr.bf16.gmra.mrb[124].mxu0 %v1330_v32 }
 0x592   : > { %v9321_v8 = vadd.f32 %v5880_v37, %v10090_v3  ;;  %v5883_v6 = vadd.f32 %v5882_v34, %v5881_v41  ;;  %v10097_v3 = vld [vmem:[#allocation35_spill] sm:$0xff] }
 0x593   : > { %5599 = vmatmul.mubr.msk.bf16.gmra.mrb[68].mxu1 %vm8632_vm6, %v10091_v9 }
 0x594   : > { %v9327_v48 = vadd.f32 %v5883_v6, %v10092_v42  ;;  %4744 = vmatprep.mubr.bf16.mxu1 %v8818_v46  ;;  %v10098_v6 = vld [vmem:[#allocation18_spill] sm:$0xff] }
 0x596   : > { %v5884_v44 = vpop.f32.mrb[224].mxu1 }
 0x597   : > { %v5885_v50 = vpop.f32.mrb[225].mxu1 }
 0x598   : > { %v5886_v11 = vadd.f32 %v5885_v50, %v5884_v44  ;;  %v5887_v0 = vpop.f32.mrb[226].mxu1 }
 0x599   : > { %v5888_v24 = vpop.f32.mrb[227].mxu1 }
 0x59a   : > { %v9331_v12 = vadd.f32 %v5886_v11, %v9172_v35  ;;  %v5889_v52 = vadd.f32 %v5888_v24, %v5887_v0  ;;  %v10099_v11 = vld [vmem:[#allocation19_spill] sm:$0xff] }
 0x59b   : > { %5602 = vmatmul.mubr.msk.bf16.gmra.mrb[72].mxu1 %vm8632_vm6, %v10093_v15  ;;  %v10100_v24 = vld [vmem:[#allocation39_spill] sm:$0xff] }
 0x59c   : > { %v9340_v46 = vadd.f32 %v5889_v52, %v9174_v26  ;;  %4752 = vmatprep.mubr.bf16.mxu1 %v8838_v33  ;;  %v10101_v52 = vld [vmem:[#allocation20_spill] sm:$0xff] }
 0x59e   : > { %v5890_v49 = vpop.f32.mrb[228].mxu1 }
 0x59f   : > { %v5891_v59 = vpop.f32.mrb[229].mxu1 }
 0x5a0   : > { %v5892_v35 = vadd.f32 %v5891_v59, %v5890_v49  ;;  %v5893_v62 = vpop.f32.mrb[230].mxu1  ;;  %v10103_v59 = vld [vmem:[#allocation41_spill] sm:$0xff] }
 0x5a1   : > { %v5894_v37 = vpop.f32.mrb[231].mxu1 }
 0x5a2   : > { %v9344_v41 = vadd.f32 %v5892_v35, %v9178_v30  ;;  %v5895_v34 = vadd.f32 %v5894_v37, %v5893_v62  ;;  %v10104_v35 = vld [vmem:[#allocation22_spill] sm:$0xff] }
 0x5a3   : > { %5605 = vmatmul.mubr.msk.bf16.gmra.mrb[76].mxu1 %vm8632_vm6, %v10097_v3 }
 0x5a4   : > { %v9350_v26 = vadd.f32 %v5895_v34, %v10098_v6  ;;  %4760 = vmatprep.mubr.bf16.mxu1 %v8856_v39 }
 0x5a6   : > { %v5896_v33 = vpop.f32.mrb[232].mxu1 }
 0x5a7   : > { %v5897_v9 = vpop.f32.mrb[233].mxu1 }
 0x5a8   : > { %v5898_v42 = vadd.f32 %v5897_v9, %v5896_v33  ;;  %v5899_v44 = vpop.f32.mrb[234].mxu1 }
 0x5a9   : > { %v5900_v50 = vpop.f32.mrb[235].mxu1 }
 0x5aa   : > { %v9354_v0 = vadd.f32 %v5898_v42, %v10099_v11  ;;  %v5901_v30 = vadd.f32 %v5900_v50, %v5899_v44  ;;  %v10105_v42 = vld [vmem:[#allocation46_spill] sm:$0xff] }
 0x5ab   : > { %5608 = vmatmul.mubr.msk.bf16.gmra.mrb[80].mxu1 %vm8632_vm6, %v10100_v24 }
 0x5ac   : > { %v9360_v15 = vadd.f32 %v5901_v30, %v10101_v52  ;;  %4768 = vmatprep.mubr.bf16.mxu1 %v8876_v40 }
 0x5ae   : > { %v5902_v1 = vpop.f32.mrb[236].mxu1 }
 0x5af   : > { %v5903_v39 = vpop.f32.mrb[237].mxu1 }
 0x5b0   : > { %v5904_v43 = vadd.f32 %v5903_v39, %v5902_v1  ;;  %v5905_v27 = vpop.f32.mrb[238].mxu1  ;;  %v10106_v1 = vld [vmem:[#allocation51_spill] sm:$0xff] }
 0x5b1   : > { %v5906_v5 = vpop.f32.mrb[239].mxu1 }
 0x5b2   : > { %v9364_v32 = vadd.f32 %v5904_v43, %v10102_v14  ;;  %v5907_v49 = vadd.f32 %v5906_v5, %v5905_v27 }
 0x5b3   : > { %5611 = vmatmul.mubr.msk.bf16.gmra.mrb[84].mxu1 %vm8632_vm6, %v10103_v59 }
 0x5b4   : > { %v9370_v62 = vadd.f32 %v5907_v49, %v10104_v35  ;;  %4776 = vmatprep.mubr.bf16.mxu1 %v10088_v29  ;;  %v10107_v49 = vld [vmem:[#allocation40_spill] sm:$0xff] }
 0x5b6   : > { %v5924_v37 = vpop.f32.mrb[240].mxu1 }
 0x5b7   : > { %v5925_v40 = vpop.f32.mrb[241].mxu1 }
 0x5b8   : > { %v5926_v34 = vadd.f32 %v5925_v40, %v5924_v37  ;;  %v5927_v3 = vpop.f32.mrb[242].mxu1 }
 0x5b9   : > { %v5928_v6 = vpop.f32.mrb[243].mxu1 }
 0x5ba   : > { %v9374_v33 = vadd.f32 %v5926_v34, %v9199_v45  ;;  %v5929_v9 = vadd.f32 %v5928_v6, %v5927_v3  ;;  %v10108_v3 = vld [vmem:[#allocation13_spill] sm:$0xff] }
 0x5bb   : > { %5614 = vmatmul.mubr.msk.bf16.gmra.mrb[88].mxu1 %vm8632_vm6, %v10105_v42 }
 0x5bc   : > { %v9380_v44 = vadd.f32 %v5929_v9, %v9203_v53  ;;  %4784 = vmatprep.mubr.bf16.mxu1 %v8914_v19 }
 0x5be   : > { %v5930_v50 = vpop.f32.mrb[244].mxu1 }
 0x5bf   : > { %v5931_v29 = vpop.f32.mrb[245].mxu1 }
 0x5c0   : > { %v5932_v11 = vadd.f32 %v5931_v29, %v5930_v50  ;;  %v5933_v30 = vpop.f32.mrb[246].mxu1 }
 0x5c1   : > { %v5934_v24 = vpop.f32.mrb[247].mxu1 }
 0x5c2   : > { %v9384_v52 = vadd.f32 %v5932_v11, %v9207_v16  ;;  %v5935_v45 = vadd.f32 %v5934_v24, %v5933_v30  ;;  %v10110_v30 = vmov 0.0|0.0  }
 0x5c3   : > { %5617 = vmatmul.mubr.msk.bf16.gmra.mrb[108].mxu1 %vm8632_vm6, %v10106_v1 }
 0x5c4   : > { %v9390_v39 = vadd.f32 %v5935_v45, %v9211_v61  ;;  %4792 = vmatprep.mubr.bf16.mxu1 %v8932_v18 }
 0x5c6   : > { %v5936_v53 = vpop.f32.mrb[248].mxu1 }
 0x5c7   : > { %v5937_v19 = vpop.f32.mrb[249].mxu1 }
 0x5c8   : > { %v5938_v43 = vadd.f32 %v5937_v19, %v5936_v53  ;;  %v5939_v27 = vpop.f32.mrb[250].mxu1 }
 0x5c9   : > { %v5940_v5 = vpop.f32.mrb[251].mxu1 }
 0x5ca   : > { %v9394_v14 = vadd.f32 %v5938_v43, %v9215_v7  ;;  %v5941_v16 = vadd.f32 %v5940_v5, %v5939_v27  ;;  %v10112_v5 = vld [vmem:[#allocation30_spill] sm:$0xff] }
 0x5cb   : > { %5620 = vmatmul.mubr.msk.bf16.gmra.mrb[92].mxu1 %vm8632_vm6, %v10107_v49 }
 0x5cc   : > { %v9400_v59 = vadd.f32 %v5941_v16, %v9219_v60  ;;  %4800 = vmatprep.mubr.bf16.mxu1 %v8969_v13  ;;  %v10109_v60 = vld [vmem:[#allocation6_spill] sm:$0xff]  ;;  %v10113_v16 = vld [vmem:[#allocation32_spill] sm:$0xff] }
 0x5ce   : > { %v5942_v61 = vpop.f32.mrb[252].mxu1 }
 0x5cf   : > { %v5943_v18 = vpop.f32.mrb[253].mxu1 }
 0x5d0   : > { %v5944_v35 = vadd.f32 %v5943_v18, %v5942_v61  ;;  %v5945_v37 = vpop.f32.mrb[254].mxu1 }
 0x5d1   : > { %v5946_v40 = vpop.f32.mrb[255].mxu1 }
 0x5d2   : > { %v9404_v34 = vadd.f32 %v5944_v35, %v9223_v51  ;;  %v5947_v7 = vadd.f32 %v5946_v40, %v5945_v37 }
 0x5d3   : > { %5623 = vmatmul.mubr.msk.bf16.gmra.mrb[96].mxu1 %vm8632_vm6, %v10108_v3  ;;  %v10115_v3 = vld [vmem:[#allocation47_spill] sm:$0xff] }
 0x5d4   : > { %v9410_v6 = vadd.f32 %v5947_v7, %v9227_v21  ;;  %4808 = vmatprep.mubr.bf16.mxu1 %v10109_v60  ;;  %v10114_v7 = vld [vmem:[#allocation44_spill] sm:$0xff] }
 0x5d6   : > { %v5948_v9 = vpop.f32.mrb[0].mxu1 }
 0x5d7   : > { %v5949_v13 = vpop.f32.mrb[1].mxu1 }
 0x5d8   : > { %v5950_v42 = vadd.f32 %v5949_v13, %v5948_v9  ;;  %v5951_v50 = vpop.f32.mrb[2].mxu1 }
 0x5d9   : > { %v5952_v29 = vpop.f32.mrb[3].mxu1 }
 0x5da   : > { %v9414_v11 = vadd.f32 %v5950_v42, %v9231_v38  ;;  %v5953_v51 = vadd.f32 %v5952_v29, %v5951_v50 }
 0x5db   : > { %4809 = vmatmul.mubr.bf16.gmra.mrb[100].mxu1 %v10110_v30  ;;  %v10117_v30 = vld [vmem:[#allocation8_spill] sm:$0xff] }
 0x5dc   : > { %v9418_v24 = vadd.f32 %v5953_v51, %v9235_v31  ;;  %6296 = vmatprep.mubr.bf16.mxu1 %v10111_v25  ;;  %v10116_v51 = vld [vmem:[#allocation38_spill] sm:$0xff] }
 0x5de   : > { %v5954_v21 = vpop.f32.mrb[104].mxu1 }
 0x5df   : > { %v5955_v45 = vpop.f32.mrb[105].mxu1 }
 0x5e0   : > { %v5956_v1 = vadd.f32 %v5955_v45, %v5954_v21  ;;  %v5957_v53 = vpop.f32.mrb[106].mxu1 }
 0x5e1   : > { %v5958_v19 = vpop.f32.mrb[107].mxu1 }
 0x5e2   : > { %v9422_v43 = vadd.f32 %v5956_v1, %v9242_v10  ;;  %v5959_v27 = vadd.f32 %v5958_v19, %v5957_v53 }
 0x5e3   : > { %6297 = vmatmul.mubr.bf16.vlgmr.msra.gmra.mrb[112].mxu1 %v10112_v5  ;;  %v10119_v5 = vld [vmem:[#allocation10_spill] sm:$0xff] }
 0x5e4   : > { %v9426_v38 = vadd.f32 %v5959_v27, %v9248_v63  ;;  %6300 = vmatprep.mubr.bf16.mxu1 %v10113_v16  ;;  %v10118_v27 = vld [vmem:[#allocation36_spill] sm:$0xff] }
 0x5e6   : > { %v5960_v31 = vpop.f32.mrb[4].mxu1 }
 0x5e7   : > { %v5961_v49 = vpop.f32.mrb[5].mxu1 }
 0x5e8   : > { %v5962_v61 = vadd.f32 %v5961_v49, %v5960_v31  ;;  %v5963_v18 = vpop.f32.mrb[6].mxu1 }
 0x5e9   : > { %v5964_v35 = vpop.f32.mrb[7].mxu1 }
 0x5ea   : > { %v9430_v37 = vadd.f32 %v5962_v61, %v9259_v28  ;;  %v5965_v40 = vadd.f32 %v5964_v35, %v5963_v18 }
 0x5eb   : > { %6301 = vmatmul.mubr.bf16.gmra.mrb[116].mxu1 %v10114_v7  ;;  %v10121_v7 = vld [vmem:[#allocation12_spill] sm:$0xff] }
 0x5ec   : > { %v9434_v10 = vadd.f32 %v5965_v40, %v9265_v57  ;;  %6304 = vmatprep.mubr.bf16.mxu1 %v10115_v3  ;;  %v10120_v40 = vld [vmem:[#allocation11_spill] sm:$0xff] }
 0x5ee   : > { %v5966_v63 = vpop.f32.mrb[8].mxu1 }
 0x5ef   : > { %v5967_v60 = vpop.f32.mrb[9].mxu1 }
 0x5f0   : > { %v5968_v9 = vadd.f32 %v5967_v60, %v5966_v63  ;;  %v5969_v13 = vpop.f32.mrb[10].mxu1 }
 0x5f1   : > { %v5970_v42 = vpop.f32.mrb[11].mxu1 }
 0x5f2   : > { %v9438_v50 = vadd.f32 %v5968_v9, %v9275_v56  ;;  %v5971_v29 = vadd.f32 %v5970_v42, %v5969_v13 }
 0x5f3   : > { %6305 = vmatmul.mubr.bf16.gmra.mrb[120].mxu1 %v10116_v51 }
 0x5f4   : > { %v9442_v28 = vadd.f32 %v5971_v29, %v9281_v22  ;;  %6308 = vmatprep.mubr.bf16.mxu1 %v10117_v30 }
 0x5f6   : > { %v5972_v57 = vpop.f32.mrb[12].mxu1 }
 0x5f7   : > { %v5973_v25 = vpop.f32.mrb[13].mxu1 }
 0x5f8   : > { %v5974_v21 = vadd.f32 %v5973_v25, %v5972_v57  ;;  %v5975_v45 = vpop.f32.mrb[14].mxu1 }
 0x5f9   : > { %v5976_v1 = vpop.f32.mrb[15].mxu1 }
 0x5fa   : > { %v9446_v53 = vadd.f32 %v5974_v21, %v9291_v2  ;;  %v5977_v19 = vadd.f32 %v5976_v1, %v5975_v45 }
 0x5fb   : > { %6309 = vmatmul.mubr.bf16.gmra.mrb[124].mxu1 %v10118_v27 }
 0x5fc   : > { %v9450_v56 = vadd.f32 %v5977_v19, %v9297_v17  ;;  %6312 = vmatprep.mubr.bf16.mxu1 %v10119_v5  ;;  %v10122_v5 = vld [vmem:[#allocation14_spill] sm:$0xff] }
 0x5fe   : > { %v5978_v22 = vpop.f32.mrb[16].mxu1 }
 0x5ff   : > { %v5979_v16 = vpop.f32.mrb[17].mxu1 }
 0x600   : > { %v5980_v31 = vadd.f32 %v5979_v16, %v5978_v22  ;;  %v5981_v49 = vpop.f32.mrb[18].mxu1 }
 0x601   : > { %v5982_v61 = vpop.f32.mrb[19].mxu1 }
 0x602   : > { %v9454_v18 = vadd.f32 %v5980_v31, %v9301_v36  ;;  %v5983_v35 = vadd.f32 %v5982_v61, %v5981_v49 }
 0x603   : > { %6313 = vmatmul.mubr.bf16.gmra.mrb[128].mxu1 %v10120_v40 }
 0x604   : > { %v9458_v2 = vadd.f32 %v5983_v35, %v9307_v47  ;;  %6316 = vmatprep.mubr.bf16.mxu1 %v10121_v7 }
 0x606   : > { %v5984_v17 = vpop.f32.mrb[20].mxu1 }
 0x607   : > { %v5985_v3 = vpop.f32.mrb[21].mxu1 }
 0x608   : > { %v5986_v63 = vadd.f32 %v5985_v3, %v5984_v17  ;;  %v5987_v60 = vpop.f32.mrb[22].mxu1 }
 0x609   : > { %v5988_v9 = vpop.f32.mrb[23].mxu1 }
 0x60a   : > { %v9462_v13 = vadd.f32 %v5986_v63, %v9311_v55  ;;  %v5989_v42 = vadd.f32 %v5988_v9, %v5987_v60 }
 0x60b   : > { %6317 = vmatmul.mubr.bf16.gmra.mrb[132].mxu1 %v8889_v20 }
 0x60c   : > { %v9466_v36 = vadd.f32 %v5989_v42, %v9317_v4  ;;  %6320 = vmatprep.mubr.bf16.mxu1 %v8909_v54 }
 0x60e   : > { %v5990_v47 = vpop.f32.mrb[24].mxu1 }
 0x60f   : > { %v5991_v29 = vpop.f32.mrb[25].mxu1 }
 0x610   : > { %v5992_v51 = vadd.f32 %v5991_v29, %v5990_v47  ;;  %v5993_v30 = vpop.f32.mrb[26].mxu1 }
 0x611   : > { %v5994_v57 = vpop.f32.mrb[27].mxu1 }
 0x612   : > { %v9470_v25 = vadd.f32 %v5992_v51, %v9321_v8  ;;  %v5995_v21 = vadd.f32 %v5994_v57, %v5993_v30 }
 0x613   : > { %6321 = vmatmul.mubr.bf16.gmra.mrb[136].mxu1 %v8927_v58 }
 0x614   : > { %v9474_v55 = vadd.f32 %v5995_v21, %v9327_v48  ;;  %6324 = vmatprep.mubr.bf16.mxu1 %v8966_v23 }
 0x616   : > { %v5996_v20 = vpop.f32.mrb[28].mxu1 }
 0x617   : > { %v5997_v4 = vpop.f32.mrb[29].mxu1 }
 0x618   : > { %v5998_v45 = vadd.f32 %v5997_v4, %v5996_v20  ;;  %v5999_v54 = vpop.f32.mrb[30].mxu1 }
 0x619   : > { %v6000_v1 = vpop.f32.mrb[31].mxu1 }
 0x61a   : > { %v9478_v19 = vadd.f32 %v5998_v45, %v9331_v12  ;;  %v6001_v27 = vadd.f32 %v6000_v1, %v5999_v54 }
 0x61b   : > { %6325 = vmatmul.mubr.bf16.gmra.mrb[140].mxu1 %v10122_v5 }
 0x61c   : > { %v9482_v8 = vadd.f32 %v6001_v27, %v9340_v46 }
 0x61e   : > { %v6002_v58 = vpop.f32.mrb[32].mxu1 }
 0x61f   : > { %v6003_v22 = vpop.f32.mrb[33].mxu1 }
 0x620   : > { %v6004_v48 = vadd.f32 %v6003_v22, %v6002_v58  ;;  %v6005_v16 = vpop.f32.mrb[34].mxu1 }
 0x621   : > { %v6006_v31 = vpop.f32.mrb[35].mxu1 }
 0x622   : > { %v9485_v23 = vadd.f32 %v6004_v48, %v9344_v41  ;;  %v6007_v49 = vadd.f32 %v6006_v31, %v6005_v16 }
 0x624   : > { %v9488_v61 = vadd.f32 %v6007_v49, %v9350_v26 }
 0x626   : > { %v6008_v12 = vpop.f32.mrb[36].mxu1 }
 0x627   : > { %v6009_v35 = vpop.f32.mrb[37].mxu1 }
 0x628   : > { %v6010_v40 = vadd.f32 %v6009_v35, %v6008_v12  ;;  %v6011_v7 = vpop.f32.mrb[38].mxu1 }
 0x629   : > { %v6012_v17 = vpop.f32.mrb[39].mxu1 }
 0x62a   : > { %v9491_v46 = vadd.f32 %v6010_v40, %v9354_v0  ;;  %v6013_v3 = vadd.f32 %v6012_v17, %v6011_v7 }
 0x62c   : > { %v9494_v63 = vadd.f32 %v6013_v3, %v9360_v15 }
 0x62e   : > { %v6014_v60 = vpop.f32.mrb[40].mxu1 }
 0x62f   : > { %v6015_v9 = vpop.f32.mrb[41].mxu1 }
 0x630   : > { %v6016_v41 = vadd.f32 %v6015_v9, %v6014_v60  ;;  %v6017_v42 = vpop.f32.mrb[42].mxu1 }
 0x631   : > { %v6018_v47 = vpop.f32.mrb[43].mxu1 }
 0x632   : > { %v9497_v26 = vadd.f32 %v6016_v41, %v9364_v32  ;;  %v6019_v29 = vadd.f32 %v6018_v47, %v6017_v42 }
 0x634   : > { %v9500_v51 = vadd.f32 %v6019_v29, %v9370_v62 }
 0x636   : > { %v6036_v30 = vpop.f32.mrb[44].mxu1 }
 0x637   : > { %v6037_v57 = vpop.f32.mrb[45].mxu1 }
 0x638   : > { %v6038_v0 = vadd.f32 %v6037_v57, %v6036_v30  ;;  %v6039_v21 = vpop.f32.mrb[46].mxu1 }
 0x639   : > { %v6040_v20 = vpop.f32.mrb[47].mxu1 }
 0x63a   : > { %v6041_v4 = vadd.f32 %v6040_v20, %v6039_v21  ;;  %v9503_v15 = vadd.f32 %v6038_v0, %v9374_v33 }
 0x63c   : > { %v9506_v45 = vadd.f32 %v6041_v4, %v9380_v44 }
 0x63e   : > { %v6042_v54 = vpop.f32.mrb[48].mxu1 }
 0x63f   : > { %v6043_v1 = vpop.f32.mrb[49].mxu1 }
 0x640   : > { %v6044_v32 = vadd.f32 %v6043_v1, %v6042_v54  ;;  %v6045_v27 = vpop.f32.mrb[50].mxu1 }
 0x641   : > { %v6046_v5 = vpop.f32.mrb[51].mxu1 }
 0x642   : > { %v6047_v58 = vadd.f32 %v6046_v5, %v6045_v27  ;;  %v9509_v62 = vadd.f32 %v6044_v32, %v9384_v52 }
 0x644   : > { %v9512_v22 = vadd.f32 %v6047_v58, %v9390_v39 }
 0x646   : > { %v6048_v48 = vpop.f32.mrb[52].mxu1 }
 0x647   : > { %v6049_v16 = vpop.f32.mrb[53].mxu1 }
 0x648   : > { %v6050_v31 = vadd.f32 %v6049_v16, %v6048_v48  ;;  %v6051_v33 = vpop.f32.mrb[54].mxu1 }
 0x649   : > { %v6052_v49 = vpop.f32.mrb[55].mxu1 }
 0x64a   : > { %v6053_v12 = vadd.f32 %v6052_v49, %v6051_v33  ;;  %v9515_v44 = vadd.f32 %v6050_v31, %v9394_v14 }
 0x64c   : > { %v9518_v35 = vadd.f32 %v6053_v12, %v9400_v59 }
 0x64e   : > { %v6054_v40 = vpop.f32.mrb[56].mxu1 }
 0x64f   : > { %v6055_v7 = vpop.f32.mrb[57].mxu1 }
 0x650   : > { %v6056_v17 = vadd.f32 %v6055_v7, %v6054_v40  ;;  %v6057_v52 = vpop.f32.mrb[58].mxu1 }
 0x651   : > { %v6058_v3 = vpop.f32.mrb[59].mxu1 }
 0x652   : > { %v6059_v60 = vadd.f32 %v6058_v3, %v6057_v52  ;;  %v9521_v39 = vadd.f32 %v6056_v17, %v9404_v34 }
 0x654   : > { %v9524_v9 = vadd.f32 %v6059_v60, %v9410_v6 }
 0x656   : > { %v6060_v41 = vpop.f32.mrb[60].mxu1 }
 0x657   : > { %v6061_v42 = vpop.f32.mrb[61].mxu1 }
 0x658   : > { %v6062_v47 = vadd.f32 %v6061_v42, %v6060_v41  ;;  %v6063_v14 = vpop.f32.mrb[62].mxu1 }
 0x659   : > { %v6064_v29 = vpop.f32.mrb[63].mxu1 }
 0x65a   : > { %v6065_v30 = vadd.f32 %v6064_v29, %v6063_v14  ;;  %v9527_v59 = vadd.f32 %v6062_v47, %v9414_v11 }
 0x65c   : > { %v9530_v57 = vadd.f32 %v6065_v30, %v9418_v24 }
 0x65e   : > { %v6066_v0 = vpop.f32.mrb[64].mxu1 }
 0x65f   : > { %v6067_v21 = vpop.f32.mrb[65].mxu1 }
 0x660   : > { %v6068_v20 = vadd.f32 %v6067_v21, %v6066_v0  ;;  %v6069_v34 = vpop.f32.mrb[66].mxu1 }
 0x661   : > { %v6070_v4 = vpop.f32.mrb[67].mxu1 }
 0x662   : > { %v6071_v54 = vadd.f32 %v6070_v4, %v6069_v34  ;;  %v9533_v6 = vadd.f32 %v6068_v20, %v9422_v43 }
 0x664   : > { %v9536_v1 = vadd.f32 %v6071_v54, %v9426_v38  ;;  %v3172_v7 = vpop.f32.mrb[124].mxu0 }
 0x665   : > { %v6278_v17 = vpop.f32.mrb[125].mxu0 }
 0x666   : > { %v6072_v32 = vpop.f32.mrb[68].mxu1  ;;  %v3175_v3 = vpop.f32.mrb[126].mxu0 }
 0x667   : > { %v6073_v27 = vpop.f32.mrb[69].mxu1 }
 0x668   : > { %v6074_v5 = vadd.f32 %v6073_v27, %v6072_v32  ;;  %v6075_v11 = vpop.f32.mrb[70].mxu1 }
 0x669   : > { %v6076_v58 = vpop.f32.mrb[71].mxu1 }
 0x66a   : > { %v6077_v48 = vadd.f32 %v6076_v58, %v6075_v11  ;;  %v9539_v24 = vadd.f32 %v6074_v5, %v9430_v37  ;;  %v6279_v37 = vpop.f32.mrb[127].mxu0 }
 0x66c   : > { %v9542_v16 = vadd.f32 %v6077_v48, %v9434_v10 }
 0x66e   : > { %v6078_v31 = vpop.f32.mrb[72].mxu1 }
 0x66f   : > { %v6079_v33 = vpop.f32.mrb[73].mxu1 }
 0x670   : > { %v6080_v49 = vadd.f32 %v6079_v33, %v6078_v31  ;;  %v6081_v43 = vpop.f32.mrb[74].mxu1 }
 0x671   : > { %v6082_v12 = vpop.f32.mrb[75].mxu1 }
 0x672   : > { %v6083_v40 = vadd.f32 %v6082_v12, %v6081_v43  ;;  %v9545_v38 = vadd.f32 %v6080_v49, %v9438_v50 }
 0x674   : > { %v9548_v52 = vadd.f32 %v6083_v40, %v9442_v28 }
 0x676   : > { %v6084_v60 = vpop.f32.mrb[76].mxu1 }
 0x677   : > { %v6085_v41 = vpop.f32.mrb[77].mxu1 }
 0x678   : > { %v6086_v10 = vadd.f32 %v6085_v41, %v6084_v60  ;;  %v6087_v42 = vpop.f32.mrb[78].mxu1 }
 0x679   : > { %v6088_v47 = vpop.f32.mrb[79].mxu1 }
 0x67a   : > { %v6089_v14 = vadd.f32 %v6088_v47, %v6087_v42  ;;  %v9551_v29 = vadd.f32 %v6086_v10, %v9446_v53 }
 0x67c   : > { %v9554_v30 = vadd.f32 %v6089_v14, %v9450_v56 }
 0x67e   : > { %v6090_v50 = vpop.f32.mrb[80].mxu1 }
 0x67f   : > { %v6091_v0 = vpop.f32.mrb[81].mxu1 }
 0x680   : > { %v6092_v21 = vadd.f32 %v6091_v0, %v6090_v50  ;;  %v6093_v20 = vpop.f32.mrb[82].mxu1 }
 0x681   : > { %v6094_v28 = vpop.f32.mrb[83].mxu1 }
 0x682   : > { %v6095_v34 = vadd.f32 %v6094_v28, %v6093_v20  ;;  %v9557_v4 = vadd.f32 %v6092_v21, %v9454_v18 }
 0x684   : > { %v9560_v54 = vadd.f32 %v6095_v34, %v9458_v2 }
 0x686   : > { %v6096_v32 = vpop.f32.mrb[84].mxu1 }
 0x687   : > { %v6097_v27 = vpop.f32.mrb[85].mxu1 }
 0x688   : > { %v6098_v5 = vadd.f32 %v6097_v27, %v6096_v32  ;;  %v6099_v53 = vpop.f32.mrb[86].mxu1 }
 0x689   : > { %v6100_v11 = vpop.f32.mrb[87].mxu1 }
 0x68a   : > { %v6101_v58 = vadd.f32 %v6100_v11, %v6099_v53  ;;  %v9563_v56 = vadd.f32 %v6098_v5, %v9462_v13 }
 0x68c   : > { %v9566_v48 = vadd.f32 %v6101_v58, %v9466_v36 }
 0x68e   : > { %v6102_v31 = vpop.f32.mrb[88].mxu1 }
 0x68f   : > { %v6103_v33 = vpop.f32.mrb[89].mxu1 }
 0x690   : > { %v6104_v49 = vadd.f32 %v6103_v33, %v6102_v31  ;;  %v6105_v18 = vpop.f32.mrb[90].mxu1  ;;  %v6931_v31 = vld [vmem:[%s7145_s11 + $0x60] sm:$0xff] }
 0x691   : > { %v6106_v43 = vpop.f32.mrb[91].mxu1  ;;  %v5032_v33 = vrot.slane %v6931_v31, 2 }
 0x692   : > { %v6107_v12 = vadd.f32 %v6106_v43, %v6105_v18  ;;  %v9569_v2 = vadd.f32 %v6104_v49, %v9470_v25  ;;  %v6932_v49 = vld [vmem:[%s7145_s11 + $0x68] sm:$0xff] }
 0x693   : > { %v5033_v18 = vrot.slane %v6932_v49, 2  ;;  %v6942_v49 = vld [vmem:[%s7145_s11 + $0x90] sm:$0xff] }
 0x694   : > { %v9572_v40 = vadd.f32 %v6107_v12, %v9474_v55  ;;  %v6934_v12 = vld [vmem:[%s7145_s11 + $0x48] sm:$0xff] }
 0x696   : > { %v6108_v7 = vpop.f32.mrb[108].mxu1 }
 0x697   : > { %v6109_v17 = vpop.f32.mrb[109].mxu1 }
 0x698   : > { %v6110_v3 = vadd.f32 %v6109_v17, %v6108_v7  ;;  %v6111_v13 = vpop.f32.mrb[110].mxu1  ;;  %v5028_v7 = vrot.slane %v6934_v12, 2  ;;  %v6935_v17 = vld [vmem:[%s7145_s11 + $0x70] sm:$0xff] }
 0x699   : > { %v6112_v37 = vpop.f32.mrb[111].mxu1 }
 0x69a   : > { %v6113_v60 = vadd.f32 %v6112_v37, %v6111_v13  ;;  %v9575_v36 = vadd.f32 %v6110_v3, %v9478_v19  ;;  %v5035_v3 = vrot.slane %v6935_v17, 2  ;;  %v6936_v37 = vld [vmem:[%s7145_s11 + $0x50] sm:$0xff] }
 0x69c   : > { %v9578_v41 = vadd.f32 %v6113_v60, %v9482_v8  ;;  %v5030_v60 = vrot.slane %v6936_v37, 2 }
 0x69e   : > { %v6114_v10 = vpop.f32.mrb[92].mxu1 }
 0x69f   : > { %v6115_v42 = vpop.f32.mrb[93].mxu1 }
 0x6a0   : > { %v6116_v47 = vadd.f32 %v6115_v42, %v6114_v10  ;;  %v6117_v25 = vpop.f32.mrb[94].mxu1 }
 0x6a1   : > { %v6118_v14 = vpop.f32.mrb[95].mxu1 }
 0x6a2   : > { %v6119_v50 = vadd.f32 %v6118_v14, %v6117_v25  ;;  %v9581_v55 = vadd.f32 %v6116_v47, %v9485_v23 }
 0x6a4   : > { %v9584_v0 = vadd.f32 %v6119_v50, %v9488_v61 }
 0x6a6   : > { %v6120_v21 = vpop.f32.mrb[96].mxu1 }
 0x6a7   : > { %v6121_v19 = vpop.f32.mrb[97].mxu1 }
 0x6a8   : > { %v6122_v20 = vadd.f32 %v6121_v19, %v6120_v21  ;;  %v6123_v8 = vpop.f32.mrb[98].mxu1 }
 0x6a9   : > { %v6124_v28 = vpop.f32.mrb[99].mxu1 }
 0x6aa   : > { %v6125_v34 = vadd.f32 %v6124_v28, %v6123_v8  ;;  %v9587_v32 = vadd.f32 %v6122_v20, %v9491_v46  ;;  %v5031_v8 = vsel %vm5026_vm7, %v5028_v7, %v5030_v60 }
 0x6ac   : > { %v9590_v27 = vadd.f32 %v6125_v34, %v9494_v63  ;;  %v6933_v63 = vld [vmem:[%s7145_s11 + $0x40] sm:$0xff] }
 0x6ad   : > { %v5027_v43 = vrot.slane %v6933_v63, 2  ;;  %v6937_v34 = vld [vmem:[%s7145_s11 + $0xa0] sm:$0xff] }
 0x6ae   : > { %v6126_v23 = vpop.f32.mrb[100].mxu1 }
 0x6af   : > { %v6127_v5 = vpop.f32.mrb[101].mxu1  ;;  %v5029_v25 = vsel %vm5026_vm7, %v5027_v43, %v5028_v7 }
 0x6b0   : > { %v6128_v61 = vadd.f32 %v6127_v5, %v6126_v23  ;;  %v6129_v53 = vpop.f32.mrb[102].mxu1  ;;  %v5042_v23 = vrot.slane %v6937_v34, 2  ;;  %v6938_v5 = vld [vmem:[%s7145_s11 + $0xa8] sm:$0xff] }
 0x6b1   : > { %v6130_v11 = vpop.f32.mrb[103].mxu1 }
 0x6b2   : > { %v6131_v58 = vadd.f32 %v6130_v11, %v6129_v53  ;;  %v9596_v46 = vadd.f32 %v6128_v61, %v9497_v26  ;;  %v5034_v26 = vsel %vm5026_vm7, %v5032_v33, %v5033_v18  ;;  %v6939_v61 = vld [vmem:[%s7145_s11 + $0x80] sm:$0xff]  ;;  %v6940_v11 = vld [vmem:[%s7145_s11 + $0x88] sm:$0xff] }
 0x6b3   : > { %v5037_v53 = vrot.slane %v6939_v61, 2 }
 0x6b4   : > { %v9602_v13 = vadd.f32 %v6131_v58, %v9500_v51  ;;  %v5036_v51 = vsel %vm5026_vm7, %v5033_v18, %v5035_v3  ;;  %v5038_v58 = vrot.slane %v6940_v11, 2  ;;  %v5040_v18 = vrot.slane %v6942_v49, 2 }
 0x6b6   : > { %v6298_v10 = vpop.f32.mrb[112].mxu1  ;;  %v5039_v17 = vsel %vm5026_vm7, %v5037_v53, %v5038_v58 }
 0x6b7   : > { %v4860_v42 = vadd.f32 %v6298_v10, %v9509_v62  ;;  %v4851_v47 = vpop.f32.mrb[113].mxu1 }
 0x6b8   : > { %v4852_v14 = vadd.f32 %v4851_v47, %v9503_v15  ;;  %v6299_v50 = vpop.f32.mrb[114].mxu1  ;;  %v5043_v15 = vrot.slane %v6938_v5, 2  ;;  %v5041_v47 = vsel %vm5026_vm7, %v5038_v58, %v5040_v18 }
 0x6b9   : > { %v5141_v21 = vadd.f32 %v5034_v26, %v4860_v42  ;;  %v4863_v19 = vadd.f32 %v6299_v50, %v9512_v22  ;;  %v4854_v20 = vpop.f32.mrb[115].mxu1 }
 0x6ba   : > { %v5139_v28 = vadd.f32 %v5029_v25, %v4852_v14  ;;  %v4855_v62 = vadd.f32 %v4854_v20, %v9506_v45  ;;  %v6941_v45 = vld [vmem:[%s7145_s11 + $0xb0] sm:$0xff]  ;;  %v5044_v43 = vsel %vm5026_vm7, %v5042_v23, %v5043_v15  ;;  %v6943_v14 = vld [vmem:[%s7145_s11 + $0xe0] sm:$0xff] }
 0x6bb   : > { %5173 = vst [vmem:[%s9617_s27 + $0x10] sm:$0xff] %v5141_v21  ;;  %v5142_v22 = vadd.f32 %v5036_v51, %v4863_v19  ;;  %v5045_v33 = vrot.slane %v6941_v45, 2  ;;  %v5052_v50 = vrot.slane %v6943_v14, 2  ;;  %v6945_v19 = vld [vmem:[%s7145_s11 + $0xc0] sm:$0xff]  ;;  %v6948_v23 = vld [vmem:[%s7145_s11 + $0xd0] sm:$0xff] }
 0x6bc   : > { %5171 = vst [vmem:[%s9617_s27] sm:$0xff] %v5139_v28  ;;  %v5140_v31 = vadd.f32 %v5031_v8, %v4855_v62  ;;  %v5047_v20 = vrot.slane %v6945_v19, 2  ;;  %v6946_v8 = vld [vmem:[%s7145_s11 + $0xc8] sm:$0xff]  ;;  %v6947_v62 = vld [vmem:[%s7145_s11 + $0xf0] sm:$0xff]  ;;  %v5050_v5 = vrot.slane %v6948_v23, 2 }
 0x6bd   : > { %5174 = vst [vmem:[%s9617_s27 + $0x18] sm:$0xff] %v5142_v22  ;;  %v5046_v60 = vsel %vm5026_vm7, %v5043_v15, %v5045_v33  ;;  %v5055_v34 = vrot.slane %v6947_v62, 2 }
 0x6be   : > { %5172 = vst [vmem:[%s9617_s27 + $0x8] sm:$0xff] %v5140_v31  ;;  %v6302_v63 = vpop.f32.mrb[116].mxu1 }
 0x6bf   : > { %v4876_v12 = vadd.f32 %v6302_v63, %v9521_v39  ;;  %v4867_v7 = vpop.f32.mrb[117].mxu1 }
 0x6c0   : > { %v4868_v3 = vadd.f32 %v4867_v7, %v9515_v44  ;;  %v6303_v37 = vpop.f32.mrb[118].mxu1  ;;  %v6944_v44 = vld [vmem:[%s7145_s11 + $0xe8] sm:$0xff] }
 0x6c1   : > { %v5145_v10 = vadd.f32 %v5044_v43, %v4876_v12  ;;  %v4879_v26 = vadd.f32 %v6303_v37, %v9524_v9  ;;  %v4870_v42 = vpop.f32.mrb[119].mxu1  ;;  %v5053_v51 = vrot.slane %v6944_v44, 2  ;;  %v5048_v9 = vrot.slane %v6946_v8, 2  ;;  %v6949_v43 = vld [vmem:[%s7145_s11 + $0x120] sm:$0xff] }
 0x6c2   : > { %v5143_v39 = vadd.f32 %v5039_v17, %v4868_v3  ;;  %v4871_v25 = vadd.f32 %v4870_v42, %v9518_v35  ;;  %v5062_v12 = vrot.slane %v6949_v43, 2  ;;  %v6951_v3 = vld [vmem:[%s7145_s11 + $0x100] sm:$0xff] }
 0x6c3   : > { %5177 = vst [vmem:[%s9617_s27 + $0x30] sm:$0xff] %v5145_v10  ;;  %v5146_v21 = vadd.f32 %v5046_v60, %v4879_v26  ;;  %v5054_v15 = vsel %vm5026_vm7, %v5052_v50, %v5053_v51  ;;  %v5049_v53 = vsel %vm5026_vm7, %v5047_v20, %v5048_v9  ;;  %v5056_v31 = vsel %vm5026_vm7, %v5053_v51, %v5055_v34  ;;  %v6952_v60 = vld [vmem:[%s7145_s11 + $0x108] sm:$0xff]  ;;  %v6953_v26 = vld [vmem:[%s7145_s11 + $0x130] sm:$0xff]  ;;  %v6955_v34 = vld [vmem:[%s7145_s11 + $0x160] sm:$0xff] }
 0x6c4   : > { %5175 = vst [vmem:[%s9617_s27 + $0x20] sm:$0xff] %v5143_v39  ;;  %v5144_v28 = vadd.f32 %v5041_v47, %v4871_v25  ;;  %v5051_v18 = vsel %vm5026_vm7, %v5048_v9, %v5050_v5  ;;  %v5057_v37 = vrot.slane %v6951_v3, 2  ;;  %v5065_v42 = vrot.slane %v6953_v26, 2  ;;  %v6954_v47 = vld [vmem:[%s7145_s11 + $0x110] sm:$0xff] }
 0x6c5   : > { %5178 = vst [vmem:[%s9617_s27 + $0x38] sm:$0xff] %v5146_v21  ;;  %v5060_v39 = vrot.slane %v6954_v47, 2  ;;  %v5072_v23 = vrot.slane %v6955_v34, 2 }
 0x6c6   : > { %5176 = vst [vmem:[%s9617_s27 + $0x28] sm:$0xff] %v5144_v28  ;;  %v6306_v35 = vpop.f32.mrb[120].mxu1 }
 0x6c7   : > { %v4892_v22 = vadd.f32 %v6306_v35, %v9533_v6  ;;  %v4883_v61 = vpop.f32.mrb[121].mxu1 }
 0x6c8   : > { %v4884_v11 = vadd.f32 %v4883_v61, %v9527_v59  ;;  %v6307_v58 = vpop.f32.mrb[122].mxu1  ;;  %v6950_v59 = vld [vmem:[%s7145_s11 + $0x128] sm:$0xff] }
 0x6c9   : > { %v5149_v45 = vadd.f32 %v5054_v15, %v4892_v22  ;;  %v4895_v33 = vadd.f32 %v6307_v58, %v9536_v1  ;;  %v4886_v49 = vpop.f32.mrb[123].mxu1  ;;  %v5063_v7 = vrot.slane %v6950_v59, 2  ;;  %v5058_v1 = vrot.slane %v6952_v60, 2  ;;  %v6957_v15 = vld [vmem:[%s7145_s11 + $0x140] sm:$0xff]  ;;  %v6958_v61 = vld [vmem:[%s7145_s11 + $0x148] sm:$0xff] }
 0x6ca   : > { %v5147_v6 = vadd.f32 %v5049_v53, %v4884_v11  ;;  %v4887_v63 = vadd.f32 %v4886_v49, %v9530_v57  ;;  %v5067_v22 = vrot.slane %v6957_v15, 2  ;;  %v6959_v11 = vld [vmem:[%s7145_s11 + $0x170] sm:$0xff]  ;;  %v6961_v60 = vld [vmem:[%s7145_s11 + $0x1a0] sm:$0xff] }
 0x6cb   : > { %5181 = vst [vmem:[%s9617_s27 + $0x50] sm:$0xff] %v5149_v45  ;;  %v5150_v17 = vadd.f32 %v5056_v31, %v4895_v33  ;;  %v5064_v25 = vsel %vm5026_vm7, %v5062_v12, %v5063_v7  ;;  %v5059_v44 = vsel %vm5026_vm7, %v5057_v37, %v5058_v1  ;;  %v5066_v19 = vsel %vm5026_vm7, %v5063_v7, %v5065_v42  ;;  %v6960_v31 = vld [vmem:[%s7145_s11 + $0x150] sm:$0xff]  ;;  %v6963_v42 = vld [vmem:[%s7145_s11 + $0x180] sm:$0xff] }
 0x6cc   : > { %5179 = vst [vmem:[%s9617_s27 + $0x40] sm:$0xff] %v5147_v6  ;;  %v5148_v10 = vadd.f32 %v5051_v18, %v4887_v63  ;;  %v5061_v28 = vsel %vm5026_vm7, %v5058_v1, %v5060_v39  ;;  %v5075_v58 = vrot.slane %v6959_v11, 2  ;;  %v5070_v45 = vrot.slane %v6960_v31, 2  ;;  %v6964_v39 = vld [vmem:[%s7145_s11 + $0x188] sm:$0xff] }
 0x6cd   : > { %5182 = vst [vmem:[%s9617_s27 + $0x58] sm:$0xff] %v5150_v17  ;;  %v5082_v1 = vrot.slane %v6961_v60, 2  ;;  %v5077_v47 = vrot.slane %v6963_v42, 2  ;;  %v6976_v42 = vld [vmem:[%s7145_s11 + $0x208] sm:$0xff] }
 0x6ce   : > { %5180 = vst [vmem:[%s9617_s27 + $0x48] sm:$0xff] %v5148_v10  ;;  %v6310_v57 = vpop.f32.mrb[124].mxu1 }
 0x6cf   : > { %v4908_v14 = vadd.f32 %v6310_v57, %v9545_v38  ;;  %v4899_v50 = vpop.f32.mrb[125].mxu1 }
 0x6d0   : > { %v4900_v51 = vadd.f32 %v4899_v50, %v9539_v24  ;;  %v6311_v21 = vpop.f32.mrb[126].mxu1  ;;  %v6956_v24 = vld [vmem:[%s7145_s11 + $0x168] sm:$0xff]  ;;  %v6966_v50 = vld [vmem:[%s7145_s11 + $0x190] sm:$0xff] }
 0x6d1   : > { %v5153_v20 = vadd.f32 %v5064_v25, %v4908_v14  ;;  %v4911_v8 = vadd.f32 %v6311_v21, %v9548_v52  ;;  %v4902_v9 = vpop.f32.mrb[127].mxu1  ;;  %v5073_v5 = vrot.slane %v6956_v24, 2  ;;  %v5068_v52 = vrot.slane %v6958_v61, 2  ;;  %v6965_v25 = vld [vmem:[%s7145_s11 + $0x1b0] sm:$0xff]  ;;  %v6969_v61 = vld [vmem:[%s7145_s11 + $0x1c0] sm:$0xff] }
 0x6d2   : > { %v5151_v38 = vadd.f32 %v5059_v44, %v4900_v51  ;;  %v4903_v62 = vadd.f32 %v4902_v9, %v9542_v16  ;;  %v5085_v14 = vrot.slane %v6965_v25, 2  ;;  %v5080_v44 = vrot.slane %v6966_v50, 2 }
 0x6d3   : > { %5185 = vst [vmem:[%s9617_s27 + $0x70] sm:$0xff] %v5153_v20  ;;  %v5154_v35 = vadd.f32 %v5066_v19, %v4911_v8  ;;  %v5074_v33 = vsel %vm5026_vm7, %v5072_v23, %v5073_v5  ;;  %v5069_v6 = vsel %vm5026_vm7, %v5067_v22, %v5068_v52  ;;  %v5076_v12 = vsel %vm5026_vm7, %v5073_v5, %v5075_v58  ;;  %v6967_v5 = vld [vmem:[%s7145_s11 + $0x1e0] sm:$0xff]  ;;  %v6971_v58 = vld [vmem:[%s7145_s11 + $0x1f0] sm:$0xff] }
 0x6d4   : > { %5183 = vst [vmem:[%s9617_s27 + $0x60] sm:$0xff] %v5151_v38  ;;  %v5152_v53 = vadd.f32 %v5061_v28, %v4903_v62  ;;  %v5071_v3 = vsel %vm5026_vm7, %v5068_v52, %v5070_v45  ;;  %v5087_v52 = vrot.slane %v6969_v61, 2  ;;  %v5095_v31 = vrot.slane %v6971_v58, 2  ;;  %v6972_v45 = vld [vmem:[%s7145_s11 + $0x1d0] sm:$0xff] }
 0x6d5   : > { %5186 = vst [vmem:[%s9617_s27 + $0x78] sm:$0xff] %v5154_v35  ;;  %v5092_v35 = vrot.slane %v6967_v5, 2 }
 0x6d6   : > { %5184 = vst [vmem:[%s9617_s27 + $0x68] sm:$0xff] %v5152_v53  ;;  %v6314_v16 = vpop.f32.mrb[128].mxu1  ;;  %v6970_v53 = vld [vmem:[%s7145_s11 + $0x1c8] sm:$0xff] }
 0x6d7   : > { %v4924_v49 = vadd.f32 %v6314_v16, %v9557_v4  ;;  %v4915_v18 = vpop.f32.mrb[129].mxu1  ;;  %v5090_v16 = vrot.slane %v6972_v45, 2 }
 0x6d8   : > { %v4916_v63 = vadd.f32 %v4915_v18, %v9551_v29  ;;  %v6315_v43 = vpop.f32.mrb[130].mxu1  ;;  %v6962_v29 = vld [vmem:[%s7145_s11 + $0x1a8] sm:$0xff] }
 0x6d9   : > { %v5157_v59 = vadd.f32 %v5074_v33, %v4924_v49  ;;  %v4927_v7 = vadd.f32 %v6315_v43, %v9560_v54  ;;  %v4918_v17 = vpop.f32.mrb[131].mxu1  ;;  %v5083_v10 = vrot.slane %v6962_v29, 2  ;;  %v5078_v54 = vrot.slane %v6964_v39, 2  ;;  %v6977_v39 = vld [vmem:[%s7145_s11 + $0x230] sm:$0xff] }
 0x6da   : > { %v5155_v4 = vadd.f32 %v5069_v6, %v4916_v63  ;;  %v4919_v37 = vadd.f32 %v4918_v17, %v9554_v30 }
 0x6db   : > { %5189 = vst [vmem:[%s9617_s27 + $0x90] sm:$0xff] %v5157_v59  ;;  %v5158_v26 = vadd.f32 %v5076_v12, %v4927_v7  ;;  %v5084_v51 = vsel %vm5026_vm7, %v5082_v1, %v5083_v10  ;;  %v5079_v20 = vsel %vm5026_vm7, %v5077_v47, %v5078_v54  ;;  %v5086_v28 = vsel %vm5026_vm7, %v5083_v10, %v5085_v14  ;;  %v6975_v10 = vld [vmem:[%s7145_s11 + $0x200] sm:$0xff] }
 0x6dc   : > { %5187 = vst [vmem:[%s9617_s27 + $0x80] sm:$0xff] %v5155_v4  ;;  %v5156_v57 = vadd.f32 %v5071_v3, %v4919_v37  ;;  %v5081_v23 = vsel %vm5026_vm7, %v5078_v54, %v5080_v44  ;;  %v6973_v37 = vld [vmem:[%s7145_s11 + $0x220] sm:$0xff]  ;;  %v5105_v54 = vrot.slane %v6977_v39, 2 }
 0x6dd   : > { %5190 = vst [vmem:[%s9617_s27 + $0x98] sm:$0xff] %v5158_v26  ;;  %v5102_v60 = vrot.slane %v6973_v37, 2  ;;  %v5097_v26 = vrot.slane %v6975_v10, 2 }
 0x6de   : > { %5188 = vst [vmem:[%s9617_s27 + $0x88] sm:$0xff] %v5156_v57  ;;  %v6318_v30 = vpop.f32.mrb[132].mxu1 }
 0x6df   : > { %v4940_v21 = vadd.f32 %v6318_v30, %v9569_v2  ;;  %v4931_v19 = vpop.f32.mrb[133].mxu1 }
 0x6e0   : > { %v4932_v8 = vadd.f32 %v4931_v19, %v9563_v56  ;;  %v6319_v9 = vpop.f32.mrb[134].mxu1  ;;  %v6968_v56 = vld [vmem:[%s7145_s11 + $0x1e8] sm:$0xff] }
 0x6e1   : > { %v5161_v38 = vadd.f32 %v5084_v51, %v4940_v21  ;;  %v4943_v62 = vadd.f32 %v6319_v9, %v9572_v40  ;;  %v4934_v34 = vpop.f32.mrb[135].mxu1  ;;  %v5093_v15 = vrot.slane %v6968_v56, 2  ;;  %v5088_v40 = vrot.slane %v6970_v53, 2 }
 0x6e2   : > { %v5159_v2 = vadd.f32 %v5079_v20, %v4932_v8  ;;  %v4935_v24 = vadd.f32 %v4934_v34, %v9566_v48 }
 0x6e3   : > { %5193 = vst [vmem:[%s9617_s27 + $0xb0] sm:$0xff] %v5161_v38  ;;  %v5162_v22 = vadd.f32 %v5086_v28, %v4943_v62  ;;  %v5094_v33 = vsel %vm5026_vm7, %v5092_v35, %v5093_v15  ;;  %v5089_v6 = vsel %vm5026_vm7, %v5087_v52, %v5088_v40  ;;  %v5096_v12 = vsel %vm5026_vm7, %v5093_v15, %v5095_v31 }
 0x6e4   : > { %5191 = vst [vmem:[%s9617_s27 + $0xa0] sm:$0xff] %v5159_v2  ;;  %v5160_v11 = vadd.f32 %v5081_v23, %v4935_v24  ;;  %v5091_v3 = vsel %vm5026_vm7, %v5088_v40, %v5090_v16 }
 0x6e5   : > { %5194 = vst [vmem:[%s9617_s27 + $0xb8] sm:$0xff] %v5162_v22 }
 0x6e6   : > { %5192 = vst [vmem:[%s9617_s27 + $0xa8] sm:$0xff] %v5160_v11  ;;  %v6322_v48 = vpop.f32.mrb[136].mxu1 }
 0x6e7   : > { %v4956_v49 = vadd.f32 %v6322_v48, %v9581_v55  ;;  %v4947_v18 = vpop.f32.mrb[137].mxu1 }
 0x6e8   : > { %v4948_v63 = vadd.f32 %v4947_v18, %v9575_v36  ;;  %v6323_v43 = vpop.f32.mrb[138].mxu1  ;;  %v6974_v36 = vld [vmem:[%s7145_s11 + $0x228] sm:$0xff] }
 0x6e9   : > { %v5165_v59 = vadd.f32 %v5094_v33, %v4956_v49  ;;  %v4959_v7 = vadd.f32 %v6323_v43, %v9584_v0  ;;  %v4950_v17 = vpop.f32.mrb[139].mxu1  ;;  %v5103_v1 = vrot.slane %v6974_v36, 2  ;;  %v5098_v0 = vrot.slane %v6976_v42, 2 }
 0x6ea   : > { %v5163_v55 = vadd.f32 %v5089_v6, %v4948_v63  ;;  %v4951_v4 = vadd.f32 %v4950_v17, %v9578_v41  ;;  %v6978_v41 = vld [vmem:[%s7145_s11 + $0x210] sm:$0xff]  ;;  %s5648_s11 = sshll.u32 %s7092_s16, 12  ;;  %s9758_s16 = scalar_lea.sflag [#allocation3], %s161_s25 }
 0x6eb   : > { %5197 = vst [vmem:[%s9617_s27 + $0xd0] sm:$0xff] %v5165_v59  ;;  %v5166_v29 = vadd.f32 %v5096_v12, %v4959_v7  ;;  %v5100_v57 = vrot.slane %v6978_v41, 2  ;;  %v5104_v14 = vsel %vm5026_vm7, %v5102_v60, %v5103_v1  ;;  %v5099_v30 = vsel %vm5026_vm7, %v5097_v26, %v5098_v0  ;;  %s9749_s4 = scalar_lea.hbm %s9802_s3, %s5648_s11 }
 0x6ec   : > { %5195 = vst [vmem:[%s9617_s27 + $0xc0] sm:$0xff] %v5163_v55  ;;  %v5164_v47 = vadd.f32 %v5091_v3, %v4951_v4  ;;  %v5106_v19 = vsel %vm5026_vm7, %v5103_v1, %v5105_v54 }
 0x6ed   : > { %5198 = vst [vmem:[%s9617_s27 + $0xd8] sm:$0xff] %v5166_v29 }
 0x6ee   : > { %5196 = vst [vmem:[%s9617_s27 + $0xc8] sm:$0xff] %v5164_v47  ;;  %v6326_v25 = vpop.f32.mrb[140].mxu1 }
 0x6ef   : > { %v4972_v50 = vadd.f32 %v6326_v25, %v9596_v46  ;;  %v4963_v44 = vpop.f32.mrb[141].mxu1  ;;  %v5101_v46 = vsel %vm5026_vm7, %v5098_v0, %v5100_v57 }
 0x6f0   : > { %v4964_v51 = vadd.f32 %v4963_v44, %v9587_v32  ;;  %v6327_v21 = vpop.f32.mrb[142].mxu1 }
 0x6f1   : > { %v5169_v20 = vadd.f32 %v5104_v14, %v4972_v50  ;;  %v4975_v8 = vadd.f32 %v6327_v21, %v9602_v13  ;;  %v4966_v9 = vpop.f32.mrb[143].mxu1 }
 0x6f2   : > { %v5167_v28 = vadd.f32 %v5099_v30, %v4964_v51  ;;  %v4967_v38 = vadd.f32 %v4966_v9, %v9590_v27 }
 0x6f3   : > { %5201 = vst [vmem:[%s9617_s27 + $0xf0] sm:$0xff] %v5169_v20  ;;  %v5170_v32 = vadd.f32 %v5106_v19, %v4975_v8 }
 0x6f4   : > { %5199 = vst [vmem:[%s9617_s27 + $0xe0] sm:$0xff] %v5167_v28  ;;  %v5168_v13 = vadd.f32 %v5101_v46, %v4967_v38 }
 0x6f5   : > { %5202 = vst [vmem:[%s9617_s27 + $0xf8] sm:$0xff] %v5170_v32 }
 0x6f6   : > { %5200 = vst [vmem:[%s9617_s27 + $0xe8] sm:$0xff] %v5168_v13 }
 0x6f7   : > { %6992 = shalt.err (!%p6989_p3)
}
 0x6f8   : > { %s6993_s9 = scalar_lea.hbm %s9749_s4, 4096  ;;  %s6997_s19 = scalar_lea.hbm %s9802_s3, 8192 }
 0x6f9   : > { %p6994_p4 = scmp.ne.s32.totalorder %s9749_s4, %s6993_s9  ;;  %p6998_p9 = scmp.lt.u32.totalorder %s9749_s4, %s9802_s3 }
 0x6fa   : > { %p6999_p10 = scmp.lt.u32.totalorder %s6997_s19, %s6993_s9  ;;  %p7001_p12 = scmp.lt.u32.totalorder %s6993_s9, %s9749_s4 }
 0x6fb   : > { %p6995_p7 = pnand %p6994_p4, %p7109_p5 }
 0x6fc   : > { %p7000_p11 = por %p6999_p10, %p6998_p9 }
 0x6fd   : > { %p6996_p8 = pneg %p6995_p7 }
 0x6fe   : > { %p7002_p13 = por %p7001_p12, %p7000_p11 }
 0x700   : > { %p7003_p0 = pnand %p7002_p13, %p6996_p8 }
 0x702   : > { %7006 = shalt.err (!%p7003_p0)
}
 0x703   : > { %s7049_s25 = smov 128   ;;  %s7050_s26 = smov 8  }
 0x704   : > { %6709 = dma.vmem_to_hbm [thread:$0]  (%p7109_p5), %s9751_s28, 4096, %s9749_s4, %s9758_s16, %s7049_s25, %s7049_s25, %s7050_s26  }
 0x705 PF: > { %p6715_p1 = scmp.ge.s32.totalorder %s7041_s15, 2  ;;  %s5232_s27 = sand.u32 1, %s7029_s12  }
 0x706   : > { %s5233_s11 = scalar_lea.sflag [#allocation3], %s5232_s27 }
 0x707   : > { %p6712_p2 = pnand %p6715_p1, %p7113_p6 }
 0x709   : > { %7024 = dma.done.wait (!%p6712_p2), %s5233_s11, 4096  }
 0x70a   : > { %7026 = vsyncadd (!%p6712_p2), %s5233_s11, 4294963200  ;;  %p13_p3 = scmp.ge.s32.totalorder %s7096_s18, 4   ;;  %s10123_s12 = smov %s7033_s13 }
 0x70b   : > { %s10124_s13 = smov %s7037_s14  ;;  %s10125_s14 = smov %s7107_s21 }
 0x70c   : > { %s10126_s15 = smov %s7096_s18  ;;  %15 = sbr.rel (!%p13_p3) target bundleno = 3 (0x3), region = 67 }
 0x713   :  { %5238 = vsyncpa [#allocation3], 1 }
 0x714   :  { %5240 = vsyncpa [#allocation3 + $0x1], 1 }

</bundles_post_ra>
